<compile_context>
chip_gen: v5e
topology: v5e:2x2
jax: 0.10.0
libtpu: 0.0.40
codegen_flags: <defaults>
</compile_context>

<pallas_src>
import math
import functools

import jax
import jax.numpy as jnp
from jax.experimental import pallas as pl
from jax.experimental.pallas import tpu as pltpu

F32 = jnp.float32
BF16 = jnp.bfloat16

_WEIGHT_ORDER = ["wqkv", "bqkv", "wo1", "bo1",
                 "wcq", "bcq", "wckv", "bckv", "wo2", "bo2",
                 "wf1", "bf1", "wf2", "bf2",
                 "g1", "be1", "g2", "be2", "g3", "be3"]


# ---------------------------------------------------------------------------
# Fused all-layers + head kernel (post-norm, ReLU FFN -- PyTorch defaults)
# ---------------------------------------------------------------------------

def _fused_decoder_kernel(*refs, nhead, eps, use_mask):
    if use_mask:
        x_ref, mem_ref, mask_ref = refs[:3]
        rest = refs[3:]
    else:
        x_ref, mem_ref = refs[:2]
        mask_ref = None
        rest = refs[2:]
    (wqkv_ref, bqkv_ref, wo1_ref, bo1_ref,
     wcq_ref, bcq_ref, wckv_ref, bckv_ref, wo2_ref, bo2_ref,
     wf1_ref, bf1_ref, wf2_ref, bf2_ref,
     g1_ref, be1_ref, g2_ref, be2_ref, g3_ref, be3_ref,
     offw_ref, offb_ref,
     o_ref, x_sc) = rest

    B, T, D = x_ref.shape
    S = mem_ref.shape[1]
    dh = D // nhead
    l = pl.program_id(0)

    # Residual stream lives in VMEM scratch across the layer grid.
    @pl.when(l == 0)
    def _():
        x_sc[...] = x_ref[...].reshape(B * T, D)

    def ln(v, g_ref, b_ref):                      # LayerNorm over features (f32)
        mu = jnp.mean(v, axis=-1, keepdims=True)
        var = jnp.mean(jnp.square(v - mu), axis=-1, keepdims=True)
        return (v - mu) * jax.lax.rsqrt(var + eps) * g_ref[...] + b_ref[...]

    def mm(a, w_ref, b_ref):                      # bf16 MXU matmul, f32 accumulate
        return jnp.dot(a.astype(BF16), w_ref[...],
                       preferred_element_type=F32) + b_ref[...]

    # Additive mask broadcast hoisted out of the per-head loop (only once).
    mask_b = None
    if use_mask:
        mask_b = jnp.broadcast_to(mask_ref[...], (B, T, T))

    def mha(q, k, v, mask, wo_ref, bo_ref):
        # q: (B, Sq, D) bf16; k, v: (B, Sk, D) bf16 (already cast once).
        # Q already carries the 1/sqrt(dh) scale (folded into its projection).
        Sq = q.shape[1]
        outs = []
        for h in range(nhead):
            sl = slice(h * dh, (h + 1) * dh)
            s = jnp.einsum('bqd,bkd->bqk', q[:, :, sl], k[:, :, sl],
                           preferred_element_type=F32)
            if mask is not None:                  # additive mask (0 / -inf)
                s = s + mask
            s = s - jnp.max(s, axis=-1, keepdims=True)
            p = jnp.exp(s)
            p = p * pl.reciprocal(jnp.sum(p, axis=-1, keepdims=True), approx=True)
            outs.append(jnp.einsum('bqk,bkd->bqd', p.astype(BF16), v[:, :, sl],
                                   preferred_element_type=F32))
        # One lane-concat + ONE (B*Sq, D) @ (D, D) output projection.
        o = jnp.concatenate(outs, axis=-1).reshape(B * Sq, D)
        return jnp.dot(o.astype(BF16), wo_ref[...],
                       preferred_element_type=F32) + bo_ref[...]

    x2 = x_sc[...]                                # (B*T, D) f32 residual stream
    mem2 = mem_ref[...].reshape(B * S, D)

    # ---- masked self-attention (fused QKV projection, lane-dense 3D output) ----
    qkv = mm(x2, wqkv_ref, bqkv_ref).astype(BF16)           # (B*T, 3D), one cast
    q = qkv[:, :D].reshape(B, T, D)
    k = qkv[:, D:2 * D].reshape(B, T, D)
    v = qkv[:, 2 * D:].reshape(B, T, D)
    a = mha(q, k, v, mask_b, wo1_ref, bo1_ref)
    x2 = ln(x2 + a, g1_ref, be1_ref)

    # ---- cross-attention over memory (fused KV projection, no mask) ----
    q = mm(x2, wcq_ref, bcq_ref).astype(BF16).reshape(B, T, D)
    kv = mm(mem2, wckv_ref, bckv_ref).astype(BF16)          # (B*S, 2D), one cast
    k = kv[:, :D].reshape(B, S, D)
    v = kv[:, D:].reshape(B, S, D)
    a = mha(q, k, v, None, wo2_ref, bo2_ref)
    x2 = ln(x2 + a, g2_ref, be2_ref)

    # ---- feed-forward (ReLU) ----
    hid = jnp.maximum(mm(x2, wf1_ref, bf1_ref), 0.0)
    hid = mm(hid, wf2_ref, bf2_ref)
    x2 = ln(x2 + hid, g3_ref, be3_ref)

    x_sc[...] = x2

    # ---- fused offload head on the last layer (lane-padded, 128-wide output) ----
    @pl.when(l == pl.num_programs(0) - 1)
    def _():
        o_ref[...] = jnp.dot(x2.astype(BF16), offw_ref[...],
                             preferred_element_type=F32) + offb_ref[...]


# ---------------------------------------------------------------------------
# Wrapper: one pallas_call for the whole forward pass
# ---------------------------------------------------------------------------

def _resident_spec(a):
    # Whole array, same block every grid step (stays VMEM-resident).
    return pl.BlockSpec(a.shape, lambda l, nd=a.ndim: (0,) * nd)


def _stacked_spec(a):
    # Per-layer slice of a (L, ...) stack; leading dim squeezed in the kernel.
    return pl.BlockSpec((None,) + a.shape[1:],
                        lambda l, nd=a.ndim: (l,) + (0,) * (nd - 1))


def vec_transformer_decoder_forward(params, tgt, memory, tgt_mask=None, *,
                                    nhead, num_servers):
    """forward(tgt, memory, tgt_mask) -> offload_decisions, matching the PyTorch module."""
    # TODO(synk): memory_mask / key-padding masks are assumed None (the module's
    # defaults); dropout (p=0.1) is identity in inference mode and omitted.
    x = tgt.astype(F32)
    mem = memory.astype(F32)
    B, T, D = x.shape
    use_mask = tgt_mask is not None

    lw = params["layers"]
    L = lw["wqkv"].shape[0]
    npad = params["off_w"].shape[1]

    args = [x, mem]
    in_specs = [_resident_spec(x), _resident_spec(mem)]
    if use_mask:
        m = tgt_mask.astype(F32)
        args.append(m)
        in_specs.append(_resident_spec(m))
    for name in _WEIGHT_ORDER:
        args.append(lw[name])
        in_specs.append(_stacked_spec(lw[name]))
    args += [params["off_w"], params["off_b"]]
    in_specs += [_resident_spec(params["off_w"]), _resident_spec(params["off_b"])]

    out = pl.pallas_call(
        functools.partial(_fused_decoder_kernel, nhead=nhead, eps=1e-5,
                          use_mask=use_mask),
        out_shape=jax.ShapeDtypeStruct((B * T, npad), F32),
        grid=(L,),
        in_specs=in_specs,
        out_specs=pl.BlockSpec((B * T, npad), lambda l: (0, 0)),
        scratch_shapes=[pltpu.VMEM((B * T, D), F32)],
        compiler_params=pltpu.CompilerParams(dimension_semantics=("arbitrary",)),
    )(*args)
    return out[:, :num_servers].reshape(B, T, num_servers)


# ---------------------------------------------------------------------------
# Parameters: PyTorch-layout init + one-time preparation
# (transpose / fuse QKV / fold 1/sqrt(dh) / bf16 / stack layers / pad head)
# ---------------------------------------------------------------------------

def init_raw_params(key, *, d_model, num_layers, dim_feedforward, num_servers):
    keys = iter(jax.random.split(key, 1024))

    def w(shape, scale=0.05):
        return scale * jax.random.normal(next(keys), shape, F32)

    zeros = lambda s: jnp.zeros(s, F32)
    ones = lambda s: jnp.ones(s, F32)

    def layer():
        return dict(
            self_in_w=w((3 * d_model, d_model)), self_in_b=zeros((3 * d_model,)),
            self_out_w=w((d_model, d_model)), self_out_b=zeros((d_model,)),
            cross_in_w=w((3 * d_model, d_model)), cross_in_b=zeros((3 * d_model,)),
            cross_out_w=w((d_model, d_model)), cross_out_b=zeros((d_model,)),
            lin1_w=w((dim_feedforward, d_model)), lin1_b=zeros((dim_feedforward,)),
            lin2_w=w((d_model, dim_feedforward)), lin2_b=zeros((d_model,)),
            norm1_g=ones((d_model,)), norm1_b=zeros((d_model,)),
            norm2_g=ones((d_model,)), norm2_b=zeros((d_model,)),
            norm3_g=ones((d_model,)), norm3_b=zeros((d_model,)))

    return dict(layers=[layer() for _ in range(num_layers)],
                off_w=w((num_servers, d_model)), off_b=zeros((num_servers,)))


def prepare_params(raw, *, d_model, nhead, num_servers):
    D = d_model
    scale = 1.0 / math.sqrt(D // nhead)

    def prep_layer(lp):
        wq, wk, wv = lp["self_in_w"][:D], lp["self_in_w"][D:2 * D], lp["self_in_w"][2 * D:]
        bq, bk, bv = lp["self_in_b"][:D], lp["self_in_b"][D:2 * D], lp["self_in_b"][2 * D:]
        cq, ck, cv = lp["cross_in_w"][:D], lp["cross_in_w"][D:2 * D], lp["cross_in_w"][2 * D:]
        cbq, cbk, cbv = lp["cross_in_b"][:D], lp["cross_in_b"][D:2 * D], lp["cross_in_b"][2 * D:]
        return dict(
            wqkv=jnp.concatenate([wq * scale, wk, wv], 0).T.astype(BF16),
            bqkv=jnp.concatenate([bq * scale, bk, bv]).reshape(1, 3 * D),
            wo1=lp["self_out_w"].T.astype(BF16), bo1=lp["self_out_b"].reshape(1, D),
            wcq=(cq * scale).T.astype(BF16), bcq=(cbq * scale).reshape(1, D),
            wckv=jnp.concatenate([ck, cv], 0).T.astype(BF16),
            bckv=jnp.concatenate([cbk, cbv]).reshape(1, 2 * D),
            wo2=lp["cross_out_w"].T.astype(BF16), bo2=lp["cross_out_b"].reshape(1, D),
            wf1=lp["lin1_w"].T.astype(BF16), bf1=lp["lin1_b"].reshape(1, -1),
            wf2=lp["lin2_w"].T.astype(BF16), bf2=lp["lin2_b"].reshape(1, D),
            g1=lp["norm1_g"].reshape(1, D), be1=lp["norm1_b"].reshape(1, D),
            g2=lp["norm2_g"].reshape(1, D), be2=lp["norm2_b"].reshape(1, D),
            g3=lp["norm3_g"].reshape(1, D), be3=lp["norm3_b"].reshape(1, D))

    per_layer = [prep_layer(lp) for lp in raw["layers"]]
    stacked = {k: jnp.stack([lp[k] for lp in per_layer], axis=0)
               for k in _WEIGHT_ORDER}

    # Lane-dense (128-wide) padded offload head; sliced back in the wrapper.
    npad = ((num_servers + 127) // 128) * 128
    off_w = jnp.zeros((D, npad), F32).at[:, :num_servers].set(raw["off_w"].T)
    off_b = jnp.zeros((1, npad), F32).at[0, :num_servers].set(raw["off_b"])
    return dict(layers=stacked, off_w=off_w.astype(BF16), off_b=off_b)


def generate_square_subsequent_mask(sz):
    return jnp.where(jnp.tril(jnp.ones((sz, sz), F32)) == 1.0, 0.0, float("-inf"))


# ---------------------------------------------------------------------------
# Pure-JAX f32 reference (PyTorch semantics) for a tolerance check
# ---------------------------------------------------------------------------

def _reference_forward(raw, tgt, memory, tgt_mask, *, nhead, eps=1e-5):
    D = tgt.shape[-1]
    dh = D // nhead
    scale = 1.0 / math.sqrt(dh)

    def mha(q_in, kv_in, w_in, b_in, w_out, b_out, mask):
        Bq, Tq, _ = q_in.shape
        Tk = kv_in.shape[1]
        wq, wk, wv = w_in[:D], w_in[D:2 * D], w_in[2 * D:]
        bq, bk, bv = b_in[:D], b_in[D:2 * D], b_in[2 * D:]
        q = (q_in @ wq.T + bq) * scale
        k = kv_in @ wk.T + bk
        v = kv_in @ wv.T + bv
        q = q.reshape(Bq, Tq, nhead, dh).transpose(0, 2, 1, 3)
        k = k.reshape(Bq, Tk, nhead, dh).transpose(0, 2, 1, 3)
        v = v.reshape(Bq, Tk, nhead, dh).transpose(0, 2, 1, 3)
        s = jnp.einsum('bhqd,bhkd->bhqk', q, k)
        if mask is not None:
            s = s + mask
        p = jax.nn.softmax(s, axis=-1)
        o = jnp.einsum('bhqk,bhkd->bhqd', p, v)
        o = o.transpose(0, 2, 1, 3).reshape(Bq, Tq, D)
        return o @ w_out.T + b_out

    def ln(x, g, b):
        mu = x.mean(-1, keepdims=True)
        var = ((x - mu) ** 2).mean(-1, keepdims=True)
        return (x - mu) / jnp.sqrt(var + eps) * g + b

    x = tgt
    for lp in raw["layers"]:
        a = mha(x, x, lp["self_in_w"], lp["self_in_b"],
                lp["self_out_w"], lp["self_out_b"], tgt_mask)
        x = ln(x + a, lp["norm1_g"], lp["norm1_b"])
        a = mha(x, memory, lp["cross_in_w"], lp["cross_in_b"],
                lp["cross_out_w"], lp["cross_out_b"], None)
        x = ln(x + a, lp["norm2_g"], lp["norm2_b"])
        h = jnp.maximum(x @ lp["lin1_w"].T + lp["lin1_b"], 0.0)
        h = h @ lp["lin2_w"].T + lp["lin2_b"]
        x = ln(x + h, lp["norm3_g"], lp["norm3_b"])
    return x @ raw["off_w"].T + raw["off_b"]


# ---------------------------------------------------------------------------
# Main
# ---------------------------------------------------------------------------

if __name__ == "__main__":
    cfg = dict(d_model=128, nhead=4, num_layers=2,
               dim_feedforward=256, num_servers=10)
    B, T, S = 2, 8, 8

    raw = init_raw_params(jax.random.PRNGKey(0),
                          d_model=cfg["d_model"], num_layers=cfg["num_layers"],
                          dim_feedforward=cfg["dim_feedforward"],
                          num_servers=cfg["num_servers"])
    params = prepare_params(raw, d_model=cfg["d_model"], nhead=cfg["nhead"],
                            num_servers=cfg["num_servers"])

    k1, k2 = jax.random.split(jax.random.PRNGKey(0))
    tgt = jax.random.normal(k1, (B, T, cfg["d_model"]), F32)
    memory = jax.random.normal(k2, (B, S, cfg["d_model"]), F32)
    tgt_mask = generate_square_subsequent_mask(T)

    fwd = jax.jit(functools.partial(vec_transformer_decoder_forward,
                                    nhead=cfg["nhead"],
                                    num_servers=cfg["num_servers"]))
    offload = fwd(params, tgt, memory, tgt_mask)
    jax.block_until_ready(offload)

    assert offload.shape == (B, T, cfg["num_servers"])
    assert bool(jnp.all(jnp.isfinite(offload)))

    # Tolerance check vs. f32 reference (bf16 weights + approx reciprocal =>
    # ~1e-2 absolute deviation expected at these scales).
    ref = _reference_forward(raw, tgt, memory, tgt_mask, nhead=cfg["nhead"])
    max_err = float(jnp.max(jnp.abs(offload - ref)))
    assert max_err < 0.15, f"max abs error vs reference too large: {max_err}"

    print("KERNEL_OK")
</pallas_src>

<mosaic_0001>
module attributes {stable_mosaic.version = 11 : i64} {
  func.func @_fused_decoder_kernel(%arg0: i32, %arg1: memref<2x8x128xf32, #tpu.memory_space<vmem>>, %arg2: memref<2x8x128xf32, #tpu.memory_space<vmem>>, %arg3: memref<8x8xf32, #tpu.memory_space<vmem>>, %arg4: memref<1x128x384xbf16, #tpu.memory_space<vmem>>, %arg5: memref<1x1x384xf32, #tpu.memory_space<vmem>>, %arg6: memref<1x128x128xbf16, #tpu.memory_space<vmem>>, %arg7: memref<1x1x128xf32, #tpu.memory_space<vmem>>, %arg8: memref<1x128x128xbf16, #tpu.memory_space<vmem>>, %arg9: memref<1x1x128xf32, #tpu.memory_space<vmem>>, %arg10: memref<1x128x256xbf16, #tpu.memory_space<vmem>>, %arg11: memref<1x1x256xf32, #tpu.memory_space<vmem>>, %arg12: memref<1x128x128xbf16, #tpu.memory_space<vmem>>, %arg13: memref<1x1x128xf32, #tpu.memory_space<vmem>>, %arg14: memref<1x128x256xbf16, #tpu.memory_space<vmem>>, %arg15: memref<1x1x256xf32, #tpu.memory_space<vmem>>, %arg16: memref<1x256x128xbf16, #tpu.memory_space<vmem>>, %arg17: memref<1x1x128xf32, #tpu.memory_space<vmem>>, %arg18: memref<1x1x128xf32, #tpu.memory_space<vmem>>, %arg19: memref<1x1x128xf32, #tpu.memory_space<vmem>>, %arg20: memref<1x1x128xf32, #tpu.memory_space<vmem>>, %arg21: memref<1x1x128xf32, #tpu.memory_space<vmem>>, %arg22: memref<1x1x128xf32, #tpu.memory_space<vmem>>, %arg23: memref<1x1x128xf32, #tpu.memory_space<vmem>>, %arg24: memref<128x128xbf16, #tpu.memory_space<vmem>>, %arg25: memref<1x128xf32, #tpu.memory_space<vmem>>, %arg26: memref<16x128xf32, #tpu.memory_space<vmem>>, %arg27: memref<16x128xf32, #tpu.memory_space<vmem>>) attributes {dimension_semantics = [#tpu.dimension_semantics<arbitrary>], iteration_bounds = array<i64: 2>, scalar_prefetch = 0 : i64, scratch_operands = 1 : i64, tpu.core_type = #tpu.core_type<tc>, window_params = [{pipeline_mode = #tpu.pipeline_mode<synchronous>, transform_indices = @transform_0, window_bounds = array<i64: 2, 8, 128>}, {pipeline_mode = #tpu.pipeline_mode<synchronous>, transform_indices = @transform_1, window_bounds = array<i64: 2, 8, 128>}, {pipeline_mode = #tpu.pipeline_mode<synchronous>, transform_indices = @transform_2, window_bounds = array<i64: 8, 8>}, {transform_indices = @transform_3, window_bounds = array<i64: 1, 128, 384>}, {transform_indices = @transform_4, window_bounds = array<i64: 1, 1, 384>}, {transform_indices = @transform_5, window_bounds = array<i64: 1, 128, 128>}, {transform_indices = @transform_6, window_bounds = array<i64: 1, 1, 128>}, {transform_indices = @transform_7, window_bounds = array<i64: 1, 128, 128>}, {transform_indices = @transform_8, window_bounds = array<i64: 1, 1, 128>}, {transform_indices = @transform_9, window_bounds = array<i64: 1, 128, 256>}, {transform_indices = @transform_10, window_bounds = array<i64: 1, 1, 256>}, {transform_indices = @transform_11, window_bounds = array<i64: 1, 128, 128>}, {transform_indices = @transform_12, window_bounds = array<i64: 1, 1, 128>}, {transform_indices = @transform_13, window_bounds = array<i64: 1, 128, 256>}, {transform_indices = @transform_14, window_bounds = array<i64: 1, 1, 256>}, {transform_indices = @transform_15, window_bounds = array<i64: 1, 256, 128>}, {transform_indices = @transform_16, window_bounds = array<i64: 1, 1, 128>}, {transform_indices = @transform_17, window_bounds = array<i64: 1, 1, 128>}, {transform_indices = @transform_18, window_bounds = array<i64: 1, 1, 128>}, {transform_indices = @transform_19, window_bounds = array<i64: 1, 1, 128>}, {transform_indices = @transform_20, window_bounds = array<i64: 1, 1, 128>}, {transform_indices = @transform_21, window_bounds = array<i64: 1, 1, 128>}, {transform_indices = @transform_22, window_bounds = array<i64: 1, 1, 128>}, {pipeline_mode = #tpu.pipeline_mode<synchronous>, transform_indices = @transform_23, window_bounds = array<i64: 128, 128>}, {pipeline_mode = #tpu.pipeline_mode<synchronous>, transform_indices = @transform_24, window_bounds = array<i64: 1, 128>}, {pipeline_mode = #tpu.pipeline_mode<synchronous>, transform_indices = @transform_25, window_bounds = array<i64: 16, 128>}]} {
    %c0_i32 = arith.constant 0 : i32
    %0 = arith.cmpi eq, %arg0, %c0_i32 : i32
    %1 = arith.extui %0 : i1 to i32
    %c0_i32_0 = arith.constant 0 : i32
    %2 = arith.cmpi ne, %1, %c0_i32_0 : i32
    scf.if %2 {
      %c0_124 = arith.constant 0 : index
      %c0_125 = arith.constant 0 : index
      %c0_126 = arith.constant 0 : index
      %302 = vector.load %arg1[%c0_124, %c0_125, %c0_126] : memref<2x8x128xf32, #tpu.memory_space<vmem>>, vector<2x8x128xf32>
      %303 = vector.shape_cast %302 : vector<2x8x128xf32> to vector<16x128xf32>
      %c0_127 = arith.constant 0 : index
      %c0_128 = arith.constant 0 : index
      %304 = vector.load %arg27[%c0_127, %c0_128] : memref<16x128xf32, #tpu.memory_space<vmem>>, vector<16x128xf32>
      tpu.vector_store %arg27[%c0_127, %c0_128], %303 {strides = array<i32>} : memref<16x128xf32, #tpu.memory_space<vmem>>, vector<16x128xf32>,
    } else {
    }
    %c0 = arith.constant 0 : index
    %c0_1 = arith.constant 0 : index
    %3 = vector.load %arg3[%c0, %c0_1] : memref<8x8xf32, #tpu.memory_space<vmem>>, vector<8x8xf32>
    %4 = vector.shape_cast %3 : vector<8x8xf32> to vector<1x8x8xf32>
    %5 = vector.broadcast %4 : vector<1x8x8xf32> to vector<2x8x8xf32>
    %c0_2 = arith.constant 0 : index
    %c0_3 = arith.constant 0 : index
    %6 = vector.load %arg27[%c0_2, %c0_3] : memref<16x128xf32, #tpu.memory_space<vmem>>, vector<16x128xf32>
    %c0_4 = arith.constant 0 : index
    %c0_5 = arith.constant 0 : index
    %c0_6 = arith.constant 0 : index
    %7 = vector.load %arg2[%c0_4, %c0_5, %c0_6] : memref<2x8x128xf32, #tpu.memory_space<vmem>>, vector<2x8x128xf32>
    %8 = vector.shape_cast %7 : vector<2x8x128xf32> to vector<16x128xf32>
    %9 = arith.truncf %6 : vector<16x128xf32> to vector<16x128xbf16>
    %c0_7 = arith.constant 0 : index
    %c0_8 = arith.constant 0 : index
    %c0_9 = arith.constant 0 : index
    %10 = vector.load %arg4[%c0_7, %c0_8, %c0_9] : memref<1x128x384xbf16, #tpu.memory_space<vmem>>, vector<1x128x384xbf16>
    %11 = vector.shape_cast %10 : vector<1x128x384xbf16> to vector<128x384xbf16>
    %cst = arith.constant dense<0.000000e+00> : vector<16x384xf32>
    %12 = tpu.matmul %9, %11, %cst {dimension_numbers = #tpu.dot_dimension_numbers<[1], [0], [0], [1], [0, 0, 1, 1], [], []>} : vector<16x128xbf16>, vector<128x384xbf16>, vector<16x384xf32> -> vector<16x384xf32>
    %c0_10 = arith.constant 0 : index
    %c0_11 = arith.constant 0 : index
    %c0_12 = arith.constant 0 : index
    %13 = vector.load %arg5[%c0_10, %c0_11, %c0_12] : memref<1x1x384xf32, #tpu.memory_space<vmem>>, vector<1x1x384xf32>
    %14 = vector.shape_cast %13 : vector<1x1x384xf32> to vector<1x384xf32>
    %15 = vector.broadcast %14 : vector<1x384xf32> to vector<16x384xf32>
    %16 = arith.addf %12, %15 : vector<16x384xf32>
    %17 = arith.truncf %16 : vector<16x384xf32> to vector<16x384xbf16>
    %18 = vector.extract_strided_slice %17 {offsets = [0, 0], sizes = [16, 128], strides = [1, 1]} : vector<16x384xbf16> to vector<16x128xbf16>
    %19 = vector.shape_cast %18 : vector<16x128xbf16> to vector<2x8x128xbf16>
    %20 = vector.extract_strided_slice %17 {offsets = [0, 128], sizes = [16, 128], strides = [1, 1]} : vector<16x384xbf16> to vector<16x128xbf16>
    %21 = vector.shape_cast %20 : vector<16x128xbf16> to vector<2x8x128xbf16>
    %22 = vector.extract_strided_slice %17 {offsets = [0, 256], sizes = [16, 128], strides = [1, 1]} : vector<16x384xbf16> to vector<16x128xbf16>
    %23 = vector.shape_cast %22 : vector<16x128xbf16> to vector<2x8x128xbf16>
    %24 = vector.extract_strided_slice %19 {offsets = [0, 0, 0], sizes = [2, 8, 32], strides = [1, 1, 1]} : vector<2x8x128xbf16> to vector<2x8x32xbf16>
    %25 = vector.extract_strided_slice %21 {offsets = [0, 0, 0], sizes = [2, 8, 32], strides = [1, 1, 1]} : vector<2x8x128xbf16> to vector<2x8x32xbf16>
    "tpu.trace_start"() <{level = 10 : i32, message = "bqd,bkd->bqk"}> : () -> ()
    %cst_13 = arith.constant dense<0.000000e+00> : vector<2x8x8xf32>
    %26 = tpu.matmul %24, %25, %cst_13 {dimension_numbers = #tpu.dot_dimension_numbers<[2], [2], [1], [1], [0, 0, 0, 1, 1, 1], [0], [0]>} : vector<2x8x32xbf16>, vector<2x8x32xbf16>, vector<2x8x8xf32> -> vector<2x8x8xf32>
    "tpu.trace_stop"() : () -> ()
    %27 = arith.addf %26, %5 : vector<2x8x8xf32>
    %cst_14 = arith.constant dense<0xFF800000> : vector<2x8xf32>
    %28 = vector.multi_reduction <maximumf>, %27, %cst_14 [2] : vector<2x8x8xf32> to vector<2x8xf32>
    %29 = vector.shape_cast %28 : vector<2x8xf32> to vector<2x8x1xf32>
    %30 = vector.broadcast %29 : vector<2x8x1xf32> to vector<2x8x8xf32>
    %31 = arith.subf %27, %30 : vector<2x8x8xf32>
    %32 = math.exp %31 : vector<2x8x8xf32>
    %cst_15 = arith.constant dense<0.000000e+00> : vector<2x8xf32>
    %33 = vector.multi_reduction <add>, %32, %cst_15 [2] : vector<2x8x8xf32> to vector<2x8xf32>
    %34 = vector.shape_cast %33 : vector<2x8xf32> to vector<2x8x1xf32>
    %35 = tpu.reciprocal %34 {approx = true} : vector<2x8x1xf32> -> vector<2x8x1xf32>
    %36 = vector.broadcast %35 : vector<2x8x1xf32> to vector<2x8x8xf32>
    %37 = arith.mulf %32, %36 : vector<2x8x8xf32>
    %38 = arith.truncf %37 : vector<2x8x8xf32> to vector<2x8x8xbf16>
    %39 = vector.extract_strided_slice %23 {offsets = [0, 0, 0], sizes = [2, 8, 32], strides = [1, 1, 1]} : vector<2x8x128xbf16> to vector<2x8x32xbf16>
    "tpu.trace_start"() <{level = 10 : i32, message = "bqk,bkd->bqd"}> : () -> ()
    %cst_16 = arith.constant dense<0.000000e+00> : vector<2x8x32xf32>
    %40 = tpu.matmul %38, %39, %cst_16 {dimension_numbers = #tpu.dot_dimension_numbers<[2], [1], [1], [2], [0, 0, 0, 1, 1, 2], [0], [0]>} : vector<2x8x8xbf16>, vector<2x8x32xbf16>, vector<2x8x32xf32> -> vector<2x8x32xf32>
    "tpu.trace_stop"() : () -> ()
    %41 = vector.extract_strided_slice %19 {offsets = [0, 0, 32], sizes = [2, 8, 32], strides = [1, 1, 1]} : vector<2x8x128xbf16> to vector<2x8x32xbf16>
    %42 = vector.extract_strided_slice %21 {offsets = [0, 0, 32], sizes = [2, 8, 32], strides = [1, 1, 1]} : vector<2x8x128xbf16> to vector<2x8x32xbf16>
    "tpu.trace_start"() <{level = 10 : i32, message = "bqd,bkd->bqk"}> : () -> ()
    %cst_17 = arith.constant dense<0.000000e+00> : vector<2x8x8xf32>
    %43 = tpu.matmul %41, %42, %cst_17 {dimension_numbers = #tpu.dot_dimension_numbers<[2], [2], [1], [1], [0, 0, 0, 1, 1, 1], [0], [0]>} : vector<2x8x32xbf16>, vector<2x8x32xbf16>, vector<2x8x8xf32> -> vector<2x8x8xf32>
    "tpu.trace_stop"() : () -> ()
    %44 = arith.addf %43, %5 : vector<2x8x8xf32>
    %cst_18 = arith.constant dense<0xFF800000> : vector<2x8xf32>
    %45 = vector.multi_reduction <maximumf>, %44, %cst_18 [2] : vector<2x8x8xf32> to vector<2x8xf32>
    %46 = vector.shape_cast %45 : vector<2x8xf32> to vector<2x8x1xf32>
    %47 = vector.broadcast %46 : vector<2x8x1xf32> to vector<2x8x8xf32>
    %48 = arith.subf %44, %47 : vector<2x8x8xf32>
    %49 = math.exp %48 : vector<2x8x8xf32>
    %cst_19 = arith.constant dense<0.000000e+00> : vector<2x8xf32>
    %50 = vector.multi_reduction <add>, %49, %cst_19 [2] : vector<2x8x8xf32> to vector<2x8xf32>
    %51 = vector.shape_cast %50 : vector<2x8xf32> to vector<2x8x1xf32>
    %52 = tpu.reciprocal %51 {approx = true} : vector<2x8x1xf32> -> vector<2x8x1xf32>
    %53 = vector.broadcast %52 : vector<2x8x1xf32> to vector<2x8x8xf32>
    %54 = arith.mulf %49, %53 : vector<2x8x8xf32>
    %55 = arith.truncf %54 : vector<2x8x8xf32> to vector<2x8x8xbf16>
    %56 = vector.extract_strided_slice %23 {offsets = [0, 0, 32], sizes = [2, 8, 32], strides = [1, 1, 1]} : vector<2x8x128xbf16> to vector<2x8x32xbf16>
    "tpu.trace_start"() <{level = 10 : i32, message = "bqk,bkd->bqd"}> : () -> ()
    %cst_20 = arith.constant dense<0.000000e+00> : vector<2x8x32xf32>
    %57 = tpu.matmul %55, %56, %cst_20 {dimension_numbers = #tpu.dot_dimension_numbers<[2], [1], [1], [2], [0, 0, 0, 1, 1, 2], [0], [0]>} : vector<2x8x8xbf16>, vector<2x8x32xbf16>, vector<2x8x32xf32> -> vector<2x8x32xf32>
    "tpu.trace_stop"() : () -> ()
    %58 = vector.extract_strided_slice %19 {offsets = [0, 0, 64], sizes = [2, 8, 32], strides = [1, 1, 1]} : vector<2x8x128xbf16> to vector<2x8x32xbf16>
    %59 = vector.extract_strided_slice %21 {offsets = [0, 0, 64], sizes = [2, 8, 32], strides = [1, 1, 1]} : vector<2x8x128xbf16> to vector<2x8x32xbf16>
    "tpu.trace_start"() <{level = 10 : i32, message = "bqd,bkd->bqk"}> : () -> ()
    %cst_21 = arith.constant dense<0.000000e+00> : vector<2x8x8xf32>
    %60 = tpu.matmul %58, %59, %cst_21 {dimension_numbers = #tpu.dot_dimension_numbers<[2], [2], [1], [1], [0, 0, 0, 1, 1, 1], [0], [0]>} : vector<2x8x32xbf16>, vector<2x8x32xbf16>, vector<2x8x8xf32> -> vector<2x8x8xf32>
    "tpu.trace_stop"() : () -> ()
    %61 = arith.addf %60, %5 : vector<2x8x8xf32>
    %cst_22 = arith.constant dense<0xFF800000> : vector<2x8xf32>
    %62 = vector.multi_reduction <maximumf>, %61, %cst_22 [2] : vector<2x8x8xf32> to vector<2x8xf32>
    %63 = vector.shape_cast %62 : vector<2x8xf32> to vector<2x8x1xf32>
    %64 = vector.broadcast %63 : vector<2x8x1xf32> to vector<2x8x8xf32>
    %65 = arith.subf %61, %64 : vector<2x8x8xf32>
    %66 = math.exp %65 : vector<2x8x8xf32>
    %cst_23 = arith.constant dense<0.000000e+00> : vector<2x8xf32>
    %67 = vector.multi_reduction <add>, %66, %cst_23 [2] : vector<2x8x8xf32> to vector<2x8xf32>
    %68 = vector.shape_cast %67 : vector<2x8xf32> to vector<2x8x1xf32>
    %69 = tpu.reciprocal %68 {approx = true} : vector<2x8x1xf32> -> vector<2x8x1xf32>
    %70 = vector.broadcast %69 : vector<2x8x1xf32> to vector<2x8x8xf32>
    %71 = arith.mulf %66, %70 : vector<2x8x8xf32>
    %72 = arith.truncf %71 : vector<2x8x8xf32> to vector<2x8x8xbf16>
    %73 = vector.extract_strided_slice %23 {offsets = [0, 0, 64], sizes = [2, 8, 32], strides = [1, 1, 1]} : vector<2x8x128xbf16> to vector<2x8x32xbf16>
    "tpu.trace_start"() <{level = 10 : i32, message = "bqk,bkd->bqd"}> : () -> ()
    %cst_24 = arith.constant dense<0.000000e+00> : vector<2x8x32xf32>
    %74 = tpu.matmul %72, %73, %cst_24 {dimension_numbers = #tpu.dot_dimension_numbers<[2], [1], [1], [2], [0, 0, 0, 1, 1, 2], [0], [0]>} : vector<2x8x8xbf16>, vector<2x8x32xbf16>, vector<2x8x32xf32> -> vector<2x8x32xf32>
    "tpu.trace_stop"() : () -> ()
    %75 = vector.extract_strided_slice %19 {offsets = [0, 0, 96], sizes = [2, 8, 32], strides = [1, 1, 1]} : vector<2x8x128xbf16> to vector<2x8x32xbf16>
    %76 = vector.extract_strided_slice %21 {offsets = [0, 0, 96], sizes = [2, 8, 32], strides = [1, 1, 1]} : vector<2x8x128xbf16> to vector<2x8x32xbf16>
    "tpu.trace_start"() <{level = 10 : i32, message = "bqd,bkd->bqk"}> : () -> ()
    %cst_25 = arith.constant dense<0.000000e+00> : vector<2x8x8xf32>
    %77 = tpu.matmul %75, %76, %cst_25 {dimension_numbers = #tpu.dot_dimension_numbers<[2], [2], [1], [1], [0, 0, 0, 1, 1, 1], [0], [0]>} : vector<2x8x32xbf16>, vector<2x8x32xbf16>, vector<2x8x8xf32> -> vector<2x8x8xf32>
    "tpu.trace_stop"() : () -> ()
    %78 = arith.addf %77, %5 : vector<2x8x8xf32>
    %cst_26 = arith.constant dense<0xFF800000> : vector<2x8xf32>
    %79 = vector.multi_reduction <maximumf>, %78, %cst_26 [2] : vector<2x8x8xf32> to vector<2x8xf32>
    %80 = vector.shape_cast %79 : vector<2x8xf32> to vector<2x8x1xf32>
    %81 = vector.broadcast %80 : vector<2x8x1xf32> to vector<2x8x8xf32>
    %82 = arith.subf %78, %81 : vector<2x8x8xf32>
    %83 = math.exp %82 : vector<2x8x8xf32>
    %cst_27 = arith.constant dense<0.000000e+00> : vector<2x8xf32>
    %84 = vector.multi_reduction <add>, %83, %cst_27 [2] : vector<2x8x8xf32> to vector<2x8xf32>
    %85 = vector.shape_cast %84 : vector<2x8xf32> to vector<2x8x1xf32>
    %86 = tpu.reciprocal %85 {approx = true} : vector<2x8x1xf32> -> vector<2x8x1xf32>
    %87 = vector.broadcast %86 : vector<2x8x1xf32> to vector<2x8x8xf32>
    %88 = arith.mulf %83, %87 : vector<2x8x8xf32>
    %89 = arith.truncf %88 : vector<2x8x8xf32> to vector<2x8x8xbf16>
    %90 = vector.extract_strided_slice %23 {offsets = [0, 0, 96], sizes = [2, 8, 32], strides = [1, 1, 1]} : vector<2x8x128xbf16> to vector<2x8x32xbf16>
    "tpu.trace_start"() <{level = 10 : i32, message = "bqk,bkd->bqd"}> : () -> ()
    %cst_28 = arith.constant dense<0.000000e+00> : vector<2x8x32xf32>
    %91 = tpu.matmul %89, %90, %cst_28 {dimension_numbers = #tpu.dot_dimension_numbers<[2], [1], [1], [2], [0, 0, 0, 1, 1, 2], [0], [0]>} : vector<2x8x8xbf16>, vector<2x8x32xbf16>, vector<2x8x32xf32> -> vector<2x8x32xf32>
    "tpu.trace_stop"() : () -> ()
    %92 = tpu.concatenate %40, %57, %74, %91 in 2 : vector<2x8x32xf32>, vector<2x8x32xf32>, vector<2x8x32xf32>, vector<2x8x32xf32> -> vector<2x8x128xf32>
    %93 = vector.shape_cast %92 : vector<2x8x128xf32> to vector<16x128xf32>
    %94 = arith.truncf %93 : vector<16x128xf32> to vector<16x128xbf16>
    %c0_29 = arith.constant 0 : index
    %c0_30 = arith.constant 0 : index
    %c0_31 = arith.constant 0 : index
    %95 = vector.load %arg6[%c0_29, %c0_30, %c0_31] : memref<1x128x128xbf16, #tpu.memory_space<vmem>>, vector<1x128x128xbf16>
    %96 = vector.shape_cast %95 : vector<1x128x128xbf16> to vector<128x128xbf16>
    %cst_32 = arith.constant dense<0.000000e+00> : vector<16x128xf32>
    %97 = tpu.matmul %94, %96, %cst_32 {dimension_numbers = #tpu.dot_dimension_numbers<[1], [0], [0], [1], [0, 0, 1, 1], [], []>} : vector<16x128xbf16>, vector<128x128xbf16>, vector<16x128xf32> -> vector<16x128xf32>
    %c0_33 = arith.constant 0 : index
    %c0_34 = arith.constant 0 : index
    %c0_35 = arith.constant 0 : index
    %98 = vector.load %arg7[%c0_33, %c0_34, %c0_35] : memref<1x1x128xf32, #tpu.memory_space<vmem>>, vector<1x1x128xf32>
    %99 = vector.shape_cast %98 : vector<1x1x128xf32> to vector<1x128xf32>
    %100 = vector.broadcast %99 : vector<1x128xf32> to vector<16x128xf32>
    %101 = arith.addf %97, %100 : vector<16x128xf32>
    %102 = arith.addf %6, %101 : vector<16x128xf32>
    %cst_36 = arith.constant dense<0.000000e+00> : vector<16xf32>
    %103 = vector.multi_reduction <add>, %102, %cst_36 [1] : vector<16x128xf32> to vector<16xf32>
    %104 = vector.shape_cast %103 : vector<16xf32> to vector<16x1xf32>
    %cst_37 = arith.constant 1.280000e+02 : f32
    %105 = vector.broadcast %cst_37 : f32 to vector<16x1xf32>
    %106 = arith.divf %104, %105 : vector<16x1xf32>
    %107 = vector.broadcast %106 : vector<16x1xf32> to vector<16x128xf32>
    %108 = arith.subf %102, %107 : vector<16x128xf32>
    %109 = arith.mulf %108, %108 : vector<16x128xf32>
    %cst_38 = arith.constant dense<0.000000e+00> : vector<16xf32>
    %110 = vector.multi_reduction <add>, %109, %cst_38 [1] : vector<16x128xf32> to vector<16xf32>
    %111 = vector.shape_cast %110 : vector<16xf32> to vector<16x1xf32>
    %cst_39 = arith.constant 1.280000e+02 : f32
    %112 = vector.broadcast %cst_39 : f32 to vector<16x1xf32>
    %113 = arith.divf %111, %112 : vector<16x1xf32>
    %114 = vector.broadcast %106 : vector<16x1xf32> to vector<16x128xf32>
    %115 = arith.subf %102, %114 : vector<16x128xf32>
    %cst_40 = arith.constant 9.99999974E-6 : f32
    %116 = vector.broadcast %cst_40 : f32 to vector<16x1xf32>
    %117 = arith.addf %113, %116 : vector<16x1xf32>
    %118 = math.rsqrt %117 : vector<16x1xf32>
    %119 = vector.broadcast %118 : vector<16x1xf32> to vector<16x128xf32>
    %120 = arith.mulf %115, %119 : vector<16x128xf32>
    %c0_41 = arith.constant 0 : index
    %c0_42 = arith.constant 0 : index
    %c0_43 = arith.constant 0 : index
    %121 = vector.load %arg18[%c0_41, %c0_42, %c0_43] : memref<1x1x128xf32, #tpu.memory_space<vmem>>, vector<1x1x128xf32>
    %122 = vector.shape_cast %121 : vector<1x1x128xf32> to vector<1x128xf32>
    %123 = vector.broadcast %122 : vector<1x128xf32> to vector<16x128xf32>
    %124 = arith.mulf %120, %123 : vector<16x128xf32>
    %c0_44 = arith.constant 0 : index
    %c0_45 = arith.constant 0 : index
    %c0_46 = arith.constant 0 : index
    %125 = vector.load %arg19[%c0_44, %c0_45, %c0_46] : memref<1x1x128xf32, #tpu.memory_space<vmem>>, vector<1x1x128xf32>
    %126 = vector.shape_cast %125 : vector<1x1x128xf32> to vector<1x128xf32>
    %127 = vector.broadcast %126 : vector<1x128xf32> to vector<16x128xf32>
    %128 = arith.addf %124, %127 : vector<16x128xf32>
    %129 = arith.truncf %128 : vector<16x128xf32> to vector<16x128xbf16>
    %c0_47 = arith.constant 0 : index
    %c0_48 = arith.constant 0 : index
    %c0_49 = arith.constant 0 : index
    %130 = vector.load %arg8[%c0_47, %c0_48, %c0_49] : memref<1x128x128xbf16, #tpu.memory_space<vmem>>, vector<1x128x128xbf16>
    %131 = vector.shape_cast %130 : vector<1x128x128xbf16> to vector<128x128xbf16>
    %cst_50 = arith.constant dense<0.000000e+00> : vector<16x128xf32>
    %132 = tpu.matmul %129, %131, %cst_50 {dimension_numbers = #tpu.dot_dimension_numbers<[1], [0], [0], [1], [0, 0, 1, 1], [], []>} : vector<16x128xbf16>, vector<128x128xbf16>, vector<16x128xf32> -> vector<16x128xf32>
    %c0_51 = arith.constant 0 : index
    %c0_52 = arith.constant 0 : index
    %c0_53 = arith.constant 0 : index
    %133 = vector.load %arg9[%c0_51, %c0_52, %c0_53] : memref<1x1x128xf32, #tpu.memory_space<vmem>>, vector<1x1x128xf32>
    %134 = vector.shape_cast %133 : vector<1x1x128xf32> to vector<1x128xf32>
    %135 = vector.broadcast %134 : vector<1x128xf32> to vector<16x128xf32>
    %136 = arith.addf %132, %135 : vector<16x128xf32>
    %137 = arith.truncf %136 : vector<16x128xf32> to vector<16x128xbf16>
    %138 = vector.shape_cast %137 : vector<16x128xbf16> to vector<2x8x128xbf16>
    %139 = arith.truncf %8 : vector<16x128xf32> to vector<16x128xbf16>
    %c0_54 = arith.constant 0 : index
    %c0_55 = arith.constant 0 : index
    %c0_56 = arith.constant 0 : index
    %140 = vector.load %arg10[%c0_54, %c0_55, %c0_56] : memref<1x128x256xbf16, #tpu.memory_space<vmem>>, vector<1x128x256xbf16>
    %141 = vector.shape_cast %140 : vector<1x128x256xbf16> to vector<128x256xbf16>
    %cst_57 = arith.constant dense<0.000000e+00> : vector<16x256xf32>
    %142 = tpu.matmul %139, %141, %cst_57 {dimension_numbers = #tpu.dot_dimension_numbers<[1], [0], [0], [1], [0, 0, 1, 1], [], []>} : vector<16x128xbf16>, vector<128x256xbf16>, vector<16x256xf32> -> vector<16x256xf32>
    %c0_58 = arith.constant 0 : index
    %c0_59 = arith.constant 0 : index
    %c0_60 = arith.constant 0 : index
    %143 = vector.load %arg11[%c0_58, %c0_59, %c0_60] : memref<1x1x256xf32, #tpu.memory_space<vmem>>, vector<1x1x256xf32>
    %144 = vector.shape_cast %143 : vector<1x1x256xf32> to vector<1x256xf32>
    %145 = vector.broadcast %144 : vector<1x256xf32> to vector<16x256xf32>
    %146 = arith.addf %142, %145 : vector<16x256xf32>
    %147 = arith.truncf %146 : vector<16x256xf32> to vector<16x256xbf16>
    %148 = vector.extract_strided_slice %147 {offsets = [0, 0], sizes = [16, 128], strides = [1, 1]} : vector<16x256xbf16> to vector<16x128xbf16>
    %149 = vector.shape_cast %148 : vector<16x128xbf16> to vector<2x8x128xbf16>
    %150 = vector.extract_strided_slice %147 {offsets = [0, 128], sizes = [16, 128], strides = [1, 1]} : vector<16x256xbf16> to vector<16x128xbf16>
    %151 = vector.shape_cast %150 : vector<16x128xbf16> to vector<2x8x128xbf16>
    %152 = vector.extract_strided_slice %138 {offsets = [0, 0, 0], sizes = [2, 8, 32], strides = [1, 1, 1]} : vector<2x8x128xbf16> to vector<2x8x32xbf16>
    %153 = vector.extract_strided_slice %149 {offsets = [0, 0, 0], sizes = [2, 8, 32], strides = [1, 1, 1]} : vector<2x8x128xbf16> to vector<2x8x32xbf16>
    "tpu.trace_start"() <{level = 10 : i32, message = "bqd,bkd->bqk"}> : () -> ()
    %cst_61 = arith.constant dense<0.000000e+00> : vector<2x8x8xf32>
    %154 = tpu.matmul %152, %153, %cst_61 {dimension_numbers = #tpu.dot_dimension_numbers<[2], [2], [1], [1], [0, 0, 0, 1, 1, 1], [0], [0]>} : vector<2x8x32xbf16>, vector<2x8x32xbf16>, vector<2x8x8xf32> -> vector<2x8x8xf32>
    "tpu.trace_stop"() : () -> ()
    %cst_62 = arith.constant dense<0xFF800000> : vector<2x8xf32>
    %155 = vector.multi_reduction <maximumf>, %154, %cst_62 [2] : vector<2x8x8xf32> to vector<2x8xf32>
    %156 = vector.shape_cast %155 : vector<2x8xf32> to vector<2x8x1xf32>
    %157 = vector.broadcast %156 : vector<2x8x1xf32> to vector<2x8x8xf32>
    %158 = arith.subf %154, %157 : vector<2x8x8xf32>
    %159 = math.exp %158 : vector<2x8x8xf32>
    %cst_63 = arith.constant dense<0.000000e+00> : vector<2x8xf32>
    %160 = vector.multi_reduction <add>, %159, %cst_63 [2] : vector<2x8x8xf32> to vector<2x8xf32>
    %161 = vector.shape_cast %160 : vector<2x8xf32> to vector<2x8x1xf32>
    %162 = tpu.reciprocal %161 {approx = true} : vector<2x8x1xf32> -> vector<2x8x1xf32>
    %163 = vector.broadcast %162 : vector<2x8x1xf32> to vector<2x8x8xf32>
    %164 = arith.mulf %159, %163 : vector<2x8x8xf32>
    %165 = arith.truncf %164 : vector<2x8x8xf32> to vector<2x8x8xbf16>
    %166 = vector.extract_strided_slice %151 {offsets = [0, 0, 0], sizes = [2, 8, 32], strides = [1, 1, 1]} : vector<2x8x128xbf16> to vector<2x8x32xbf16>
    "tpu.trace_start"() <{level = 10 : i32, message = "bqk,bkd->bqd"}> : () -> ()
    %cst_64 = arith.constant dense<0.000000e+00> : vector<2x8x32xf32>
    %167 = tpu.matmul %165, %166, %cst_64 {dimension_numbers = #tpu.dot_dimension_numbers<[2], [1], [1], [2], [0, 0, 0, 1, 1, 2], [0], [0]>} : vector<2x8x8xbf16>, vector<2x8x32xbf16>, vector<2x8x32xf32> -> vector<2x8x32xf32>
    "tpu.trace_stop"() : () -> ()
    %168 = vector.extract_strided_slice %138 {offsets = [0, 0, 32], sizes = [2, 8, 32], strides = [1, 1, 1]} : vector<2x8x128xbf16> to vector<2x8x32xbf16>
    %169 = vector.extract_strided_slice %149 {offsets = [0, 0, 32], sizes = [2, 8, 32], strides = [1, 1, 1]} : vector<2x8x128xbf16> to vector<2x8x32xbf16>
    "tpu.trace_start"() <{level = 10 : i32, message = "bqd,bkd->bqk"}> : () -> ()
    %cst_65 = arith.constant dense<0.000000e+00> : vector<2x8x8xf32>
    %170 = tpu.matmul %168, %169, %cst_65 {dimension_numbers = #tpu.dot_dimension_numbers<[2], [2], [1], [1], [0, 0, 0, 1, 1, 1], [0], [0]>} : vector<2x8x32xbf16>, vector<2x8x32xbf16>, vector<2x8x8xf32> -> vector<2x8x8xf32>
    "tpu.trace_stop"() : () -> ()
    %cst_66 = arith.constant dense<0xFF800000> : vector<2x8xf32>
    %171 = vector.multi_reduction <maximumf>, %170, %cst_66 [2] : vector<2x8x8xf32> to vector<2x8xf32>
    %172 = vector.shape_cast %171 : vector<2x8xf32> to vector<2x8x1xf32>
    %173 = vector.broadcast %172 : vector<2x8x1xf32> to vector<2x8x8xf32>
    %174 = arith.subf %170, %173 : vector<2x8x8xf32>
    %175 = math.exp %174 : vector<2x8x8xf32>
    %cst_67 = arith.constant dense<0.000000e+00> : vector<2x8xf32>
    %176 = vector.multi_reduction <add>, %175, %cst_67 [2] : vector<2x8x8xf32> to vector<2x8xf32>
    %177 = vector.shape_cast %176 : vector<2x8xf32> to vector<2x8x1xf32>
    %178 = tpu.reciprocal %177 {approx = true} : vector<2x8x1xf32> -> vector<2x8x1xf32>
    %179 = vector.broadcast %178 : vector<2x8x1xf32> to vector<2x8x8xf32>
    %180 = arith.mulf %175, %179 : vector<2x8x8xf32>
    %181 = arith.truncf %180 : vector<2x8x8xf32> to vector<2x8x8xbf16>
    %182 = vector.extract_strided_slice %151 {offsets = [0, 0, 32], sizes = [2, 8, 32], strides = [1, 1, 1]} : vector<2x8x128xbf16> to vector<2x8x32xbf16>
    "tpu.trace_start"() <{level = 10 : i32, message = "bqk,bkd->bqd"}> : () -> ()
    %cst_68 = arith.constant dense<0.000000e+00> : vector<2x8x32xf32>
    %183 = tpu.matmul %181, %182, %cst_68 {dimension_numbers = #tpu.dot_dimension_numbers<[2], [1], [1], [2], [0, 0, 0, 1, 1, 2], [0], [0]>} : vector<2x8x8xbf16>, vector<2x8x32xbf16>, vector<2x8x32xf32> -> vector<2x8x32xf32>
    "tpu.trace_stop"() : () -> ()
    %184 = vector.extract_strided_slice %138 {offsets = [0, 0, 64], sizes = [2, 8, 32], strides = [1, 1, 1]} : vector<2x8x128xbf16> to vector<2x8x32xbf16>
    %185 = vector.extract_strided_slice %149 {offsets = [0, 0, 64], sizes = [2, 8, 32], strides = [1, 1, 1]} : vector<2x8x128xbf16> to vector<2x8x32xbf16>
    "tpu.trace_start"() <{level = 10 : i32, message = "bqd,bkd->bqk"}> : () -> ()
    %cst_69 = arith.constant dense<0.000000e+00> : vector<2x8x8xf32>
    %186 = tpu.matmul %184, %185, %cst_69 {dimension_numbers = #tpu.dot_dimension_numbers<[2], [2], [1], [1], [0, 0, 0, 1, 1, 1], [0], [0]>} : vector<2x8x32xbf16>, vector<2x8x32xbf16>, vector<2x8x8xf32> -> vector<2x8x8xf32>
    "tpu.trace_stop"() : () -> ()
    %cst_70 = arith.constant dense<0xFF800000> : vector<2x8xf32>
    %187 = vector.multi_reduction <maximumf>, %186, %cst_70 [2] : vector<2x8x8xf32> to vector<2x8xf32>
    %188 = vector.shape_cast %187 : vector<2x8xf32> to vector<2x8x1xf32>
    %189 = vector.broadcast %188 : vector<2x8x1xf32> to vector<2x8x8xf32>
    %190 = arith.subf %186, %189 : vector<2x8x8xf32>
    %191 = math.exp %190 : vector<2x8x8xf32>
    %cst_71 = arith.constant dense<0.000000e+00> : vector<2x8xf32>
    %192 = vector.multi_reduction <add>, %191, %cst_71 [2] : vector<2x8x8xf32> to vector<2x8xf32>
    %193 = vector.shape_cast %192 : vector<2x8xf32> to vector<2x8x1xf32>
    %194 = tpu.reciprocal %193 {approx = true} : vector<2x8x1xf32> -> vector<2x8x1xf32>
    %195 = vector.broadcast %194 : vector<2x8x1xf32> to vector<2x8x8xf32>
    %196 = arith.mulf %191, %195 : vector<2x8x8xf32>
    %197 = arith.truncf %196 : vector<2x8x8xf32> to vector<2x8x8xbf16>
    %198 = vector.extract_strided_slice %151 {offsets = [0, 0, 64], sizes = [2, 8, 32], strides = [1, 1, 1]} : vector<2x8x128xbf16> to vector<2x8x32xbf16>
    "tpu.trace_start"() <{level = 10 : i32, message = "bqk,bkd->bqd"}> : () -> ()
    %cst_72 = arith.constant dense<0.000000e+00> : vector<2x8x32xf32>
    %199 = tpu.matmul %197, %198, %cst_72 {dimension_numbers = #tpu.dot_dimension_numbers<[2], [1], [1], [2], [0, 0, 0, 1, 1, 2], [0], [0]>} : vector<2x8x8xbf16>, vector<2x8x32xbf16>, vector<2x8x32xf32> -> vector<2x8x32xf32>
    "tpu.trace_stop"() : () -> ()
    %200 = vector.extract_strided_slice %138 {offsets = [0, 0, 96], sizes = [2, 8, 32], strides = [1, 1, 1]} : vector<2x8x128xbf16> to vector<2x8x32xbf16>
    %201 = vector.extract_strided_slice %149 {offsets = [0, 0, 96], sizes = [2, 8, 32], strides = [1, 1, 1]} : vector<2x8x128xbf16> to vector<2x8x32xbf16>
    "tpu.trace_start"() <{level = 10 : i32, message = "bqd,bkd->bqk"}> : () -> ()
    %cst_73 = arith.constant dense<0.000000e+00> : vector<2x8x8xf32>
    %202 = tpu.matmul %200, %201, %cst_73 {dimension_numbers = #tpu.dot_dimension_numbers<[2], [2], [1], [1], [0, 0, 0, 1, 1, 1], [0], [0]>} : vector<2x8x32xbf16>, vector<2x8x32xbf16>, vector<2x8x8xf32> -> vector<2x8x8xf32>
    "tpu.trace_stop"() : () -> ()
    %cst_74 = arith.constant dense<0xFF800000> : vector<2x8xf32>
    %203 = vector.multi_reduction <maximumf>, %202, %cst_74 [2] : vector<2x8x8xf32> to vector<2x8xf32>
    %204 = vector.shape_cast %203 : vector<2x8xf32> to vector<2x8x1xf32>
    %205 = vector.broadcast %204 : vector<2x8x1xf32> to vector<2x8x8xf32>
    %206 = arith.subf %202, %205 : vector<2x8x8xf32>
    %207 = math.exp %206 : vector<2x8x8xf32>
    %cst_75 = arith.constant dense<0.000000e+00> : vector<2x8xf32>
    %208 = vector.multi_reduction <add>, %207, %cst_75 [2] : vector<2x8x8xf32> to vector<2x8xf32>
    %209 = vector.shape_cast %208 : vector<2x8xf32> to vector<2x8x1xf32>
    %210 = tpu.reciprocal %209 {approx = true} : vector<2x8x1xf32> -> vector<2x8x1xf32>
    %211 = vector.broadcast %210 : vector<2x8x1xf32> to vector<2x8x8xf32>
    %212 = arith.mulf %207, %211 : vector<2x8x8xf32>
    %213 = arith.truncf %212 : vector<2x8x8xf32> to vector<2x8x8xbf16>
    %214 = vector.extract_strided_slice %151 {offsets = [0, 0, 96], sizes = [2, 8, 32], strides = [1, 1, 1]} : vector<2x8x128xbf16> to vector<2x8x32xbf16>
    "tpu.trace_start"() <{level = 10 : i32, message = "bqk,bkd->bqd"}> : () -> ()
    %cst_76 = arith.constant dense<0.000000e+00> : vector<2x8x32xf32>
    %215 = tpu.matmul %213, %214, %cst_76 {dimension_numbers = #tpu.dot_dimension_numbers<[2], [1], [1], [2], [0, 0, 0, 1, 1, 2], [0], [0]>} : vector<2x8x8xbf16>, vector<2x8x32xbf16>, vector<2x8x32xf32> -> vector<2x8x32xf32>
    "tpu.trace_stop"() : () -> ()
    %216 = tpu.concatenate %167, %183, %199, %215 in 2 : vector<2x8x32xf32>, vector<2x8x32xf32>, vector<2x8x32xf32>, vector<2x8x32xf32> -> vector<2x8x128xf32>
    %217 = vector.shape_cast %216 : vector<2x8x128xf32> to vector<16x128xf32>
    %218 = arith.truncf %217 : vector<16x128xf32> to vector<16x128xbf16>
    %c0_77 = arith.constant 0 : index
    %c0_78 = arith.constant 0 : index
    %c0_79 = arith.constant 0 : index
    %219 = vector.load %arg12[%c0_77, %c0_78, %c0_79] : memref<1x128x128xbf16, #tpu.memory_space<vmem>>, vector<1x128x128xbf16>
    %220 = vector.shape_cast %219 : vector<1x128x128xbf16> to vector<128x128xbf16>
    %cst_80 = arith.constant dense<0.000000e+00> : vector<16x128xf32>
    %221 = tpu.matmul %218, %220, %cst_80 {dimension_numbers = #tpu.dot_dimension_numbers<[1], [0], [0], [1], [0, 0, 1, 1], [], []>} : vector<16x128xbf16>, vector<128x128xbf16>, vector<16x128xf32> -> vector<16x128xf32>
    %c0_81 = arith.constant 0 : index
    %c0_82 = arith.constant 0 : index
    %c0_83 = arith.constant 0 : index
    %222 = vector.load %arg13[%c0_81, %c0_82, %c0_83] : memref<1x1x128xf32, #tpu.memory_space<vmem>>, vector<1x1x128xf32>
    %223 = vector.shape_cast %222 : vector<1x1x128xf32> to vector<1x128xf32>
    %224 = vector.broadcast %223 : vector<1x128xf32> to vector<16x128xf32>
    %225 = arith.addf %221, %224 : vector<16x128xf32>
    %226 = arith.addf %128, %225 : vector<16x128xf32>
    %cst_84 = arith.constant dense<0.000000e+00> : vector<16xf32>
    %227 = vector.multi_reduction <add>, %226, %cst_84 [1] : vector<16x128xf32> to vector<16xf32>
    %228 = vector.shape_cast %227 : vector<16xf32> to vector<16x1xf32>
    %cst_85 = arith.constant 1.280000e+02 : f32
    %229 = vector.broadcast %cst_85 : f32 to vector<16x1xf32>
    %230 = arith.divf %228, %229 : vector<16x1xf32>
    %231 = vector.broadcast %230 : vector<16x1xf32> to vector<16x128xf32>
    %232 = arith.subf %226, %231 : vector<16x128xf32>
    %233 = arith.mulf %232, %232 : vector<16x128xf32>
    %cst_86 = arith.constant dense<0.000000e+00> : vector<16xf32>
    %234 = vector.multi_reduction <add>, %233, %cst_86 [1] : vector<16x128xf32> to vector<16xf32>
    %235 = vector.shape_cast %234 : vector<16xf32> to vector<16x1xf32>
    %cst_87 = arith.constant 1.280000e+02 : f32
    %236 = vector.broadcast %cst_87 : f32 to vector<16x1xf32>
    %237 = arith.divf %235, %236 : vector<16x1xf32>
    %238 = vector.broadcast %230 : vector<16x1xf32> to vector<16x128xf32>
    %239 = arith.subf %226, %238 : vector<16x128xf32>
    %cst_88 = arith.constant 9.99999974E-6 : f32
    %240 = vector.broadcast %cst_88 : f32 to vector<16x1xf32>
    %241 = arith.addf %237, %240 : vector<16x1xf32>
    %242 = math.rsqrt %241 : vector<16x1xf32>
    %243 = vector.broadcast %242 : vector<16x1xf32> to vector<16x128xf32>
    %244 = arith.mulf %239, %243 : vector<16x128xf32>
    %c0_89 = arith.constant 0 : index
    %c0_90 = arith.constant 0 : index
    %c0_91 = arith.constant 0 : index
    %245 = vector.load %arg20[%c0_89, %c0_90, %c0_91] : memref<1x1x128xf32, #tpu.memory_space<vmem>>, vector<1x1x128xf32>
    %246 = vector.shape_cast %245 : vector<1x1x128xf32> to vector<1x128xf32>
    %247 = vector.broadcast %246 : vector<1x128xf32> to vector<16x128xf32>
    %248 = arith.mulf %244, %247 : vector<16x128xf32>
    %c0_92 = arith.constant 0 : index
    %c0_93 = arith.constant 0 : index
    %c0_94 = arith.constant 0 : index
    %249 = vector.load %arg21[%c0_92, %c0_93, %c0_94] : memref<1x1x128xf32, #tpu.memory_space<vmem>>, vector<1x1x128xf32>
    %250 = vector.shape_cast %249 : vector<1x1x128xf32> to vector<1x128xf32>
    %251 = vector.broadcast %250 : vector<1x128xf32> to vector<16x128xf32>
    %252 = arith.addf %248, %251 : vector<16x128xf32>
    %253 = arith.truncf %252 : vector<16x128xf32> to vector<16x128xbf16>
    %c0_95 = arith.constant 0 : index
    %c0_96 = arith.constant 0 : index
    %c0_97 = arith.constant 0 : index
    %254 = vector.load %arg14[%c0_95, %c0_96, %c0_97] : memref<1x128x256xbf16, #tpu.memory_space<vmem>>, vector<1x128x256xbf16>
    %255 = vector.shape_cast %254 : vector<1x128x256xbf16> to vector<128x256xbf16>
    %cst_98 = arith.constant dense<0.000000e+00> : vector<16x256xf32>
    %256 = tpu.matmul %253, %255, %cst_98 {dimension_numbers = #tpu.dot_dimension_numbers<[1], [0], [0], [1], [0, 0, 1, 1], [], []>} : vector<16x128xbf16>, vector<128x256xbf16>, vector<16x256xf32> -> vector<16x256xf32>
    %c0_99 = arith.constant 0 : index
    %c0_100 = arith.constant 0 : index
    %c0_101 = arith.constant 0 : index
    %257 = vector.load %arg15[%c0_99, %c0_100, %c0_101] : memref<1x1x256xf32, #tpu.memory_space<vmem>>, vector<1x1x256xf32>
    %258 = vector.shape_cast %257 : vector<1x1x256xf32> to vector<1x256xf32>
    %259 = vector.broadcast %258 : vector<1x256xf32> to vector<16x256xf32>
    %260 = arith.addf %256, %259 : vector<16x256xf32>
    %cst_102 = arith.constant 0.000000e+00 : f32
    %261 = vector.broadcast %cst_102 : f32 to vector<16x256xf32>
    %262 = arith.maximumf %260, %261 : vector<16x256xf32>
    %263 = arith.truncf %262 : vector<16x256xf32> to vector<16x256xbf16>
    %c0_103 = arith.constant 0 : index
    %c0_104 = arith.constant 0 : index
    %c0_105 = arith.constant 0 : index
    %264 = vector.load %arg16[%c0_103, %c0_104, %c0_105] : memref<1x256x128xbf16, #tpu.memory_space<vmem>>, vector<1x256x128xbf16>
    %265 = vector.shape_cast %264 : vector<1x256x128xbf16> to vector<256x128xbf16>
    %cst_106 = arith.constant dense<0.000000e+00> : vector<16x128xf32>
    %266 = tpu.matmul %263, %265, %cst_106 {dimension_numbers = #tpu.dot_dimension_numbers<[1], [0], [0], [1], [0, 0, 1, 1], [], []>} : vector<16x256xbf16>, vector<256x128xbf16>, vector<16x128xf32> -> vector<16x128xf32>
    %c0_107 = arith.constant 0 : index
    %c0_108 = arith.constant 0 : index
    %c0_109 = arith.constant 0 : index
    %267 = vector.load %arg17[%c0_107, %c0_108, %c0_109] : memref<1x1x128xf32, #tpu.memory_space<vmem>>, vector<1x1x128xf32>
    %268 = vector.shape_cast %267 : vector<1x1x128xf32> to vector<1x128xf32>
    %269 = vector.broadcast %268 : vector<1x128xf32> to vector<16x128xf32>
    %270 = arith.addf %266, %269 : vector<16x128xf32>
    %271 = arith.addf %252, %270 : vector<16x128xf32>
    %cst_110 = arith.constant dense<0.000000e+00> : vector<16xf32>
    %272 = vector.multi_reduction <add>, %271, %cst_110 [1] : vector<16x128xf32> to vector<16xf32>
    %273 = vector.shape_cast %272 : vector<16xf32> to vector<16x1xf32>
    %cst_111 = arith.constant 1.280000e+02 : f32
    %274 = vector.broadcast %cst_111 : f32 to vector<16x1xf32>
    %275 = arith.divf %273, %274 : vector<16x1xf32>
    %276 = vector.broadcast %275 : vector<16x1xf32> to vector<16x128xf32>
    %277 = arith.subf %271, %276 : vector<16x128xf32>
    %278 = arith.mulf %277, %277 : vector<16x128xf32>
    %cst_112 = arith.constant dense<0.000000e+00> : vector<16xf32>
    %279 = vector.multi_reduction <add>, %278, %cst_112 [1] : vector<16x128xf32> to vector<16xf32>
    %280 = vector.shape_cast %279 : vector<16xf32> to vector<16x1xf32>
    %cst_113 = arith.constant 1.280000e+02 : f32
    %281 = vector.broadcast %cst_113 : f32 to vector<16x1xf32>
    %282 = arith.divf %280, %281 : vector<16x1xf32>
    %283 = vector.broadcast %275 : vector<16x1xf32> to vector<16x128xf32>
    %284 = arith.subf %271, %283 : vector<16x128xf32>
    %cst_114 = arith.constant 9.99999974E-6 : f32
    %285 = vector.broadcast %cst_114 : f32 to vector<16x1xf32>
    %286 = arith.addf %282, %285 : vector<16x1xf32>
    %287 = math.rsqrt %286 : vector<16x1xf32>
    %288 = vector.broadcast %287 : vector<16x1xf32> to vector<16x128xf32>
    %289 = arith.mulf %284, %288 : vector<16x128xf32>
    %c0_115 = arith.constant 0 : index
    %c0_116 = arith.constant 0 : index
    %c0_117 = arith.constant 0 : index
    %290 = vector.load %arg22[%c0_115, %c0_116, %c0_117] : memref<1x1x128xf32, #tpu.memory_space<vmem>>, vector<1x1x128xf32>
    %291 = vector.shape_cast %290 : vector<1x1x128xf32> to vector<1x128xf32>
    %292 = vector.broadcast %291 : vector<1x128xf32> to vector<16x128xf32>
    %293 = arith.mulf %289, %292 : vector<16x128xf32>
    %c0_118 = arith.constant 0 : index
    %c0_119 = arith.constant 0 : index
    %c0_120 = arith.constant 0 : index
    %294 = vector.load %arg23[%c0_118, %c0_119, %c0_120] : memref<1x1x128xf32, #tpu.memory_space<vmem>>, vector<1x1x128xf32>
    %295 = vector.shape_cast %294 : vector<1x1x128xf32> to vector<1x128xf32>
    %296 = vector.broadcast %295 : vector<1x128xf32> to vector<16x128xf32>
    %297 = arith.addf %293, %296 : vector<16x128xf32>
    %c0_121 = arith.constant 0 : index
    %c0_122 = arith.constant 0 : index
    %298 = vector.load %arg27[%c0_121, %c0_122] : memref<16x128xf32, #tpu.memory_space<vmem>>, vector<16x128xf32>
    tpu.vector_store %arg27[%c0_121, %c0_122], %297 {strides = array<i32>} : memref<16x128xf32, #tpu.memory_space<vmem>>, vector<16x128xf32>,
    %c1_i32 = arith.constant 1 : i32
    %299 = arith.cmpi eq, %arg0, %c1_i32 : i32
    %300 = arith.extui %299 : i1 to i32
    %c0_i32_123 = arith.constant 0 : i32
    %301 = arith.cmpi ne, %300, %c0_i32_123 : i32
    scf.if %301 {
      %302 = arith.truncf %297 : vector<16x128xf32> to vector<16x128xbf16>
      %c0_124 = arith.constant 0 : index
      %c0_125 = arith.constant 0 : index
      %303 = vector.load %arg24[%c0_124, %c0_125] : memref<128x128xbf16, #tpu.memory_space<vmem>>, vector<128x128xbf16>
      %cst_126 = arith.constant dense<0.000000e+00> : vector<16x128xf32>
      %304 = tpu.matmul %302, %303, %cst_126 {dimension_numbers = #tpu.dot_dimension_numbers<[1], [0], [0], [1], [0, 0, 1, 1], [], []>} : vector<16x128xbf16>, vector<128x128xbf16>, vector<16x128xf32> -> vector<16x128xf32>
      %c0_127 = arith.constant 0 : index
      %c0_128 = arith.constant 0 : index
      %305 = vector.load %arg25[%c0_127, %c0_128] : memref<1x128xf32, #tpu.memory_space<vmem>>, vector<1x128xf32>
      %306 = vector.broadcast %305 : vector<1x128xf32> to vector<16x128xf32>
      %307 = arith.addf %304, %306 : vector<16x128xf32>
      %c0_129 = arith.constant 0 : index
      %c0_130 = arith.constant 0 : index
      %308 = vector.load %arg26[%c0_129, %c0_130] : memref<16x128xf32, #tpu.memory_space<vmem>>, vector<16x128xf32>
      tpu.vector_store %arg26[%c0_129, %c0_130], %307 {strides = array<i32>} : memref<16x128xf32, #tpu.memory_space<vmem>>, vector<16x128xf32>,
    } else {
    }
    return
  }
  func.func @transform_0(%arg0: i32) -> (i32, i32, i32) {
    %c0_i32 = arith.constant 0 : i32
    %c0_i32_0 = arith.constant 0 : i32
    %c0_i32_1 = arith.constant 0 : i32
    %c0_i32_2 = arith.constant 0 : i32
    return %c0_i32, %c0_i32_0, %c0_i32_1 : i32, i32, i32
  }
  func.func @transform_1(%arg0: i32) -> (i32, i32, i32) {
    %c0_i32 = arith.constant 0 : i32
    %c0_i32_0 = arith.constant 0 : i32
    %c0_i32_1 = arith.constant 0 : i32
    %c0_i32_2 = arith.constant 0 : i32
    return %c0_i32, %c0_i32_0, %c0_i32_1 : i32, i32, i32
  }
  func.func @transform_2(%arg0: i32) -> (i32, i32) {
    %c0_i32 = arith.constant 0 : i32
    %c0_i32_0 = arith.constant 0 : i32
    %c0_i32_1 = arith.constant 0 : i32
    return %c0_i32, %c0_i32_0 : i32, i32
  }
  func.func @transform_3(%arg0: i32) -> (i32, i32, i32) {
    %c0_i32 = arith.constant 0 : i32
    %c0_i32_0 = arith.constant 0 : i32
    %c0_i32_1 = arith.constant 0 : i32
    return %arg0, %c0_i32, %c0_i32_0 : i32, i32, i32
  }
  func.func @transform_4(%arg0: i32) -> (i32, i32, i32) {
    %c0_i32 = arith.constant 0 : i32
    %c0_i32_0 = arith.constant 0 : i32
    %c0_i32_1 = arith.constant 0 : i32
    return %arg0, %c0_i32, %c0_i32_0 : i32, i32, i32
  }
  func.func @transform_5(%arg0: i32) -> (i32, i32, i32) {
    %c0_i32 = arith.constant 0 : i32
    %c0_i32_0 = arith.constant 0 : i32
    %c0_i32_1 = arith.constant 0 : i32
    return %arg0, %c0_i32, %c0_i32_0 : i32, i32, i32
  }
  func.func @transform_6(%arg0: i32) -> (i32, i32, i32) {
    %c0_i32 = arith.constant 0 : i32
    %c0_i32_0 = arith.constant 0 : i32
    %c0_i32_1 = arith.constant 0 : i32
    return %arg0, %c0_i32, %c0_i32_0 : i32, i32, i32
  }
  func.func @transform_7(%arg0: i32) -> (i32, i32, i32) {
    %c0_i32 = arith.constant 0 : i32
    %c0_i32_0 = arith.constant 0 : i32
    %c0_i32_1 = arith.constant 0 : i32
    return %arg0, %c0_i32, %c0_i32_0 : i32, i32, i32
  }
  func.func @transform_8(%arg0: i32) -> (i32, i32, i32) {
    %c0_i32 = arith.constant 0 : i32
    %c0_i32_0 = arith.constant 0 : i32
    %c0_i32_1 = arith.constant 0 : i32
    return %arg0, %c0_i32, %c0_i32_0 : i32, i32, i32
  }
  func.func @transform_9(%arg0: i32) -> (i32, i32, i32) {
    %c0_i32 = arith.constant 0 : i32
    %c0_i32_0 = arith.constant 0 : i32
    %c0_i32_1 = arith.constant 0 : i32
    return %arg0, %c0_i32, %c0_i32_0 : i32, i32, i32
  }
  func.func @transform_10(%arg0: i32) -> (i32, i32, i32) {
    %c0_i32 = arith.constant 0 : i32
    %c0_i32_0 = arith.constant 0 : i32
    %c0_i32_1 = arith.constant 0 : i32
    return %arg0, %c0_i32, %c0_i32_0 : i32, i32, i32
  }
  func.func @transform_11(%arg0: i32) -> (i32, i32, i32) {
    %c0_i32 = arith.constant 0 : i32
    %c0_i32_0 = arith.constant 0 : i32
    %c0_i32_1 = arith.constant 0 : i32
    return %arg0, %c0_i32, %c0_i32_0 : i32, i32, i32
  }
  func.func @transform_12(%arg0: i32) -> (i32, i32, i32) {
    %c0_i32 = arith.constant 0 : i32
    %c0_i32_0 = arith.constant 0 : i32
    %c0_i32_1 = arith.constant 0 : i32
    return %arg0, %c0_i32, %c0_i32_0 : i32, i32, i32
  }
  func.func @transform_13(%arg0: i32) -> (i32, i32, i32) {
    %c0_i32 = arith.constant 0 : i32
    %c0_i32_0 = arith.constant 0 : i32
    %c0_i32_1 = arith.constant 0 : i32
    return %arg0, %c0_i32, %c0_i32_0 : i32, i32, i32
  }
  func.func @transform_14(%arg0: i32) -> (i32, i32, i32) {
    %c0_i32 = arith.constant 0 : i32
    %c0_i32_0 = arith.constant 0 : i32
    %c0_i32_1 = arith.constant 0 : i32
    return %arg0, %c0_i32, %c0_i32_0 : i32, i32, i32
  }
  func.func @transform_15(%arg0: i32) -> (i32, i32, i32) {
    %c0_i32 = arith.constant 0 : i32
    %c0_i32_0 = arith.constant 0 : i32
    %c0_i32_1 = arith.constant 0 : i32
    return %arg0, %c0_i32, %c0_i32_0 : i32, i32, i32
  }
  func.func @transform_16(%arg0: i32) -> (i32, i32, i32) {
    %c0_i32 = arith.constant 0 : i32
    %c0_i32_0 = arith.constant 0 : i32
    %c0_i32_1 = arith.constant 0 : i32
    return %arg0, %c0_i32, %c0_i32_0 : i32, i32, i32
  }
  func.func @transform_17(%arg0: i32) -> (i32, i32, i32) {
    %c0_i32 = arith.constant 0 : i32
    %c0_i32_0 = arith.constant 0 : i32
    %c0_i32_1 = arith.constant 0 : i32
    return %arg0, %c0_i32, %c0_i32_0 : i32, i32, i32
  }
  func.func @transform_18(%arg0: i32) -> (i32, i32, i32) {
    %c0_i32 = arith.constant 0 : i32
    %c0_i32_0 = arith.constant 0 : i32
    %c0_i32_1 = arith.constant 0 : i32
    return %arg0, %c0_i32, %c0_i32_0 : i32, i32, i32
  }
  func.func @transform_19(%arg0: i32) -> (i32, i32, i32) {
    %c0_i32 = arith.constant 0 : i32
    %c0_i32_0 = arith.constant 0 : i32
    %c0_i32_1 = arith.constant 0 : i32
    return %arg0, %c0_i32, %c0_i32_0 : i32, i32, i32
  }
  func.func @transform_20(%arg0: i32) -> (i32, i32, i32) {
    %c0_i32 = arith.constant 0 : i32
    %c0_i32_0 = arith.constant 0 : i32
    %c0_i32_1 = arith.constant 0 : i32
    return %arg0, %c0_i32, %c0_i32_0 : i32, i32, i32
  }
  func.func @transform_21(%arg0: i32) -> (i32, i32, i32) {
    %c0_i32 = arith.constant 0 : i32
    %c0_i32_0 = arith.constant 0 : i32
    %c0_i32_1 = arith.constant 0 : i32
    return %arg0, %c0_i32, %c0_i32_0 : i32, i32, i32
  }
  func.func @transform_22(%arg0: i32) -> (i32, i32, i32) {
    %c0_i32 = arith.constant 0 : i32
    %c0_i32_0 = arith.constant 0 : i32
    %c0_i32_1 = arith.constant 0 : i32
    return %arg0, %c0_i32, %c0_i32_0 : i32, i32, i32
  }
  func.func @transform_23(%arg0: i32) -> (i32, i32) {
    %c0_i32 = arith.constant 0 : i32
    %c0_i32_0 = arith.constant 0 : i32
    %c0_i32_1 = arith.constant 0 : i32
    return %c0_i32, %c0_i32_0 : i32, i32
  }
  func.func @transform_24(%arg0: i32) -> (i32, i32) {
    %c0_i32 = arith.constant 0 : i32
    %c0_i32_0 = arith.constant 0 : i32
    %c0_i32_1 = arith.constant 0 : i32
    return %c0_i32, %c0_i32_0 : i32, i32
  }
  func.func @transform_25(%arg0: i32) -> (i32, i32) {
    %c0_i32 = arith.constant 0 : i32
    %c0_i32_0 = arith.constant 0 : i32
    %c0_i32_1 = arith.constant 0 : i32
    return %c0_i32, %c0_i32_0 : i32, i32
  }
}

</mosaic_0001>

<bundles_post_ra>
// kernel: vec_transformer_decoder_forward.1
= control target key start
LH: loop header
LB: loop body
LE: loop exit
PB: predicated region body
PF: predicated region fallthrough
CT: control target
= control target key end

     0   :  { %s6632_s0 = inlined_call_operand.vmem [shape: f32[2,8,128], index: 0, kind: input, shape index: {}]   ;;  %s6633_s1 = inlined_call_operand.hbm [shape: f32[2,8,128], index: 1, kind: input, shape index: {}]   ;;  %s6634_s2 = inlined_call_operand.hbm [shape: f32[8,8], index: 2, kind: input, shape index: {}]   ;;  %s6635_s3 = inlined_call_operand.hbm [shape: bf16[2,128,384], index: 3, kind: input, shape index: {}]   ;;  %s6636_s4 = inlined_call_operand.hbm [shape: f32[2,1,384], index: 4, kind: input, shape index: {}]   ;;  %s6637_s5 = inlined_call_operand.hbm [shape: bf16[2,128,128], index: 5, kind: input, shape index: {}]   ;;  %s6638_s6 = inlined_call_operand.hbm [shape: f32[2,1,128], index: 6, kind: input, shape index: {}]   ;;  %s6639_s7 = inlined_call_operand.hbm [shape: bf16[2,128,128], index: 7, kind: input, shape index: {}]   ;;  %s6640_s8 = inlined_call_operand.hbm [shape: f32[2,1,128], index: 8, kind: input, shape index: {}]   ;;  %s6641_s9 = inlined_call_operand.hbm [shape: bf16[2,128,256], index: 9, kind: input, shape index: {}]   ;;  %s6642_s10 = inlined_call_operand.hbm [shape: f32[2,1,256], index: 10, kind: input, shape index: {}]   ;;  %s6643_s11 = inlined_call_operand.hbm [shape: bf16[2,128,128], index: 11, kind: input, shape index: {}]   ;;  %s6644_s12 = inlined_call_operand.hbm [shape: f32[2,1,128], index: 12, kind: input, shape index: {}]   ;;  %s6645_s13 = inlined_call_operand.hbm [shape: bf16[2,128,256], index: 13, kind: input, shape index: {}]   ;;  %s6646_s14 = inlined_call_operand.vmem [shape: f32[2,1,256], index: 14, kind: input, shape index: {}]   ;;  %s6647_s15 = inlined_call_operand.hbm [shape: bf16[2,256,128], index: 15, kind: input, shape index: {}]   ;;  %s6648_s16 = inlined_call_operand.hbm [shape: f32[2,1,128], index: 16, kind: input, shape index: {}]   ;;  %s6649_s17 = inlined_call_operand.hbm [shape: f32[2,1,128], index: 17, kind: input, shape index: {}]   ;;  %s6650_s18 = inlined_call_operand.hbm [shape: f32[2,1,128], index: 18, kind: input, shape index: {}]   ;;  %s6651_s19 = inlined_call_operand.hbm [shape: f32[2,1,128], index: 19, kind: input, shape index: {}]   ;;  %s6652_s20 = inlined_call_operand.hbm [shape: f32[2,1,128], index: 20, kind: input, shape index: {}]   ;;  %s6653_s21 = inlined_call_operand.hbm [shape: f32[2,1,128], index: 21, kind: input, shape index: {}]   ;;  %s6654_s22 = inlined_call_operand.hbm [shape: f32[2,1,128], index: 22, kind: input, shape index: {}]   ;;  %s6655_s23 = inlined_call_operand.hbm [shape: bf16[128,128], index: 23, kind: input, shape index: {}]   ;;  %s6656_s24 = inlined_call_operand.vmem [shape: f32[1,128], index: 24, kind: input, shape index: {}]   ;;  %s6657_s25 = inlined_call_operand.vmem [shape: f32[16,128], index: 25, kind: output, shape index: {}]  }
   0x1   :  { %6697 = sst [smem:[#allocation38_spill]] %s6632_s0 }
   0x2   :  { %6698 = sst [smem:[#allocation39_spill]] %s6633_s1 }
   0x3   :  { %6699 = sst [smem:[#allocation40_spill]] %s6634_s2 }
   0x4   :  { %6700 = sst [smem:[#allocation41_spill]] %s6635_s3 }
   0x5   :  { %6701 = sst [smem:[#allocation42_spill]] %s6636_s4 }
   0x6   :  { %6702 = sst [smem:[#allocation43_spill]] %s6637_s5 }
   0x7   :  { %6703 = sst [smem:[#allocation44_spill]] %s6638_s6 }
   0x8   :  { %6704 = sst [smem:[#allocation45_spill]] %s6639_s7 }
   0x9   :  { %6705 = sst [smem:[#allocation46_spill]] %s6640_s8 }
   0xa   :  { %6706 = sst [smem:[#allocation47_spill]] %s6641_s9 }
   0xb   :  { %6707 = sst [smem:[#allocation48_spill]] %s6642_s10 }
   0xc   :  { %6708 = sst [smem:[#allocation49_spill]] %s6643_s11 }
   0xd   :  { %6709 = sst [smem:[#allocation50_spill]] %s6646_s14 }
   0xe   :  { %6710 = sst [smem:[#allocation51_spill]] %s6648_s16 }
   0xf   :  { %6711 = sst [smem:[#allocation52_spill]] %s6649_s17 }
  0x10   :  { %6712 = sst [smem:[#allocation53_spill]] %s6650_s18 }
  0x11   :  { %6713 = sst [smem:[#allocation54_spill]] %s6651_s19 }
  0x12   :  { %6714 = sst [smem:[#allocation55_spill]] %s6652_s20 }
  0x13   :  { %6715 = sst [smem:[#allocation56_spill]] %s6653_s21 }
  0x14   :  { %6716 = sst [smem:[#allocation57_spill]] %s6654_s22 }
  0x15   :  { %6717 = sst [smem:[#allocation58_spill]] %s6655_s23 }
  0x16   :  { %6718 = sst [smem:[#allocation59_spill]] %s6656_s24 }
  0x17   :  { %6719 = sst [smem:[#allocation60_spill]] %s6657_s25 }
  0x18   :  { %30 = vsyncpa [#allocation4], 0 }
  0x19   :  { %31 = vsyncpa [#allocation6], 0  ;;  %s5660_s29 = smov 0   ;;  %s5662_s2 = smov 0  }
  0x1a   :  { %s5664_s6 = smov 0   ;;  %s5666_s30 = smov 0  }
  0x1b LB: > { %6720 = sst [smem:[#allocation31_spill]] %s5503_s2  ;;  %s5679_s7 = sadd.s32 4294967295, %s5511_s30   ;;  %s5511_s30 = sphi %s5666_s30, %s6775_s30   ;;  %s5507_s6 = sphi %s5664_s6, %s6778_s6   ;;  %s5503_s2 = sphi %s5662_s2, %s6777_s2   ;;  %s5499_s29 = sphi %s5660_s29, %s6776_s29  }
  0x1c   : > { %6721 = sst [smem:[#allocation32_spill]] %s5507_s6  ;;  %s5682_s3 = sadd.s32 1, %s5511_s30  }
  0x1d   : > { %6722 = sst [smem:[#allocation33_spill]] %s5679_s7  ;;  %s104_s26 = ssub.s32 %s5511_s30, %s5682_s3 }
  0x1e   : > { %6723 = sst [smem:[#allocation34_spill]] %s5682_s3  ;;  %s107_s1 = sadd.s32 1, %s5507_s6 }
  0x1f   : > { %p105_p0 = scmp.eq.s32.totalorder %s104_s26, 0  ;;  %p114_p1 = scmp.ne.s32.totalorder %s5507_s6, %s5503_s2 }
  0x20   : > { %p115_p2 = scmp.eq.s32.totalorder %s5511_s30, 0  ;;  %p120_p3 = scmp.ne.s32.totalorder %s5503_s2, %s5499_s29 }
  0x21   : > { %s5692_s8 = scalar_select %p105_p0, %s5507_s6, %s107_s1  }
  0x22   : > { %p5694_p4 = por %p115_p2, %p114_p1  ;;  %p121_p5 = scmp.eq.s32.totalorder %s5679_s7, 0 }
  0x23   : > { %6724 = sst [smem:[#allocation35_spill]] %s5692_s8  ;;  %p4003_p6 = scmp.ge.s32.totalorder %s5511_s30, 1 }
  0x24   : > { %p688_p7 = scmp.lt.s32.totalorder %s5511_s30, 3  ;;  %p5703_p8 = por %p121_p5, %p120_p3 }
  0x25   : > { %p4004_p9 = scmp.ne.s32.totalorder %s5679_s7, 0  ;;  %s6730_s0 = sld [smem:[#allocation40_spill]] }
  0x26   : > { %s6726_s4 = scalar_select %p5703_p8, 1, 0 }
  0x27   : > { %p5708_p10 = pnand %p4003_p6, %p688_p7  ;;  %s5513_s26 = smov [#allocation5]  }
  0x28   : > { %6727 = sst [smem:[#allocation36_spill]] %s6726_s4  ;;  %s719_s1 = sshll.u32 %s5513_s26, 4  ;;  %s720_s1 = int_to_ptr.vmem [resolvable:$true] %s719_s1 }
  0x29   : > { %s6728_s28 = scalar_select %p5708_p10, 1, 0 }
  0x2a   : > { %p4659_p11 = pneg %p5708_p10  ;;  %s6731_s25 = sld [smem:[#allocation39_spill]] }
  0x2b   : > { %6729 = sst [smem:[#allocation37_spill]] %s6728_s28  ;;  %s717_s29 = sshll.u32 %s6730_s0, 4  ;;  %s718_s29 = int_to_ptr.hbm [resolvable:$true] %s717_s29 }
  0x2c   : > { %p5722_p12 = pnand %p4659_p11, %p121_p5  ;;  %s5514_s9 = smov [#allocation3]  }
  0x2d   : > { %s704_s5 = sshll.u32 %s5514_s9, 4  ;;  %s5515_s0 = smov 128   ;;  %s705_s5 = int_to_ptr.vmem [resolvable:$true] %s704_s5 }
  0x2e   : > { %4665 = dma.hbm_to_vmem [thread:$0]  (!%p5722_p12), %s718_s29, 128, %s720_s1, [#allocation6]  }
  0x2f   : > { %s5516_s26 = smov 8   ;;  %s6733_s23 = sld [smem:[#allocation58_spill]] }
  0x30   : > { %s702_s24 = sshll.u32 %s6731_s25, 4  ;;  %s5517_s4 = smov [#allocation26]   ;;  %s703_s24 = int_to_ptr.hbm [resolvable:$true] %s702_s24 }
  0x31   : > { %4662 = dma.hbm_to_vmem [thread:$0]  (!%p5722_p12), %s703_s24, 256, %s705_s5, [#allocation4], %s5515_s0, %s5515_s0, %s5516_s26  }
  0x32   : > { %s730_s2 = sshll.u32 %s5517_s4, 4  ;;  %s5518_s7 = smov 64   ;;  %s731_s2 = int_to_ptr.vmem [resolvable:$true] %s730_s2 }
  0x33   : > { %s5519_s28 = smov 4   ;;  %p4007_p13 = scmp.ge.s32.totalorder %s5511_s30, 2 }
  0x34   : > { %s747_s29 = sand.u32 (!%p4007_p13), 1, %s5511_s30   ;;  %s5738_s24 = sand.u32 (!%p4007_p13), 1, %s5507_s6  }
  0x35   : > { %s728_s8 = sshll.u32 %s6733_s23, 4  ;;  %743 = sbr.rel (%p4007_p13) target bundleno = 423 (0x1a7), region = 36  ;;  %s729_s8 = int_to_ptr.hbm [resolvable:$true] %s728_s8 }
  0x36   : > { %4668 = dma.hbm_to_vmem [thread:$0]  (!%p5722_p12), %s729_s8, 1024, %s731_s2, [#allocation6], %s5518_s7, %s5518_s7, %s5519_s28  }
  0x37   : > { %s4603_s1 = smul.u32 (!%p4007_p13), 192, %s5738_s24  ;;  %s6734_s0 = sld [smem:[#allocation41_spill]] (!%p4007_p13) }
  0x38   : > { %s4604_s9 = smul.u32 (!%p4007_p13), 192, %s5511_s30  ;;  %s5746_s3 = scalar_lea.sflag (!%p4007_p13), [#allocation4], %s747_s29 }
  0x39   : > { %s751_s14 = scalar_lea.vmem (!%p4007_p13), [#allocation7], %s4603_s1  ;;  %s4605_s28 = smul.u32 (!%p4007_p13), 3, %s5738_s24 }
  0x3a   : > { %s759_s2 = sshll.u32 %s751_s14, 4  ;;  %s760_s2 = int_to_ptr.vmem [resolvable:$true] %s759_s2 }
  0x3d   : > { %s756_s26 = scalar_lea.hbm %s6734_s0, %s4604_s9  ;;  %s4939_s4 = scalar_lea.hbm %s6734_s0, 384 }
  0x3e   : > { %s757_s7 = sshll.u32 %s756_s26, 4  ;;  %s758_s7 = int_to_ptr.hbm [resolvable:$true] %s757_s7 }
  0x3f   : > { %s4933_s25 = sshra.s32 %s758_s7, 4  ;;  %s4934_s25 = int_to_ptr.hbm [resolvable:$true] %s4933_s25 }
  0x40   : > { %s4935_s8 = scalar_lea.hbm %s4934_s25, 192  ;;  %p4940_p3 = scmp.lt.s32.totalorder %s4934_s25, %s6734_s0 }
  0x41   : > { %p4936_p0 = scmp.ne.s32.totalorder %s4934_s25, %s4935_s8  ;;  %p4941_p6 = scmp.lt.s32.totalorder %s4939_s4, %s4935_s8 }
  0x43   : > { %p4937_p1 = pnand %p4936_p0, %p5694_p4  ;;  %p4942_p7 = por %p4941_p6, %p4940_p3 }
  0x45   : > { %p4938_p2 = pneg %p4937_p1 }
  0x47   : > { %p4943_p11 = pnand %p4942_p7, %p4938_p2 }
  0x49   : > { %4946 = shalt.err (!%p4943_p11)
}
  0x4a   : > { %s5520_s29 = smov 192   ;;  %s5521_s5 = smov 12  }
  0x4b   : > { %4615 = dma.hbm_to_vmem [thread:$0]  (%p5694_p4), %s758_s7, 3072, %s760_s2, %s5746_s3, %s5520_s29, %s5520_s29, %s5521_s5  }
  0x4c   : > { %s4606_s23 = smul.u32 3, %s5511_s30  ;;  %s773_s6 = scalar_lea.vmem [#allocation8], %s4605_s28 }
  0x4d   : > { %s781_s26 = sshll.u32 %s773_s6, 4  ;;  %s5761_s14 = sshll.u32 %s5738_s24, 6  ;;  %s782_s26 = int_to_ptr.vmem [resolvable:$true] %s781_s26 }
  0x4e   : > { %s6735_s4 = sld [smem:[#allocation42_spill]]  ;;  %s5767_s0 = sshll.u32 %s5511_s30, 6 }
  0x54   : > { %s777_s9 = scalar_lea.hbm %s6735_s4, %s4606_s23  ;;  %s4967_s28 = scalar_lea.hbm %s6735_s4, 6 }
  0x55   : > { %s779_s1 = sshll.u32 %s777_s9, 4  ;;  %s780_s1 = int_to_ptr.hbm [resolvable:$true] %s779_s1 }
  0x56   : > { %s4961_s22 = sshra.s32 %s780_s1, 4  ;;  %s4962_s22 = int_to_ptr.hbm [resolvable:$true] %s4961_s22 }
  0x57   : > { %s4963_s21 = scalar_lea.hbm %s4962_s22, 3  ;;  %p4968_p1 = scmp.lt.s32.totalorder %s4962_s22, %s6735_s4 }
  0x58   : > { %p4964_p12 = scmp.ne.s32.totalorder %s4962_s22, %s4963_s21  ;;  %p4969_p2 = scmp.lt.s32.totalorder %s4967_s28, %s4963_s21 }
  0x5a   : > { %p4965_p13 = pnand %p4964_p12, %p5694_p4  ;;  %p4970_p3 = por %p4969_p2, %p4968_p1 }
  0x5c   : > { %p4966_p0 = pneg %p4965_p13 }
  0x5e   : > { %p4971_p6 = pnand %p4970_p3, %p4966_p0 }
  0x60   : > { %4974 = shalt.err (!%p4971_p6)
}
  0x61   : > { %4616 = dma.hbm_to_vmem [thread:$0]  (%p5694_p4), %s780_s1, 48, %s782_s26, %s5746_s3  }
  0x62   : > { %s6736_s25 = sld [smem:[#allocation43_spill]]  ;;  %s792_s9 = scalar_lea.vmem [#allocation9], %s5761_s14 }
  0x63   : > { %s800_s2 = sshll.u32 %s792_s9, 4  ;;  %s801_s2 = int_to_ptr.vmem [resolvable:$true] %s800_s2 }
  0x68   : > { %s797_s8 = scalar_lea.hbm %s6736_s25, %s5767_s0  ;;  %s4995_s26 = scalar_lea.hbm %s6736_s25, 128 }
  0x69   : > { %s798_s7 = sshll.u32 %s797_s8, 4  ;;  %s799_s7 = int_to_ptr.hbm [resolvable:$true] %s798_s7 }
  0x6a   : > { %s4989_s21 = sshra.s32 %s799_s7, 4  ;;  %s4990_s21 = int_to_ptr.hbm [resolvable:$true] %s4989_s21 }
  0x6b   : > { %s4991_s22 = scalar_lea.hbm %s4990_s21, 64  ;;  %p4996_p13 = scmp.lt.s32.totalorder %s4990_s21, %s6736_s25 }
  0x6c   : > { %p4992_p7 = scmp.ne.s32.totalorder %s4990_s21, %s4991_s22  ;;  %p4997_p0 = scmp.lt.s32.totalorder %s4995_s26, %s4991_s22 }
  0x6e   : > { %p4993_p11 = pnand %p4992_p7, %p5694_p4  ;;  %p4998_p1 = por %p4997_p0, %p4996_p13 }
  0x70   : > { %p4994_p12 = pneg %p4993_p11 }
  0x72   : > { %p4999_p2 = pnand %p4998_p1, %p4994_p12 }
  0x74   : > { %5002 = shalt.err (!%p4999_p2)
}
  0x75   : > { %s6681_s23 = smov 64   ;;  %s6683_s6 = smov 4  }
  0x76   : > { %4617 = dma.hbm_to_vmem [thread:$0]  (%p5694_p4), %s799_s7, 1024, %s801_s2, %s5746_s3, %s6681_s23, %s6681_s23, %s6683_s6  }
  0x77   : > { %s6737_s28 = sld [smem:[#allocation44_spill]]  ;;  %s813_s22 = scalar_lea.vmem [#allocation10], %s5738_s24 }
  0x78   : > { %s820_s29 = sshll.u32 %s813_s22, 4  ;;  %s821_s29 = int_to_ptr.vmem [resolvable:$true] %s820_s29 }
  0x7d   : > { %s816_s21 = scalar_lea.hbm %s6737_s28, %s5511_s30  ;;  %s5023_s2 = scalar_lea.hbm %s6737_s28, 2 }
  0x7e   : > { %s818_s26 = sshll.u32 %s816_s21, 4  ;;  %s819_s26 = int_to_ptr.hbm [resolvable:$true] %s818_s26 }
  0x7f   : > { %s5017_s1 = sshra.s32 %s819_s26, 4  ;;  %s5018_s1 = int_to_ptr.hbm [resolvable:$true] %s5017_s1 }
  0x80   : > { %s5019_s5 = scalar_lea.hbm %s5018_s1, 1  ;;  %p5024_p11 = scmp.lt.s32.totalorder %s5018_s1, %s6737_s28 }
  0x81   : > { %p5020_p3 = scmp.ne.s32.totalorder %s5018_s1, %s5019_s5  ;;  %p5025_p12 = scmp.lt.s32.totalorder %s5023_s2, %s5019_s5 }
  0x83   : > { %p5021_p6 = pnand %p5020_p3, %p5694_p4  ;;  %p5026_p13 = por %p5025_p12, %p5024_p11 }
  0x85   : > { %p5022_p7 = pneg %p5021_p6 }
  0x87   : > { %p5027_p0 = pnand %p5026_p13, %p5022_p7 }
  0x89   : > { %5030 = shalt.err (!%p5027_p0)
}
  0x8a   : > { %4618 = dma.hbm_to_vmem [thread:$0]  (%p5694_p4), %s819_s26, 16, %s821_s29, %s5746_s3  }
  0x8b   : > { %s6738_s21 = sld [smem:[#allocation45_spill]]  ;;  %s831_s25 = scalar_lea.vmem [#allocation11], %s5761_s14 }
  0x8c   : > { %s839_s22 = sshll.u32 %s831_s25, 4  ;;  %s840_s22 = int_to_ptr.vmem [resolvable:$true] %s839_s22 }
  0x91   : > { %s836_s4 = scalar_lea.hbm %s6738_s21, %s5767_s0  ;;  %s5051_s29 = scalar_lea.hbm %s6738_s21, 128 }
  0x92   : > { %s837_s6 = sshll.u32 %s836_s4, 4  ;;  %s838_s6 = int_to_ptr.hbm [resolvable:$true] %s837_s6 }
  0x93   : > { %s5045_s23 = sshra.s32 %s838_s6, 4  ;;  %s5046_s23 = int_to_ptr.hbm [resolvable:$true] %s5045_s23 }
  0x94   : > { %s5047_s1 = scalar_lea.hbm %s5046_s23, 64  ;;  %p5052_p6 = scmp.lt.s32.totalorder %s5046_s23, %s6738_s21 }
  0x95   : > { %p5048_p1 = scmp.ne.s32.totalorder %s5046_s23, %s5047_s1  ;;  %p5053_p7 = scmp.lt.s32.totalorder %s5051_s29, %s5047_s1 }
  0x97   : > { %p5049_p2 = pnand %p5048_p1, %p5694_p4  ;;  %p5054_p11 = por %p5053_p7, %p5052_p6 }
  0x99   : > { %p5050_p3 = pneg %p5049_p2 }
  0x9b   : > { %p5055_p12 = pnand %p5054_p11, %p5050_p3 }
  0x9d   : > { %5058 = shalt.err (!%p5055_p12)
}
  0x9e   : > { %s6739_s8 = smov 4   ;;  %s6740_s9 = smov 64  }
  0x9f   : > { %4619 = dma.hbm_to_vmem [thread:$0]  (%p5694_p4), %s838_s6, 1024, %s840_s22, %s5746_s3, %s6740_s9, %s6740_s9, %s6739_s8  }
  0xa0   : > { %s6741_s5 = sld [smem:[#allocation46_spill]]  ;;  %s852_s23 = scalar_lea.vmem [#allocation12], %s5738_s24 }
  0xa1   : > { %s859_s1 = sshll.u32 %s852_s23, 4  ;;  %s5840_s26 = sshll.u32 %s5738_s24, 7  ;;  %s860_s1 = int_to_ptr.vmem [resolvable:$true] %s859_s1 }
  0xa6   : > { %s855_s2 = scalar_lea.hbm %s6741_s5, %s5511_s30  ;;  %s5079_s22 = scalar_lea.hbm %s6741_s5, 2 }
  0xa7   : > { %s857_s29 = sshll.u32 %s855_s2, 4  ;;  %s858_s29 = int_to_ptr.hbm [resolvable:$true] %s857_s29 }
  0xa8   : > { %s5073_s7 = sshra.s32 %s858_s29, 4  ;;  %s5074_s7 = int_to_ptr.hbm [resolvable:$true] %s5073_s7 }
  0xa9   : > { %s5075_s21 = scalar_lea.hbm %s5074_s7, 1  ;;  %p5080_p2 = scmp.lt.s32.totalorder %s5074_s7, %s6741_s5 }
  0xaa   : > { %p5076_p13 = scmp.ne.s32.totalorder %s5074_s7, %s5075_s21  ;;  %p5081_p3 = scmp.lt.s32.totalorder %s5079_s22, %s5075_s21 }
  0xac   : > { %p5077_p0 = pnand %p5076_p13, %p5694_p4  ;;  %p5082_p6 = por %p5081_p3, %p5080_p2 }
  0xae   : > { %p5078_p1 = pneg %p5077_p0 }
  0xb0   : > { %p5083_p7 = pnand %p5082_p6, %p5078_p1 }
  0xb2   : > { %5086 = shalt.err (!%p5083_p7)
}
  0xb3   : > { %4620 = dma.hbm_to_vmem [thread:$0]  (%p5694_p4), %s858_s29, 16, %s860_s1, %s5746_s3  }
  0xb4   : > { %s5854_s2 = sshll.u32 %s5511_s30, 7  ;;  %s6742_s6 = sld [smem:[#allocation47_spill]] }
  0xb5   : > { %s870_s7 = scalar_lea.vmem [#allocation13], %s5840_s26  ;;  %s4018_s25 = sshll.u32 %s5738_s24, 1 }
  0xb6   : > { %s878_s21 = sshll.u32 %s870_s7, 4  ;;  %s879_s21 = int_to_ptr.vmem [resolvable:$true] %s878_s21 }
  0xba   : > { %s6743_s20 = smov %s6742_s6  ;;  %s875_s4 = scalar_lea.hbm %s6742_s6, %s5854_s2 }
  0xbb   : > { %s876_s22 = sshll.u32 %s875_s4, 4  ;;  %s5107_s18 = scalar_lea.hbm %s6743_s20, 256  ;;  %s877_s22 = int_to_ptr.hbm [resolvable:$true] %s876_s22 }
  0xbc   : > { %s5101_s5 = sshra.s32 %s877_s22, 4  ;;  %s5102_s5 = int_to_ptr.hbm [resolvable:$true] %s5101_s5 }
  0xbd   : > { %s5103_s19 = scalar_lea.hbm %s5102_s5, 128  ;;  %p5108_p0 = scmp.lt.s32.totalorder %s5102_s5, %s6743_s20 }
  0xbe   : > { %p5104_p11 = scmp.ne.s32.totalorder %s5102_s5, %s5103_s19  ;;  %p5109_p1 = scmp.lt.s32.totalorder %s5107_s18, %s5103_s19 }
  0xc0   : > { %p5105_p12 = pnand %p5104_p11, %p5694_p4  ;;  %p5110_p2 = por %p5109_p1, %p5108_p0 }
  0xc2   : > { %p5106_p13 = pneg %p5105_p12 }
  0xc4   : > { %p5111_p3 = pnand %p5110_p2, %p5106_p13 }
  0xc6   : > { %5114 = shalt.err (!%p5111_p3)
}
  0xc7   : > { %s6694_s23 = smov 128   ;;  %s5525_s6 = smov 8  }
  0xc8   : > { %4621 = dma.hbm_to_vmem [thread:$0]  (%p5694_p4), %s877_s22, 2048, %s879_s21, %s5746_s3, %s6694_s23, %s6694_s23, %s5525_s6  }
  0xc9   : > { %s4019_s4 = sshll.u32 %s5511_s30, 1  ;;  %s6744_s10 = sld [smem:[#allocation48_spill]] }
  0xca   : > { %s892_s18 = scalar_lea.vmem [#allocation14], %s4018_s25 }
  0xcb   : > { %s900_s19 = sshll.u32 %s892_s18, 4  ;;  %s901_s19 = int_to_ptr.vmem [resolvable:$true] %s900_s19 }
  0xcf   : > { %s896_s17 = scalar_lea.hbm %s6744_s10, %s4019_s4  ;;  %s5135_s21 = scalar_lea.hbm %s6744_s10, 4 }
  0xd0   : > { %s898_s5 = sshll.u32 %s896_s17, 4  ;;  %s899_s5 = int_to_ptr.hbm [resolvable:$true] %s898_s5 }
  0xd1   : > { %s5129_s29 = sshra.s32 %s899_s5, 4  ;;  %s5130_s29 = int_to_ptr.hbm [resolvable:$true] %s5129_s29 }
  0xd2   : > { %s5131_s28 = scalar_lea.hbm %s5130_s29, 2  ;;  %p5136_p12 = scmp.lt.s32.totalorder %s5130_s29, %s6744_s10 }
  0xd3   : > { %p5132_p6 = scmp.ne.s32.totalorder %s5130_s29, %s5131_s28  ;;  %p5137_p13 = scmp.lt.s32.totalorder %s5135_s21, %s5131_s28 }
  0xd5   : > { %p5133_p7 = pnand %p5132_p6, %p5694_p4  ;;  %p5138_p0 = por %p5137_p13, %p5136_p12 }
  0xd7   : > { %p5134_p11 = pneg %p5133_p7 }
  0xd9   : > { %p5139_p1 = pnand %p5138_p0, %p5134_p11 }
  0xdb   : > { %5142 = shalt.err (!%p5139_p1)
}
  0xdc   : > { %4622 = dma.hbm_to_vmem [thread:$0]  (%p5694_p4), %s899_s5, 32, %s901_s19, %s5746_s3  }
  0xdd   : > { %s6745_s11 = sld [smem:[#allocation49_spill]]  ;;  %s911_s20 = scalar_lea.vmem [#allocation15], %s5761_s14 }
  0xde   : > { %s919_s7 = sshll.u32 %s911_s20, 4  ;;  %s920_s7 = int_to_ptr.vmem [resolvable:$true] %s919_s7 }
  0xe3   : > { %s916_s16 = scalar_lea.hbm %s6745_s11, %s5767_s0  ;;  %s5163_s19 = scalar_lea.hbm %s6745_s11, 128 }
  0xe4   : > { %s917_s1 = sshll.u32 %s916_s16, 4  ;;  %s918_s1 = int_to_ptr.hbm [resolvable:$true] %s917_s1 }
  0xe5   : > { %s5157_s23 = sshra.s32 %s918_s1, 4  ;;  %s5158_s23 = int_to_ptr.hbm [resolvable:$true] %s5157_s23 }
  0xe6   : > { %s5159_s17 = scalar_lea.hbm %s5158_s23, 64  ;;  %p5164_p7 = scmp.lt.s32.totalorder %s5158_s23, %s6745_s11 }
  0xe7   : > { %p5160_p2 = scmp.ne.s32.totalorder %s5158_s23, %s5159_s17  ;;  %p5165_p11 = scmp.lt.s32.totalorder %s5163_s19, %s5159_s17 }
  0xe9   : > { %p5161_p3 = pnand %p5160_p2, %p5694_p4  ;;  %p5166_p12 = por %p5165_p11, %p5164_p7 }
  0xeb   : > { %p5162_p6 = pneg %p5161_p3 }
  0xed   : > { %p5167_p13 = pnand %p5166_p12, %p5162_p6 }
  0xef   : > { %5170 = shalt.err (!%p5167_p13)
}
  0xf0   : > { %4623 = dma.hbm_to_vmem [thread:$0]  (%p5694_p4), %s918_s1, 1024, %s920_s7, %s5746_s3, %s6740_s9, %s6740_s9, %s6739_s8  }
  0xf1   : > { %s935_s21 = scalar_lea.hbm %s6644_s12, %s5511_s30  ;;  %s932_s22 = scalar_lea.vmem [#allocation16], %s5738_s24 }
  0xf2   : > { %s939_s25 = sshll.u32 %s932_s22, 4  ;;  %s937_s4 = sshll.u32 %s935_s21, 4  ;;  %s940_s25 = int_to_ptr.vmem [resolvable:$true] %s939_s25  ;;  %s938_s4 = int_to_ptr.hbm [resolvable:$true] %s937_s4 }
  0xf3   : > { %s5185_s16 = sshra.s32 %s938_s4, 4  ;;  %s5191_s7 = scalar_lea.hbm %s6644_s12, 2  ;;  %s5186_s16 = int_to_ptr.hbm [resolvable:$true] %s5185_s16 }
  0xf4   : > { %s5187_s20 = scalar_lea.hbm %s5186_s16, 1  ;;  %p5192_p3 = scmp.lt.s32.totalorder %s5186_s16, %s6644_s12 }
  0xf5   : > { %p5188_p0 = scmp.ne.s32.totalorder %s5186_s16, %s5187_s20  ;;  %p5193_p6 = scmp.lt.s32.totalorder %s5191_s7, %s5187_s20 }
  0xf7   : > { %p5189_p1 = pnand %p5188_p0, %p5694_p4  ;;  %p5194_p7 = por %p5193_p6, %p5192_p3 }
  0xf9   : > { %p5190_p2 = pneg %p5189_p1 }
  0xfb   : > { %p5195_p11 = pnand %p5194_p7, %p5190_p2 }
  0xfd   : > { %5198 = shalt.err (!%p5195_p11)
}
  0xfe   : > { %4624 = dma.hbm_to_vmem [thread:$0]  (%p5694_p4), %s938_s4, 16, %s940_s25, %s5746_s3  }
  0xff   : > { %s955_s5 = scalar_lea.hbm %s6645_s13, %s5854_s2  ;;  %s950_s28 = scalar_lea.vmem [#allocation17], %s5840_s26 }
 0x100   : > { %s958_s0 = sshll.u32 %s950_s28, 4  ;;  %s956_s14 = sshll.u32 %s955_s5, 4  ;;  %s959_s0 = int_to_ptr.vmem [resolvable:$true] %s958_s0  ;;  %s957_s14 = int_to_ptr.hbm [resolvable:$true] %s956_s14 }
 0x101   : > { %s5213_s21 = sshra.s32 %s957_s14, 4  ;;  %s5219_s25 = scalar_lea.hbm %s6645_s13, 256  ;;  %s5214_s21 = int_to_ptr.hbm [resolvable:$true] %s5213_s21 }
 0x102   : > { %s5215_s22 = scalar_lea.hbm %s5214_s21, 128  ;;  %p5220_p1 = scmp.lt.s32.totalorder %s5214_s21, %s6645_s13 }
 0x103   : > { %p5216_p12 = scmp.ne.s32.totalorder %s5214_s21, %s5215_s22  ;;  %p5221_p2 = scmp.lt.s32.totalorder %s5219_s25, %s5215_s22 }
 0x105   : > { %p5217_p13 = pnand %p5216_p12, %p5694_p4  ;;  %p5222_p3 = por %p5221_p2, %p5220_p1 }
 0x107   : > { %p5218_p0 = pneg %p5217_p13 }
 0x109   : > { %p5223_p6 = pnand %p5222_p3, %p5218_p0 }
 0x10b   : > { %5226 = shalt.err (!%p5223_p6)
}
 0x10c   : > { %s6746_s17 = smov 128   ;;  %s984_s18 = scalar_lea.hbm %s6647_s15, %s5854_s2 }
 0x10d   : > { %4625 = dma.hbm_to_vmem [thread:$0]  (%p5694_p4), %s957_s14, 2048, %s959_s0, %s5746_s3, %s6746_s17, %s6746_s17, %s5525_s6  }
 0x10e   : > { %s979_s29 = scalar_lea.vmem [#allocation18], %s5840_s26  ;;  %s985_s5 = sshll.u32 %s984_s18, 4  ;;  %s986_s5 = int_to_ptr.hbm [resolvable:$true] %s985_s5 }
 0x10f   : > { %s987_s19 = sshll.u32 %s979_s29, 4  ;;  %s5241_s28 = sshra.s32 %s986_s5, 4  ;;  %s988_s19 = int_to_ptr.vmem [resolvable:$true] %s987_s19  ;;  %s5242_s28 = int_to_ptr.hbm [resolvable:$true] %s5241_s28 }
 0x110   : > { %s5243_s21 = scalar_lea.hbm %s5242_s28, 128  ;;  %s5247_s6 = scalar_lea.hbm %s6647_s15, 256 }
 0x111   : > { %p5244_p7 = scmp.ne.s32.totalorder %s5242_s28, %s5243_s21  ;;  %p5248_p13 = scmp.lt.s32.totalorder %s5242_s28, %s6647_s15 }
 0x112   : > { %p5249_p0 = scmp.lt.s32.totalorder %s5247_s6, %s5243_s21 }
 0x113   : > { %p5245_p11 = pnand %p5244_p7, %p5694_p4 }
 0x114   : > { %p5250_p1 = por %p5249_p0, %p5248_p13 }
 0x115   : > { %p5246_p12 = pneg %p5245_p11 }
 0x117   : > { %p5251_p2 = pnand %p5250_p1, %p5246_p12 }
 0x119   : > { %5254 = shalt.err (!%p5251_p2)
}
 0x11a   : > { %4626 = dma.hbm_to_vmem [thread:$0]  (%p5694_p4), %s986_s5, 2048, %s988_s19, %s5746_s3, %s6740_s9, %s6740_s9, %s6739_s8  }
 0x11b   : > { %s6747_s20 = sld [smem:[#allocation51_spill]]  ;;  %s1000_s4 = scalar_lea.vmem [#allocation19], %s5738_s24 }
 0x11c   : > { %s1007_s23 = sshll.u32 %s1000_s4, 4  ;;  %s1008_s23 = int_to_ptr.vmem [resolvable:$true] %s1007_s23 }
 0x121   : > { %s1003_s25 = scalar_lea.hbm %s6747_s20, %s5511_s30  ;;  %s5275_s8 = scalar_lea.hbm %s6747_s20, 2 }
 0x122   : > { %s1005_s17 = sshll.u32 %s1003_s25, 4  ;;  %s1006_s17 = int_to_ptr.hbm [resolvable:$true] %s1005_s17 }
 0x123   : > { %s5269_s7 = sshra.s32 %s1006_s17, 4  ;;  %s5270_s7 = int_to_ptr.hbm [resolvable:$true] %s5269_s7 }
 0x124   : > { %s5271_s1 = scalar_lea.hbm %s5270_s7, 1  ;;  %p5276_p11 = scmp.lt.s32.totalorder %s5270_s7, %s6747_s20 }
 0x125   : > { %p5272_p3 = scmp.ne.s32.totalorder %s5270_s7, %s5271_s1  ;;  %p5277_p12 = scmp.lt.s32.totalorder %s5275_s8, %s5271_s1 }
 0x127   : > { %p5273_p6 = pnand %p5272_p3, %p5694_p4  ;;  %p5278_p13 = por %p5277_p12, %p5276_p11 }
 0x129   : > { %p5274_p7 = pneg %p5273_p6 }
 0x12b   : > { %p5279_p0 = pnand %p5278_p13, %p5274_p7 }
 0x12d   : > { %5282 = shalt.err (!%p5279_p0)
}
 0x12e   : > { %4627 = dma.hbm_to_vmem [thread:$0]  (%p5694_p4), %s1006_s17, 16, %s1008_s23, %s5746_s3  }
 0x12f   : > { %s6748_s21 = sld [smem:[#allocation52_spill]]  ;;  %s1017_s16 = scalar_lea.vmem [#allocation20], %s5738_s24 }
 0x130   : > { %s1024_s6 = sshll.u32 %s1017_s16, 4  ;;  %s1025_s6 = int_to_ptr.vmem [resolvable:$true] %s1024_s6 }
 0x135   : > { %s1020_s22 = scalar_lea.hbm %s6748_s21, %s5511_s30  ;;  %s5303_s4 = scalar_lea.hbm %s6748_s21, 2 }
 0x136   : > { %s1022_s0 = sshll.u32 %s1020_s22, 4  ;;  %s1023_s0 = int_to_ptr.hbm [resolvable:$true] %s1022_s0 }
 0x137   : > { %s5297_s14 = sshra.s32 %s1023_s0, 4  ;;  %s5298_s14 = int_to_ptr.hbm [resolvable:$true] %s5297_s14 }
 0x138   : > { %s5299_s26 = scalar_lea.hbm %s5298_s14, 1  ;;  %p5304_p6 = scmp.lt.s32.totalorder %s5298_s14, %s6748_s21 }
 0x139   : > { %p5300_p1 = scmp.ne.s32.totalorder %s5298_s14, %s5299_s26  ;;  %p5305_p7 = scmp.lt.s32.totalorder %s5303_s4, %s5299_s26 }
 0x13b   : > { %p5301_p2 = pnand %p5300_p1, %p5694_p4  ;;  %p5306_p11 = por %p5305_p7, %p5304_p6 }
 0x13d   : > { %p5302_p3 = pneg %p5301_p2 }
 0x13f   : > { %p5307_p12 = pnand %p5306_p11, %p5302_p3 }
 0x141   : > { %5310 = shalt.err (!%p5307_p12)
}
 0x142   : > { %4628 = dma.hbm_to_vmem [thread:$0]  (%p5694_p4), %s1023_s0, 16, %s1025_s6, %s5746_s3  }
 0x143   : > { %s6749_s18 = sld [smem:[#allocation53_spill]]  ;;  %s1034_s8 = scalar_lea.vmem [#allocation21], %s5738_s24 }
 0x144   : > { %s1041_s9 = sshll.u32 %s1034_s8, 4  ;;  %s1042_s9 = int_to_ptr.vmem [resolvable:$true] %s1041_s9 }
 0x149   : > { %s1037_s29 = scalar_lea.hbm %s6749_s18, %s5511_s30  ;;  %s5331_s6 = scalar_lea.hbm %s6749_s18, 2 }
 0x14a   : > { %s1039_s19 = sshll.u32 %s1037_s29, 4  ;;  %s1040_s19 = int_to_ptr.hbm [resolvable:$true] %s1039_s19 }
 0x14b   : > { %s5325_s5 = sshra.s32 %s1040_s19, 4  ;;  %s5326_s5 = int_to_ptr.hbm [resolvable:$true] %s5325_s5 }
 0x14c   : > { %s5327_s28 = scalar_lea.hbm %s5326_s5, 1  ;;  %p5332_p2 = scmp.lt.s32.totalorder %s5326_s5, %s6749_s18 }
 0x14d   : > { %p5328_p13 = scmp.ne.s32.totalorder %s5326_s5, %s5327_s28  ;;  %p5333_p3 = scmp.lt.s32.totalorder %s5331_s6, %s5327_s28 }
 0x14f   : > { %p5329_p0 = pnand %p5328_p13, %p5694_p4  ;;  %p5334_p6 = por %p5333_p3, %p5332_p2 }
 0x151   : > { %p5330_p1 = pneg %p5329_p0 }
 0x153   : > { %p5335_p7 = pnand %p5334_p6, %p5330_p1 }
 0x155   : > { %5338 = shalt.err (!%p5335_p7)
}
 0x156   : > { %4629 = dma.hbm_to_vmem [thread:$0]  (%p5694_p4), %s1040_s19, 16, %s1042_s9, %s5746_s3  }
 0x157   : > { %s6750_s25 = sld [smem:[#allocation54_spill]]  ;;  %s1051_s23 = scalar_lea.vmem [#allocation22], %s5738_s24 }
 0x158   : > { %s1058_s17 = sshll.u32 %s1051_s23, 4  ;;  %s1059_s17 = int_to_ptr.vmem [resolvable:$true] %s1058_s17 }
 0x15d   : > { %s1054_s4 = scalar_lea.hbm %s6750_s25, %s5511_s30  ;;  %s5359_s9 = scalar_lea.hbm %s6750_s25, 2 }
 0x15e   : > { %s1056_s7 = sshll.u32 %s1054_s4, 4  ;;  %s1057_s7 = int_to_ptr.hbm [resolvable:$true] %s1056_s7 }
 0x15f   : > { %s5353_s1 = sshra.s32 %s1057_s7, 4  ;;  %s5354_s1 = int_to_ptr.hbm [resolvable:$true] %s5353_s1 }
 0x160   : > { %s5355_s29 = scalar_lea.hbm %s5354_s1, 1  ;;  %p5360_p0 = scmp.lt.s32.totalorder %s5354_s1, %s6750_s25 }
 0x161   : > { %p5356_p11 = scmp.ne.s32.totalorder %s5354_s1, %s5355_s29  ;;  %p5361_p1 = scmp.lt.s32.totalorder %s5359_s9, %s5355_s29 }
 0x163   : > { %p5357_p12 = pnand %p5356_p11, %p5694_p4  ;;  %p5362_p2 = por %p5361_p1, %p5360_p0 }
 0x165   : > { %p5358_p13 = pneg %p5357_p12 }
 0x167   : > { %p5363_p3 = pnand %p5362_p2, %p5358_p13 }
 0x169   : > { %5366 = shalt.err (!%p5363_p3)
}
 0x16a   : > { %4630 = dma.hbm_to_vmem [thread:$0]  (%p5694_p4), %s1057_s7, 16, %s1059_s17, %s5746_s3  }
 0x16b   : > { %s6751_s6 = sld [smem:[#allocation55_spill]]  ;;  %s1068_s26 = scalar_lea.vmem [#allocation23], %s5738_s24 }
 0x16c   : > { %s1075_s2 = sshll.u32 %s1068_s26, 4  ;;  %s1076_s2 = int_to_ptr.vmem [resolvable:$true] %s1075_s2 }
 0x171   : > { %s6752_s0 = smov %s6751_s6  ;;  %s1071_s14 = scalar_lea.hbm %s6751_s6, %s5511_s30 }
 0x172   : > { %s1073_s4 = sshll.u32 %s1071_s14, 4  ;;  %s5387_s17 = scalar_lea.hbm %s6752_s0, 2  ;;  %s1074_s4 = int_to_ptr.hbm [resolvable:$true] %s1073_s4 }
 0x173   : > { %s5381_s23 = sshra.s32 %s1074_s4, 4  ;;  %s5382_s23 = int_to_ptr.hbm [resolvable:$true] %s5381_s23 }
 0x174   : > { %s5383_s1 = scalar_lea.hbm %s5382_s23, 1  ;;  %p5388_p12 = scmp.lt.s32.totalorder %s5382_s23, %s6752_s0 }
 0x175   : > { %p5384_p6 = scmp.ne.s32.totalorder %s5382_s23, %s5383_s1  ;;  %p5389_p13 = scmp.lt.s32.totalorder %s5387_s17, %s5383_s1 }
 0x177   : > { %p5385_p7 = pnand %p5384_p6, %p5694_p4  ;;  %p5390_p0 = por %p5389_p13, %p5388_p12 }
 0x179   : > { %p5386_p11 = pneg %p5385_p7 }
 0x17b   : > { %p5391_p1 = pnand %p5390_p0, %p5386_p11 }
 0x17d   : > { %5394 = shalt.err (!%p5391_p1)
}
 0x17e   : > { %4631 = dma.hbm_to_vmem [thread:$0]  (%p5694_p4), %s1074_s4, 16, %s1076_s2, %s5746_s3  }
 0x17f   : > { %s6753_s28 = sld [smem:[#allocation56_spill]]  ;;  %s1085_s16 = scalar_lea.vmem [#allocation24], %s5738_s24 }
 0x180   : > { %s1092_s6 = sshll.u32 %s1085_s16, 4  ;;  %s1093_s6 = int_to_ptr.vmem [resolvable:$true] %s1092_s6 }
 0x185   : > { %s1088_s22 = scalar_lea.hbm %s6753_s28, %s5511_s30  ;;  %s5415_s2 = scalar_lea.hbm %s6753_s28, 2 }
 0x186   : > { %s1090_s14 = sshll.u32 %s1088_s22, 4  ;;  %s1091_s14 = int_to_ptr.hbm [resolvable:$true] %s1090_s14 }
 0x187   : > { %s5409_s26 = sshra.s32 %s1091_s14, 4  ;;  %s5410_s26 = int_to_ptr.hbm [resolvable:$true] %s5409_s26 }
 0x188   : > { %s5411_s23 = scalar_lea.hbm %s5410_s26, 1  ;;  %p5416_p7 = scmp.lt.s32.totalorder %s5410_s26, %s6753_s28 }
 0x189   : > { %p5412_p2 = scmp.ne.s32.totalorder %s5410_s26, %s5411_s23  ;;  %p5417_p11 = scmp.lt.s32.totalorder %s5415_s2, %s5411_s23 }
 0x18b   : > { %p5413_p3 = pnand %p5412_p2, %p5694_p4  ;;  %p5418_p12 = por %p5417_p11, %p5416_p7 }
 0x18d   : > { %p5414_p6 = pneg %p5413_p3 }
 0x18f   : > { %p5419_p13 = pnand %p5418_p12, %p5414_p6 }
 0x191   : > { %5422 = shalt.err (!%p5419_p13)
}
 0x192   : > { %4632 = dma.hbm_to_vmem [thread:$0]  (%p5694_p4), %s1091_s14, 16, %s1093_s6, %s5746_s3  }
 0x193   : > { %s6754_s5 = sld [smem:[#allocation57_spill]]  ;;  %s1102_s19 = scalar_lea.vmem [#allocation25], %s5738_s24 }
 0x194   : > { %s1109_s22 = sshll.u32 %s1102_s19, 4  ;;  %s1110_s22 = int_to_ptr.vmem [resolvable:$true] %s1109_s22 }
 0x199   : > { %s1105_s9 = scalar_lea.hbm %s6754_s5, %s5511_s30  ;;  %s5443_s6 = scalar_lea.hbm %s6754_s5, 2 }
 0x19a   : > { %s1107_s16 = sshll.u32 %s1105_s9, 4  ;;  %s1108_s16 = int_to_ptr.hbm [resolvable:$true] %s1107_s16 }
 0x19b   : > { %s5437_s26 = sshra.s32 %s1108_s16, 4  ;;  %s5438_s26 = int_to_ptr.hbm [resolvable:$true] %s5437_s26 }
 0x19c   : > { %s5439_s23 = scalar_lea.hbm %s5438_s26, 1  ;;  %p5444_p3 = scmp.lt.s32.totalorder %s5438_s26, %s6754_s5 }
 0x19d   : > { %p5440_p0 = scmp.ne.s32.totalorder %s5438_s26, %s5439_s23  ;;  %p5445_p6 = scmp.lt.s32.totalorder %s5443_s6, %s5439_s23 }
 0x19f   : > { %p5441_p1 = pnand %p5440_p0, %p5694_p4  ;;  %p5446_p7 = por %p5445_p6, %p5444_p3 }
 0x1a1   : > { %p5442_p2 = pneg %p5441_p1 }
 0x1a3   : > { %p5447_p11 = pnand %p5446_p7, %p5442_p2 }
 0x1a5   : > { %5450 = shalt.err (!%p5447_p11)
}
 0x1a6   : > { %4633 = dma.hbm_to_vmem [thread:$0]  (%p5694_p4), %s1108_s16, 16, %s1110_s22, %s5746_s3  }
 0x1a7 PF: > { %1118 = sbr.rel (%p5708_p10) target bundleno = 3917 (0xf4d), region = 120  ;;  %s6756_s24 = sld [smem:[#allocation33_spill]] (!%p5708_p10) }
 0x1ac   : > { %5482 = dma.done.wait (%p121_p5), [#allocation4], 256  }
 0x1ad   : > { %5484 = vsyncadd (%p121_p5), [#allocation4], 4294967040 }
 0x1ae   : > { %5486 = dma.done.wait (%p121_p5), [#allocation6], 128  }
 0x1af   : > { %5488 = vsyncadd (%p121_p5), [#allocation6], 4294967168  ;;  %s6757_s27 = sld [smem:[#allocation31_spill]]  ;;  %s1130_s3 = sand.u32 1, %s6756_s24  }
 0x1b0   : > { %s1131_s7 = scalar_lea.sflag [#allocation4], %s1130_s3 }
 0x1b5   : > { %s6088_s8 = sand.u32 1, %s6757_s27  }
 0x1b6   : > { %s4607_s17 = smul.u32 192, %s6088_s8 }
 0x1b8   : > { %s6091_s9 = scalar_lea.vmem [#allocation7], %s4607_s17 }
 0x1b9   : > { %5490 = dma.done.wait (%p5703_p8), %s1131_s7, 12528  }
 0x1ba   : > { %5492 = vsyncadd (%p5703_p8), %s1131_s7, 4294954768  ;;  %s4608_s19 = smul.u32 3, %s6088_s8  ;;  %s4032_s22 = sshll.u32 %s6088_s8, 6 }
 0x1bb   : > { %s4034_s16 = sshll.u32 %s6088_s8, 7  ;;  %s4035_s26 = sshll.u32 %s6088_s8, 1 }
 0x1bc   : > { %s6101_s23 = scalar_lea.vmem [#allocation8], %s4608_s19  ;;  %s6103_s1 = scalar_lea.vmem [#allocation9], %s4032_s22 }
 0x1bd   : > { %s6106_s6 = scalar_lea.vmem [#allocation11], %s4032_s22  ;;  %s6109_s2 = scalar_lea.vmem [#allocation13], %s4034_s16 }
 0x1be   : > { %s6111_s30 = scalar_lea.vmem [#allocation14], %s4035_s26  ;;  %s6113_s27 = scalar_lea.vmem [#allocation15], %s4032_s22 }
 0x1bf   : > { %s6116_s3 = scalar_lea.vmem [#allocation17], %s4034_s16  ;;  %s6118_s17 = scalar_lea.vmem [#allocation18], %s4034_s16 }
 0x1c0   : > { %5494 = dma.done.wait (%p121_p5), [#allocation6], 1024  }
 0x1c1   : > { %5496 = vsyncadd (%p121_p5), [#allocation6], 4294966272  ;;  %p1456_p4 = scmp.lt.s32.totalorder %s6756_s24, 1  ;;  %s6759_s14 = sld [smem:[#allocation50_spill]] }
 0x1c2   : > { %s6760_s29 = sld [smem:[#allocation38_spill]] (!%p4004_p9) }
 0x1c3   : > { %s1457_s22 = scalar_select %p1456_p4, %s6756_s24, 1 }
 0x1c4   : > { %1464 = sbr.rel (%p4004_p9) target bundleno = 460 (0x1cc), region = 212 }
 0x1c5   : > { %s4040_s26 = sshll.u32 %s1457_s22, 1 }
 0x1c7   : > { %s6136_s7 = scalar_lea.vmem %s6759_s14, %s4040_s26 }
 0x1c8   : > { %s6761_s5 = smov (!%p4004_p9), %s6760_s29 }
 0x1c9   : > { %v1465_v0 = vld [vmem:[%s6760_s29] sm:$0xff]  ;;  %v1466_v1 = vld [vmem:[%s6761_s5 + $0x8] sm:$0xff] }
 0x1ca   : > { %1467 = vst [vmem:[#allocation2] sm:$0xff] %v1465_v0 }
 0x1cb   : > { %1468 = vst [vmem:[#allocation2 + $0x8] sm:$0xff] %v1466_v1 }
 0x1cc PF: > { %v4128_v2 = vld [vmem:[%s6091_s9 + $0xa8] sm:$0xf]  ;;  %v4521_v3 = vld [vmem:[%s6091_s9 + $0xb0] sm:$0xf0]  ;;  %v4520_v4 = vld [vmem:[%s6091_s9 + $0xac] sm:$0xf] }
 0x1cd   : > { %v4129_v5 = vor.u32 %v4521_v3, %v4128_v2  ;;  %v4130_v6 = vld [vmem:[%s6091_s9 + $0xb4] sm:$0xf0]  ;;  %v4116_v7 = vld [vmem:[%s6091_s9 + $0x90] sm:$0xf]  ;;  %v4518_v8 = vld [vmem:[%s6091_s9 + $0x98] sm:$0xf0] }
 0x1ce   : > { %v4133_v9 = vor.u32 %v4520_v4, %v4130_v6  ;;  %v4517_v10 = vld [vmem:[%s6091_s9 + $0x94] sm:$0xf]  ;;  %v4118_v11 = vld [vmem:[%s6091_s9 + $0x9c] sm:$0xf0]  ;;  %v4117_v12 = vor.u32 %v4518_v8, %v4116_v7  ;;  %v4104_v14 = vld [vmem:[%s6091_s9 + $0x78] sm:$0xf] }
 0x1cf   : > { %1643 = vmatpush.bf16.msra.mxu0 %v4129_v5  ;;  %v4121_v13 = vor.u32 %v4517_v10, %v4118_v11  ;;  %v4515_v15 = vld [vmem:[%s6091_s9 + $0x80] sm:$0xf0]  ;;  %v4514_v16 = vld [vmem:[%s6091_s9 + $0x7c] sm:$0xf]  ;;  %v4106_v17 = vld [vmem:[%s6091_s9 + $0x84] sm:$0xf0] }
 0x1d0   : > { %1657 = vmatpush.bf16.msra.mxu1 %v4133_v9  ;;  %v4105_v18 = vor.u32 %v4515_v15, %v4104_v14  ;;  %v4109_v19 = vor.u32 %v4514_v16, %v4106_v17  ;;  %v4092_v20 = vld [vmem:[%s6091_s9 + $0x60] sm:$0xf]  ;;  %v4512_v21 = vld [vmem:[%s6091_s9 + $0x68] sm:$0xf0]  ;;  %v4511_v22 = vld [vmem:[%s6091_s9 + $0x64] sm:$0xf] }
 0x1d1   : > { %v4094_v23 = vld [vmem:[%s6091_s9 + $0x6c] sm:$0xf0]  ;;  %v4080_v24 = vld [vmem:[%s6091_s9 + $0x48] sm:$0xf]  ;;  %v4093_v25 = vor.u32 %v4512_v21, %v4092_v20  ;;  %v4509_v26 = vld [vmem:[%s6091_s9 + $0x50] sm:$0xf0] }
 0x1d2   : > { %v4508_v27 = vld [vmem:[%s6091_s9 + $0x4c] sm:$0xf]  ;;  %v4097_v28 = vor.u32 %v4511_v22, %v4094_v23  ;;  %v4082_v29 = vld [vmem:[%s6091_s9 + $0x54] sm:$0xf0]  ;;  %v4081_v30 = vor.u32 %v4509_v26, %v4080_v24  ;;  %v4068_v32 = vld [vmem:[%s6091_s9 + $0x30] sm:$0xf] }
 0x1d3   : > { %1644 = vmatpush.bf16.msra.mxu0 %v4117_v12  ;;  %v4085_v31 = vor.u32 %v4508_v27, %v4082_v29  ;;  %v4506_v33 = vld [vmem:[%s6091_s9 + $0x38] sm:$0xf0]  ;;  %v4505_v34 = vld [vmem:[%s6091_s9 + $0x34] sm:$0xf]  ;;  %v4070_v35 = vld [vmem:[%s6091_s9 + $0x3c] sm:$0xf0] }
 0x1d4   : > { %1658 = vmatpush.bf16.msra.mxu1 %v4121_v13  ;;  %v4069_v36 = vor.u32 %v4506_v33, %v4068_v32  ;;  %v4073_v37 = vor.u32 %v4505_v34, %v4070_v35  ;;  %v4056_v38 = vld [vmem:[%s6091_s9 + $0x18] sm:$0xf]  ;;  %v4503_v39 = vld [vmem:[%s6091_s9 + $0x20] sm:$0xf0]  ;;  %v4502_v40 = vld [vmem:[%s6091_s9 + $0x1c] sm:$0xf] }
 0x1d5   : > { %v4058_v41 = vld [vmem:[%s6091_s9 + $0x24] sm:$0xf0]  ;;  %v4057_v42 = vor.u32 %v4503_v39, %v4056_v38  ;;  %v4044_v44 = vld [vmem:[%s6091_s9] sm:$0xf]  ;;  %v4500_v45 = vld [vmem:[%s6091_s9 + $0x8] sm:$0xf0] }
 0x1d6   : > { %v4061_v43 = vor.u32 %v4502_v40, %v4058_v41  ;;  %v4499_v46 = vld [vmem:[%s6091_s9 + $0x4] sm:$0xf]  ;;  %v4046_v47 = vld [vmem:[%s6091_s9 + $0xc] sm:$0xf0]  ;;  %v4045_v48 = vor.u32 %v4500_v45, %v4044_v44  ;;  %v6178_v49 = vld [vmem:[#allocation2] sm:$0xff]  ;;  %vm1693_vm0 = vcmask 261120  }
 0x1d7   : > { %1645 = vmatpush.bf16.msra.mxu0 %v4105_v18  ;;  %v6180_v50 = vld [vmem:[#allocation2 + $0x8] sm:$0xff]  ;;  %v4049_v51 = vor.u32 %v4499_v46, %v4046_v47  ;;  %s5526_s10 = smov 64   ;;  %s5527_s11 = smov 96   ;;  %v4136_v6 = vld [vmem:[%s6091_s9 + $0xb0] sm:$0xf]  ;;  %vm1732_vm1 = vcmask 64512  }
 0x1d8   : > { %1659 = vmatpush.bf16.msra.mxu1 %v4109_v19  ;;  %v6184_v52 = vpack.c.bf16 %v6180_v50, %v6178_v49  ;;  %v6189_v53 = vld [vmem:[%s6101_s23] sm:$0x7]  ;;  %v4522_v7 = vld [vmem:[%s6091_s9 + $0xb8] sm:$0xf0]  ;;  %v4124_v9 = vld [vmem:[%s6091_s9 + $0x98] sm:$0xf] }
 0x1d9   : > { %v1509_v54 = vperm.slane %v6189_v53, 0  ;;  %v1510_v55 = vperm.slane %v6189_v53, 1  ;;  %v4137_v8 = vor.u32 %v4522_v7, %v4136_v6  ;;  %v4519_v10 = vld [vmem:[%s6091_s9 + $0xa0] sm:$0xf0]  ;;  %v4112_v16 = vld [vmem:[%s6091_s9 + $0x80] sm:$0xf] }
 0x1da   : > { %v4125_v13 = vor.u32 %v4519_v10, %v4124_v9  ;;  %v4516_v17 = vld [vmem:[%s6091_s9 + $0x88] sm:$0xf0]  ;;  %v4100_v21 = vld [vmem:[%s6091_s9 + $0x68] sm:$0xf]  ;;  %v4513_v22 = vld [vmem:[%s6091_s9 + $0x70] sm:$0xf0] }
 0x1db   : > { %1646 = vmatpush.bf16.msra.mxu0 %v4093_v25  ;;  %1671 = vmatpush.bf16.msra.mxu2 %v4137_v8  ;;  %v4113_v20 = vor.u32 %v4516_v17, %v4112_v16  ;;  %v4101_v24 = vor.u32 %v4513_v22, %v4100_v21  ;;  %v4088_v25 = vld [vmem:[%s6091_s9 + $0x50] sm:$0xf]  ;;  %v4510_v26 = vld [vmem:[%s6091_s9 + $0x58] sm:$0xf0]  ;;  %s5528_s0 = smov 32   ;;  %vm1760_vm2 = vcmask 1043456  }
 0x1dc   : > { %1660 = vmatpush.bf16.msra.mxu1 %v4097_v28  ;;  %v4089_v28 = vor.u32 %v4510_v26, %v4088_v25  ;;  %v4076_v29 = vld [vmem:[%s6091_s9 + $0x38] sm:$0xf]  ;;  %v4064_v32 = vld [vmem:[%s6091_s9 + $0x20] sm:$0xf]  ;;  %v4504_v33 = vld [vmem:[%s6091_s9 + $0x28] sm:$0xf0] }
 0x1dd   : > { %v4065_v34 = vor.u32 %v4504_v33, %v4064_v32  ;;  %v4052_v35 = vld [vmem:[%s6091_s9 + $0x8] sm:$0xf]  ;;  %vm2172_vm3 = vcmask 523264   ;;  %vm2175_vm4 = vcmask 785408   ;;  %s6762_s24 = scalar_lea.vmem [#allocation10], %s6088_s8  ;;  %s6764_s23 = scalar_lea.vmem [#allocation21], %s6088_s8 }
 0x1de   : > { %s6766_s29 = scalar_lea.vmem [#allocation16], %s6088_s8  ;;  %s6768_s14 = scalar_lea.vmem [#allocation23], %s6088_s8 }
 0x1df   : > { %1647 = vmatpush.bf16.msra.mxu0 %v4081_v30  ;;  %1672 = vmatpush.bf16.msra.mxu2 %v4125_v13  ;;  %v4507_v30 = vld [vmem:[%s6091_s9 + $0x40] sm:$0xf0]  ;;  %s6772_s4 = sld [smem:[#allocation33_spill]] }
 0x1e0   : > { %1661 = vmatpush.bf16.msra.mxu1 %v4085_v31  ;;  %v4077_v31 = vor.u32 %v4507_v30, %v4076_v29 }
 0x1e3   : > { %1648 = vmatpush.bf16.msra.mxu0 %v4069_v36  ;;  %1673 = vmatpush.bf16.msra.mxu2 %v4113_v20  ;;  %v4501_v36 = vld [vmem:[%s6091_s9 + $0x10] sm:$0xf0]  ;;  %s6763_s9 = scalar_lea.vmem [#allocation20], %s6088_s8 }
 0x1e4   : > { %1662 = vmatpush.bf16.msra.mxu1 %v4073_v37  ;;  %v4053_v37 = vor.u32 %v4501_v36, %v4052_v35 }
 0x1e5   : > { %p4458_p5 = scmp.ne.s32.totalorder %s6772_s4, 1 }
 0x1e6   : > { %s6774_s22 = sld [smem:[#allocation60_spill]] (!%p4458_p5) }
 0x1e7   : > { %1649 = vmatpush.bf16.msra.mxu0 %v4057_v42  ;;  %1674 = vmatpush.bf16.msra.mxu2 %v4101_v24 }
 0x1e8   : > { %1663 = vmatpush.bf16.msra.mxu1 %v4061_v43 }
 0x1eb   : > { %1650 = vmatpush.bf16.msra.mxu0 %v4045_v48  ;;  %1675 = vmatpush.bf16.msra.mxu2 %v4089_v28 }
 0x1ec   : > { %1664 = vmatpush.bf16.msra.mxu1 %v4049_v51 }
 0x1ee   : > { %1651 = vmatmul.bf16.vlgmr.msra.gmra.mxu0 %v6184_v52 }
 0x1ef   : > { %1665 = vmatmul.bf16.vlgmr.msra.gmra.mxu1 %v6184_v52  ;;  %1676 = vmatpush.bf16.msra.mxu2 %v4077_v31 }
 0x1f3   : > { %1677 = vmatpush.bf16.msra.mxu2 %v4065_v34 }
 0x1f7   : > { %1678 = vmatpush.bf16.msra.mxu2 %v4053_v37 }
 0x1fa   : > { %1679 = vmatmul.bf16.vlgmr.msra.gmra.mxu2 %v6184_v52 }
 0x26b   : > { %v1652_v56 = vpop.f32.mrf.mxu0 }
 0x26c   : > { %v1653_v57 = vadd.f32 %v1652_v56, %v1509_v54  ;;  %v1666_v58 = vpop.f32.mrf.mxu1 }
 0x26d   : > { %v1667_v59 = vadd.f32 %v1666_v58, %v1510_v55 }
 0x26f   : > { %v1685_v60 = vpack.c.bf16 %v1667_v59, %v1653_v57 }
 0x271   : > { %v1691_v61 = vrot.slane %v1685_v60, 4  ;;  %v1796_v12 = vunpack.c.l.b16 %v1685_v60 }
 0x273   : > { %v1654_v62 = vpop.f32.mrf.mxu0  ;;  %v1698_v63 = vsel %vm1693_vm0, %v1691_v61, 0  ;;  %v1800_v0 = vunpack.c.l.b16 %v1691_v61  ;;  %v1797_v19 = vpack.c.b16 %v1796_v12, %v1796_v12 }
 0x274   : > { %v1655_v1 = vadd.f32 %v1654_v62, %v1509_v54  ;;  %v1668_v2 = vpop.f32.mrf.mxu1  ;;  %1707 = vmatpush.bf16.xpose.msra.mxu3 %v1698_v63  ;;  %v6233_v54 = vld [vmem:[#allocation5] sm:$0xff] }
 0x275   : > { %v1669_v3 = vadd.f32 %v1668_v2, %v1510_v55  ;;  %v1801_v4 = vpack.c.b16 %v1800_v0, %v1800_v0 }
 0x277   : > { %v1687_v5 = vpack.c.bf16 %v1669_v3, %v1655_v1  ;;  %1924 = vrot.lane.b32.xlu2 %v1801_v4, %s5526_s10  ;;  %1802 = vrot.lane.b32.xlu0 %v1801_v4, %s5527_s11 }
 0x279   : > { %v1692_v11 = vrot.slane %v1687_v5, 4  ;;  %v1823_v23 = vunpack.c.l.b16 %v1687_v5 }
 0x27b   : > { %4138 = vmatmul.msk.bf16.vlgmr.msra.gmra.mxu3 %vm1693_vm0, %v1685_v60  ;;  %v1717_v14 = vsel %vm1693_vm0, %v1692_v11, 0  ;;  %v1827_v15 = vunpack.c.l.b16 %v1692_v11  ;;  %v1824_v27 = vpack.c.b16 %v1823_v23, %v1823_v23 }
 0x27c   : > { %1726 = vmatpush.bf16.xpose.msrb.mxu3 %v1717_v14 }
 0x27d   : > { %v1828_v18 = vpack.c.b16 %v1827_v15, %v1827_v15 }
 0x27f   : > { %1829 = vrot.lane.b32.xlu1 %v1828_v18, %s5527_s11  ;;  %1947 = vrot.lane.b32.xlu2 %v1828_v18, %s5526_s10 }
 0x280   : > { %1798 = vrot.lane.b32.xlu0 %v1797_v19, %s5527_s11 }
 0x287   : > { %1825 = vrot.lane.b32.xlu1 %v1824_v27, %s5527_s11  ;;  %2036 = vrot.lane.b32.xlu2 %v1801_v4, %s5528_s0  ;;  %v1511_v4 = vperm.slane %v6189_v53, 2 }
 0x288   : > { %1922 = vrot.lane.b32.xlu0 %v1797_v19, %s5526_s10 }
 0x28b   : > { %4139 = vmatmul.msk.bf16.vlgmr.msrb.gmra.mxu3 %vm1693_vm0, %v1687_v5  ;;  %v1680_v5 = vpop.f32.mrf.mxu2 }
 0x28c   : > { %v1681_v6 = vadd.f32 %v1680_v5, %v1511_v4 }
 0x28e   : > { %v1686_v7 = vpack.c.bf16 %v1681_v6, %v1681_v6 }
 0x28f   : > { %1945 = vrot.lane.b32.xlu1 %v1824_v27, %s5526_s10  ;;  %2057 = vrot.lane.b32.xlu2 %v1824_v27, %s5528_s0 }
 0x290   : > { %2059 = vrot.lane.b32.xlu0 %v1828_v18, %s5528_s0  ;;  %v1762_v8 = vsel %vm1760_vm2, %v1686_v7, 0  ;;  %v1875_v9 = vunpack.c.l.b16 %v1686_v7 }
 0x291   : > { %1771 = vmatpush.bf16.msra.mxu3 %v1762_v8 }
 0x292   : > { %v6246_v10 = vpack.c.b16 %v1875_v9, %v1875_v9 }
 0x293   : > { %v1682_v11 = vpop.f32.mrf.mxu2 }
 0x294   : > { %v1683_v12 = vadd.f32 %v1682_v11, %v1511_v4 }
 0x296   : > { %v1688_v13 = vpack.c.bf16 %v1683_v12, %v1683_v12 }
 0x297   : > { %2034 = vrot.lane.b32.xlu1 %v1797_v19, %s5528_s0 }
 0x298   : > { %v1781_v14 = vsel %vm1760_vm2, %v1688_v13, 0 }
 0x299   : > { %1790 = vmatpush.bf16.msrb.mxu0 %v1781_v14 }
 0x2d1   : > { %v1925_v38 = vpop.permute.xlu2 %1924 }
 0x2d2   : > { %v1930_v39 = vsel %vm1693_vm0, %v1925_v38, 0  ;;  %v1899_v38 = vunpack.c.l.b16 %v1688_v13 }
 0x2d3   : > { %1939 = vmatpush.bf16.xpose.msrb.mxu1 %v1930_v39 }
 0x2d9   : > { %v1948_v40 = vpop.permute.xlu2 %1947 }
 0x2da   : > { %v1953_v48 = vsel %vm1693_vm0, %v1948_v40, 0  ;;  %v6260_v40 = vpack.c.b16 %v1899_v38, %v1899_v38 }
 0x2e1   : > { %v2037_v41 = vpop.permute.xlu2 %2036 }
 0x2e2   : > { %v2042_v42 = vsel %vm1693_vm0, %v2037_v41, 0 }
 0x2e3   : > { %2051 = vmatpush.bf16.xpose.msra.mxu1 %v2042_v42 }
 0x2e9   : > { %v1803_v43 = vpop.permute.xlu0 %1802  ;;  %v2058_v3 = vpop.permute.xlu2 %2057 }
 0x2ea   : > { %v1808_v44 = vsel %vm1693_vm0, %v1803_v43, 0 }
 0x2eb   : > { %1817 = vmatpush.bf16.xpose.msrb.mxu2 %v1808_v44 }
 0x2f1   : > { %v1830_v45 = vpop.permute.xlu1 %1829 }
 0x2f2   : > { %v1835_v46 = vsel %vm1693_vm0, %v1830_v45, 0  ;;  %v1799_v47 = vpop.permute.xlu0 %1798 }
 0x2f3   : > { %4142 = vmatmul.msk.bf16.vlgmr.msrb.gmra.mxu2 %vm1693_vm0, %v1799_v47 }
 0x2f4   : > { %1844 = vmatpush.bf16.xpose.msra.mxu2 %v1835_v46 }
 0x2f9   : > { %v1826_v51 = vpop.permute.xlu1 %1825 }
 0x2fa   : > { %v1923_v52 = vpop.permute.xlu0 %1922 }
 0x2fb   : > { %4146 = vmatmul.msk.bf16.vlgmr.msrb.gmra.mxu1 %vm1693_vm0, %v1923_v52 }
 0x2fc   : > { %1962 = vmatpush.bf16.xpose.msrb.mxu2 %v1953_v48 }
 0x2fe   : > { %v1709_v55 = vpop.f32.mrf.mxu3 }
 0x2ff   : > { %v1710_v56 = vadd.f32 %v1709_v55, %v6233_v54 }
 0x301   : > { %v1946_v57 = vpop.permute.xlu1 %1945  ;;  %v1733_v58 = vsel %vm1732_vm1, %v1710_v56, -inf }
 0x302   : > { %v2060_v59 = vpop.permute.xlu0 %2059  ;;  %1734 = vmax.xlane.f32.xlu0 %v1733_v58 }
 0x303   : > { %v2065_v60 = vsel %vm1693_vm0, %v2060_v59, 0  ;;  %4143 = vmatmul.msk.bf16.vlgmr.msra.gmra.mxu2 %vm1693_vm0, %v1826_v51 }
 0x304   : > { %2074 = vmatpush.bf16.xpose.msra.mxu2 %v2065_v60 }
 0x306   : > { %v1711_v61 = vpop.f32.mrf.mxu3 }
 0x309   : > { %v2035_v62 = vpop.permute.xlu1 %2034 }
 0x30b   : > { %4150 = vmatmul.msk.bf16.vlgmr.msra.gmra.mxu1 %vm1693_vm0, %v2035_v62 }
 0x30e   : > { %v1728_v63 = vpop.f32.mrf.mxu3 }
 0x30f   : > { %v1729_v0 = vadd.f32 %v1728_v63, %v6233_v54 }
 0x311   : > { %v1736_v1 = vsel %vm1732_vm1, %v1729_v0, -inf }
 0x312   : > { %1737 = vmax.xlane.f32.xlu1 %v1736_v1 }
 0x313   : > { %4147 = vmatmul.msk.bf16.vlgmr.msrb.gmra.mxu2 %vm1693_vm0, %v1946_v57 }
 0x316   : > { %v1730_v2 = vpop.f32.mrf.mxu3 }
 0x323   : > { %4151 = vmatmul.msk.bf16.vlgmr.msra.gmra.mxu2 %vm1693_vm0, %v2058_v3 }
 0x32b   : > { %1992 = vrot.lane.b32.xlu1 %v6246_v10, %s5526_s10 }
 0x375   : > { %v1735_v53 = vpop.xlane.xlu0 %1734 }
 0x376   : > { %v1819_v15 = vpop.f32.mrf.mxu2  ;;  %v1739_v16 = vsub.f32 %v1710_v56, %v1735_v53 }
 0x377   : > { %v1820_v17 = vadd.f32 %v1819_v15, %v6233_v54 }
 0x378   : > { %v1741_v18 = vmul.f32 1.442695, %v1739_v16  ;;  %v1941_v19 = vpop.f32.mrf.mxu1 }
 0x379   : > { %v1942_v20 = vadd.f32 %v1941_v19, %v6233_v54  ;;  %v1850_v21 = vsel %vm1732_vm1, %v1820_v17, -inf }
 0x37a   : > { %4764 = vpow2.f32 %v1741_v18  ;;  %1851 = vmax.xlane.f32.xlu2 %v1850_v21 }
 0x37b   : > { %v1968_v22 = vsel %vm1732_vm1, %v1942_v20, -inf }
 0x37c   : > { %1969 = vmax.xlane.f32.xlu0 %v1968_v22 }
 0x37e   : > { %v1821_v23 = vpop.f32.mrf.mxu2 }
 0x380   : > { %v4765_v24 = vpop.eup %4764  ;;  %v1943_v25 = vpop.f32.mrf.mxu1 }
 0x381   : > { %v1745_v26 = vsel %vm1732_vm1, %v4765_v24, 0.0 }
 0x384   : > { %1746 = vadd.xlane.f32.xlu0 %v1745_v26 }
 0x385   : > { %v1738_v27 = vpop.xlane.xlu1 %1737 }
 0x386   : > { %v1846_v28 = vpop.f32.mrf.mxu2  ;;  %v1740_v30 = vsub.f32 %v1729_v0, %v1738_v27 }
 0x387   : > { %v1847_v29 = vadd.f32 %v1846_v28, %v6233_v54 }
 0x388   : > { %v2053_v31 = vpop.f32.mrf.mxu1  ;;  %v1743_v33 = vmul.f32 1.442695, %v1740_v30 }
 0x389   : > { %v1853_v32 = vsel %vm1732_vm1, %v1847_v29, -inf  ;;  %v2054_v34 = vadd.f32 %v2053_v31, %v6233_v54 }
 0x38a   : > { %1854 = vmax.xlane.f32.xlu2 %v1853_v32  ;;  %4766 = vpow2.f32 %v1743_v33 }
 0x38b   : > { %v2080_v37 = vsel %vm1732_vm1, %v2054_v34, -inf }
 0x38e   : > { %v1848_v35 = vpop.f32.mrf.mxu2 }
 0x390   : > { %v2055_v36 = vpop.f32.mrf.mxu1  ;;  %v4767_v39 = vpop.eup %4766 }
 0x391   : > { %v1748_v44 = vsel %vm1732_vm1, %v4767_v39, 0.0 }
 0x392   : > { %2081 = vmax.xlane.f32.xlu2 %v2080_v37 }
 0x396   : > { %v1964_v41 = vpop.f32.mrf.mxu2 }
 0x397   : > { %v1965_v42 = vadd.f32 %v1964_v41, %v6233_v54 }
 0x398   : > { %1901 = vrot.lane.b32.xlu0 %v6260_v40, %s5527_s11 }
 0x399   : > { %v1971_v43 = vsel %vm1732_vm1, %v1965_v42, -inf }
 0x39a   : > { %1972 = vmax.xlane.f32.xlu1 %v1971_v43  ;;  %1749 = vadd.xlane.f32.xlu2 %v1748_v44 }
 0x39d   : > { %v1993_v6 = vpop.permute.xlu1 %1992 }
 0x39e   : > { %v1966_v45 = vpop.f32.mrf.mxu2 }
 0x3a6   : > { %v2076_v46 = vpop.f32.mrf.mxu2 }
 0x3a7   : > { %v6268_v47 = vadd.f32 %v2076_v46, %v6233_v54 }
 0x3a9   : > { %v2083_v48 = vsel %vm1732_vm1, %v6268_v47, -inf }
 0x3aa   : > { %2084 = vmax.xlane.f32.xlu1 %v2083_v48 }
 0x3ae   : > { %v2078_v51 = vpop.f32.mrf.mxu2 }
 0x3b2   : > { %1877 = vrot.lane.b32.xlu2 %v6246_v10, %s5527_s11 }
 0x3ed   : > { %v1852_v52 = vpop.xlane.xlu2 %1851 }
 0x3ee   : > { %v1856_v55 = vsub.f32 %v1820_v17, %v1852_v52 }
 0x3ef   : > { %v1970_v56 = vpop.xlane.xlu0 %1969 }
 0x3f0   : > { %v1858_v57 = vmul.f32 1.442695, %v1856_v55  ;;  %v1974_v58 = vsub.f32 %v1942_v20, %v1970_v56 }
 0x3f2   : > { %4768 = vpow2.f32 %v1858_v57  ;;  %v1976_v59 = vmul.f32 1.442695, %v1974_v58 }
 0x3f4   : > { %4770 = vpow2.f32 %v1976_v59 }
 0x3f7   : > { %v1747_v60 = vpop.xlane.xlu0 %1746 }
 0x3f8   : > { %v4769_v61 = vpop.eup %4768  ;;  %4772 = vrcp.f32 %v1747_v60 }
 0x3f9   : > { %v1862_v54 = vsel %vm1732_vm1, %v4769_v61, 0.0 }
 0x3fa   : > { %v6275_v62 = vpop.eup %4770  ;;  %1863 = vadd.xlane.f32.xlu0 %v1862_v54 }
 0x3fb   : > { %v1980_v63 = vsel %vm1732_vm1, %v6275_v62, 0.0 }
 0x3fc   : > { %1981 = vadd.xlane.f32.xlu1 %v1980_v63 }
 0x3fd   : > { %v1855_v0 = vpop.xlane.xlu2 %1854 }
 0x3fe   : > { %v4773_v1 = vpop.eup %4772  ;;  %v1857_v2 = vsub.f32 %v1847_v29, %v1855_v0 }
 0x3ff   : > { %v1753_v3 = vmul.f32 %v4773_v1, %v4765_v24  ;;  %v1998_v24 = vsel %vm1760_vm2, %v1993_v6, 0 }
 0x400   : > { %v1860_v4 = vmul.f32 1.442695, %v1857_v2 }
 0x401   : > { %v1755_v5 = vpack.c.bf16 %v1753_v3, %v1753_v3 }
 0x402   : > { %4774 = vpow2.f32 %v1860_v4 }
 0x403   : > { %4140 = vmatmul.msk.bf16.vlgmr.msra.gmra.mxu3 %vm1732_vm1, %v1755_v5 }
 0x405   : > { %v2082_v7 = vpop.xlane.xlu2 %2081 }
 0x406   : > { %v2086_v8 = vsub.f32 %v2054_v34, %v2082_v7 }
 0x408   : > { %v4775_v9 = vpop.eup %4774  ;;  %v2088_v11 = vmul.f32 1.442695, %v2086_v8 }
 0x409   : > { %v1865_v12 = vsel %vm1732_vm1, %v4775_v9, 0.0 }
 0x40a   : > { %4776 = vpow2.f32 %v2088_v11  ;;  %1866 = vadd.xlane.f32.xlu1 %v1865_v12  ;;  %v1902_v13 = vpop.permute.xlu0 %1901 }
 0x40b   : > { %v1907_v14 = vsel %vm1760_vm2, %v1902_v13, 0 }
 0x40c   : > { %1916 = vmatpush.bf16.msra.mxu0 %v1907_v14 }
 0x40d   : > { %v1750_v53 = vpop.xlane.xlu2 %1749  ;;  %v1973_v15 = vpop.xlane.xlu1 %1972 }
 0x40e   : > { %4778 = vrcp.f32 %v1750_v53  ;;  %v1975_v16 = vsub.f32 %v1965_v42, %v1973_v15  ;;  %2013 = vrot.lane.b32.xlu0 %v6260_v40, %s5526_s10 }
 0x410   : > { %v4777_v17 = vpop.eup %4776  ;;  %v1978_v18 = vmul.f32 1.442695, %v1975_v16 }
 0x411   : > { %v2092_v19 = vsel %vm1732_vm1, %v4777_v17, 0.0 }
 0x412   : > { %4780 = vpow2.f32 %v1978_v18  ;;  %2093 = vadd.xlane.f32.xlu2 %v2092_v19 }
 0x414   : > { %v4779_v20 = vpop.eup %4778 }
 0x415   : > { %v1754_v21 = vmul.f32 %v4779_v20, %v4767_v39  ;;  %v1878_v22 = vpop.permute.xlu2 %1877  ;;  %v4530_v20 = vld [vmem:[%s6103_s1 + $0x38] sm:$0xff] }
 0x416   : > { %v1883_v23 = vsel %vm1760_vm2, %v1878_v22, 0  ;;  %2247 = vmatpush.bf16.msrb.mxu1 %v4530_v20  ;;  %v4528_v22 = vld [vmem:[%s6103_s1 + $0x28] sm:$0xff]  ;;  %v4246_v20 = vld [vmem:[%s6109_s2 + $0x38] sm:$0xf0] }
 0x417   : > { %1892 = vmatpush.bf16.msrb.mxu3 %v1883_v23  ;;  %v1756_v25 = vpack.c.bf16 %v1754_v21, %v1754_v21  ;;  %v4529_v21 = vld [vmem:[%s6103_s1 + $0x30] sm:$0xff]  ;;  %v4527_v23 = vld [vmem:[%s6103_s1 + $0x20] sm:$0xff] }
 0x418   : > { %v4781_v26 = vpop.eup %4780 }
 0x419   : > { %4141 = vmatmul.msk.bf16.vlgmr.msrb.gmra.mxu0 %vm1732_vm1, %v1756_v25  ;;  %v1983_v27 = vsel %vm1732_vm1, %v4781_v26, 0.0  ;;  %v4525_v25 = vld [vmem:[%s6103_s1 + $0x10] sm:$0xff] }
 0x41a   : > { %1984 = vadd.xlane.f32.xlu1 %v1983_v27  ;;  %2248 = vmatpush.bf16.msrb.mxu1 %v4529_v21  ;;  %v4523_v27 = vld [vmem:[%s6103_s1] sm:$0xff] }
 0x41b   : > { %2007 = vmatpush.bf16.msra.mxu3 %v1998_v24  ;;  %v4526_v24 = vld [vmem:[%s6103_s1 + $0x18] sm:$0xff] }
 0x41d   : > { %v2085_v28 = vpop.xlane.xlu1 %2084 }
 0x41e   : > { %v2087_v29 = vsub.f32 %v6268_v47, %v2085_v28  ;;  %2249 = vmatpush.bf16.msrb.mxu1 %v4528_v22 }
 0x420   : > { %v2090_v30 = vmul.f32 1.442695, %v2087_v29 }
 0x422   : > { %4782 = vpow2.f32 %v2090_v30  ;;  %2250 = vmatpush.bf16.msrb.mxu1 %v4527_v23  ;;  %v4236_v23 = vld [vmem:[%s6109_s2 + $0x20] sm:$0xf] }
 0x426   : > { %2251 = vmatpush.bf16.msrb.mxu1 %v4526_v24  ;;  %v4544_v24 = vld [vmem:[%s6109_s2 + $0x24] sm:$0xf0] }
 0x428   : > { %v4783_v31 = vpop.eup %4782 }
 0x429   : > { %v2095_v32 = vsel %vm1732_vm1, %v4783_v31, 0.0 }
 0x42a   : > { %2252 = vmatpush.bf16.msrb.mxu1 %v4525_v25 }
 0x433   : > { %2104 = vrot.lane.b32.xlu1 %v6246_v10, %s5528_s0 }
 0x438   : > { %2096 = vadd.xlane.f32.xlu0 %v2095_v32 }
 0x43b   : > { %2125 = vrot.lane.b32.xlu1 %v6260_v40, %s5528_s0 }
 0x46d   : > { %v1864_v33 = vpop.xlane.xlu0 %1863 }
 0x46e   : > { %4784 = vrcp.f32 %v1864_v33 }
 0x46f   : > { %v1982_v36 = vpop.xlane.xlu1 %1981 }
 0x470   : > { %4786 = vrcp.f32 %v1982_v36 }
 0x474   : > { %v4785_v34 = vpop.eup %4784 }
 0x475   : > { %v1870_v35 = vmul.f32 %v4785_v34, %v4769_v61 }
 0x476   : > { %v4787_v39 = vpop.eup %4786 }
 0x477   : > { %v1872_v37 = vpack.c.bf16 %v1870_v35, %v1870_v35  ;;  %v1988_v42 = vmul.f32 %v4787_v39, %v6275_v62 }
 0x479   : > { %4144 = vmatmul.msk.bf16.vlgmr.msrb.gmra.mxu3 %vm1732_vm1, %v1872_v37  ;;  %v1990_v45 = vpack.c.bf16 %v1988_v42, %v1988_v42 }
 0x47d   : > { %v1867_v38 = vpop.xlane.xlu1 %1866 }
 0x47e   : > { %4788 = vrcp.f32 %v1867_v38 }
 0x480   : > { %v2014_v10 = vpop.permute.xlu0 %2013 }
 0x481   : > { %v2019_v41 = vsel %vm1760_vm2, %v2014_v10, 0 }
 0x482   : > { %2028 = vmatpush.bf16.msrb.mxu0 %v2019_v41 }
 0x484   : > { %v4789_v43 = vpop.eup %4788 }
 0x485   : > { %v1871_v40 = vmul.f32 %v4789_v43, %v4775_v9  ;;  %v2094_v57 = vpop.xlane.xlu2 %2093 }
 0x486   : > { %v6298_v44 = vpop.f32.mrf.mxu3 }
 0x487   : > { %v1873_v46 = vpack.c.bf16 %v1871_v40, %v1871_v40  ;;  %v4754_v40 = vld [vmem:[%s6762_s24] ss:$0 sm:$0xff] }
 0x489   : > { %4145 = vmatmul.msk.bf16.vlgmr.msra.gmra.mxu0 %vm1732_vm1, %v1873_v46  ;;  %4148 = vmatmul.msk.bf16.vlgmr.msra.gmra.mxu3 %vm1732_vm1, %v1990_v45 }
 0x48d   : > { %v1985_v47 = vpop.xlane.xlu1 %1984 }
 0x48e   : > { %4790 = vrcp.f32 %v1985_v47  ;;  %v1775_v48 = vpop.f32.mrf.mxu3 }
 0x48f   : > { %4792 = vrcp.f32 %v2094_v57  ;;  %v4276_v57 = vld [vmem:[%s6109_s2 + $0x70] sm:$0xf] }
 0x494   : > { %v4791_v51 = vpop.eup %4790 }
 0x495   : > { %v1989_v52 = vmul.f32 %v4791_v51, %v4781_v26  ;;  %v4793_v59 = vpop.eup %4792  ;;  %v4524_v26 = vld [vmem:[%s6103_s1 + $0x8] sm:$0xff]  ;;  %s6765_s1 = scalar_lea.vmem [#allocation12], %s6088_s8 }
 0x496   : > { %v1792_v55 = vpop.f32.mrf.mxu0  ;;  %v2100_v60 = vmul.f32 %v4793_v59, %v4777_v17  ;;  %2253 = vmatpush.bf16.msrb.mxu1 %v4524_v26 }
 0x497   : > { %v1991_v56 = vpack.c.bf16 %v1989_v52, %v1989_v52  ;;  %v5529_v52 = vmov 128.0  }
 0x498   : > { %v2102_v62 = vpack.c.bf16 %v2100_v60, %v2100_v60  ;;  %v4552_v60 = vld [vmem:[%s6109_s2 + $0x64] sm:$0xf0] }
 0x499   : > { %4149 = vmatmul.msk.bf16.vlgmr.msrb.gmra.mxu0 %vm1732_vm1, %v1991_v56 }
 0x49a   : > { %2254 = vmatpush.bf16.msrb.mxu1 %v4523_v27  ;;  %v4543_v27 = vld [vmem:[%s6109_s2 + $0x24] sm:$0xf] }
 0x49e   : > { %v1794_v58 = vpop.f32.mrf.mxu0 }
 0x49f   : > { %v4554_v58 = vld [vmem:[%s6109_s2 + $0x74] sm:$0xf0] }
 0x4a0   : > { %v4277_v59 = vor.u32 %v4554_v58, %v4276_v57  ;;  %v4538_v57 = vld [vmem:[%s6106_s6 + $0x38] sm:$0xff]  ;;  %v4536_v58 = vld [vmem:[%s6106_s6 + $0x28] sm:$0xff] }
 0x4a1   : > { %2391 = vmatpush.bf16.msrb.mxu2 %v4538_v57 }
 0x4a5   : > { %v2105_v61 = vpop.permute.xlu1 %2104 }
 0x4a6   : > { %v2110_v54 = vsel %vm1760_vm2, %v2105_v61, 0  ;;  %v4553_v61 = vld [vmem:[%s6109_s2 + $0x74] sm:$0xf] }
 0x4a7   : > { %2119 = vmatpush.bf16.msrb.mxu3 %v2110_v54  ;;  %v4278_v54 = vld [vmem:[%s6109_s2 + $0x78] sm:$0xf0] }
 0x4aa   : > { %4152 = vmatmul.msk.bf16.vlgmr.msrb.gmra.mxu3 %vm1732_vm1, %v2102_v62  ;;  %v4551_v62 = vld [vmem:[%s6109_s2 + $0x64] sm:$0xf] }
 0x4ab   : > { %v2097_v63 = vpop.xlane.xlu0 %2096  ;;  %2510 = vmatpush.bf16.msra.mxu3 %v4277_v59  ;;  %v4534_v59 = vld [vmem:[%s6106_s6 + $0x18] sm:$0xff] }
 0x4ac   : > { %4794 = vrcp.f32 %v2097_v63 }
 0x4ad   : > { %v2126_v0 = vpop.permute.xlu1 %2125  ;;  %4796 = vrcp.f32 %v5529_v52 }
 0x4ae   : > { %v2131_v1 = vsel %vm1760_vm2, %v2126_v0, 0 }
 0x4af   : > { %2140 = vmatpush.bf16.msra.mxu0 %v2131_v1  ;;  %v4270_v1 = vld [vmem:[%s6109_s2 + $0x68] sm:$0xf0] }
 0x4b2   : > { %v4795_v2 = vpop.eup %4794 }
 0x4b3   : > { %v2101_v3 = vmul.f32 %v4795_v2, %v4783_v31  ;;  %v4260_v2 = vld [vmem:[%s6109_s2 + $0x50] sm:$0xf] }
 0x4b5   : > { %v2103_v4 = vpack.c.bf16 %v2101_v3, %v2101_v3  ;;  %v4550_v3 = vld [vmem:[%s6109_s2 + $0x54] sm:$0xf0] }
 0x4b7   : > { %4153 = vmatmul.msk.bf16.vlgmr.msra.gmra.mxu0 %vm1732_vm1, %v2103_v4  ;;  %v4273_v4 = vor.u32 %v4551_v62, %v4270_v1 }
 0x4fc   : > { %v1894_v5 = vpop.f32.mrf.mxu3 }
 0x504   : > { %v1896_v6 = vpop.f32.mrf.mxu3 }
 0x505   : > { %v4262_v6 = vld [vmem:[%s6109_s2 + $0x58] sm:$0xf0] }
 0x506   : > { %v1918_v7 = vpop.f32.mrf.mxu0 }
 0x507   : > { %v4724_v8 = vpack.i.bf16 %v1918_v7, %v1894_v5  ;;  %v4549_v5 = vld [vmem:[%s6109_s2 + $0x54] sm:$0xf] }
 0x509   : > { %4725 = vrot.lane.b32.xlu1 %v4724_v8, %s5528_s0  ;;  %v4261_v8 = vor.u32 %v4550_v3, %v4260_v2 }
 0x50c   : > { %v2009_v9 = vpop.f32.mrf.mxu3 }
 0x50e   : > { %v1920_v11 = vpop.f32.mrf.mxu0 }
 0x50f   : > { %v4548_v11 = vld [vmem:[%s6109_s2 + $0x44] sm:$0xf0] }
 0x514   : > { %v2011_v12 = vpop.f32.mrf.mxu3 }
 0x515   : > { %v4265_v12 = vor.u32 %v4549_v5, %v4262_v6 }
 0x516   : > { %v2030_v13 = vpop.f32.mrf.mxu0 }
 0x517   : > { %v4729_v14 = vpack.i.bf16 %v2030_v13, %v2009_v9  ;;  %v4252_v9 = vld [vmem:[%s6109_s2 + $0x40] sm:$0xf]  ;;  %v4547_v13 = vld [vmem:[%s6109_s2 + $0x44] sm:$0xf] }
 0x519   : > { %4730 = vrot.lane.b32.xlu2 %v4729_v14, %s5526_s10  ;;  %v4254_v14 = vld [vmem:[%s6109_s2 + $0x48] sm:$0xf0] }
 0x51e   : > { %v2032_v53 = vpop.f32.mrf.mxu0 }
 0x52d   : > { %v2121_v15 = vpop.f32.mrf.mxu3 }
 0x534   : > { %v2142_v16 = vpop.f32.mrf.mxu0 }
 0x535   : > { %v4734_v17 = vpack.i.bf16 %v2142_v16, %v2121_v15  ;;  %v2123_v18 = vpop.f32.mrf.mxu3  ;;  %v4253_v15 = vor.u32 %v4548_v11, %v4252_v9  ;;  %v4244_v16 = vld [vmem:[%s6109_s2 + $0x30] sm:$0xf] }
 0x536   : > { %v4257_v18 = vor.u32 %v4547_v13, %v4254_v14 }
 0x537   : > { %4735 = vrot.lane.b32.xlu1 %v4734_v17, %s5527_s11  ;;  %v4546_v17 = vld [vmem:[%s6109_s2 + $0x34] sm:$0xf0] }
 0x538   : > { %v4245_v22 = vor.u32 %v4546_v17, %v4244_v16 }
 0x53c   : > { %v2144_v19 = vpop.f32.mrf.mxu0 }
 0x53d   : > { %v4545_v19 = vld [vmem:[%s6109_s2 + $0x34] sm:$0xf] }
 0x53e   : > { %v4249_v25 = vor.u32 %v4545_v19, %v4246_v20 }
 0x573   : > { %v4731_v31 = vpop.permute.xlu2 %4730 }
 0x574   : > { %v4733_v34 = vunpack.i.h.bf16 %v4731_v31  ;;  %v4732_v35 = vunpack.i.l.bf16 %v4731_v31 }
 0x57b   : > { %v4726_v28 = vpop.permute.xlu1 %4725 }
 0x57c   : > { %v4728_v29 = vunpack.i.h.bf16 %v4726_v28  ;;  %v4727_v30 = vunpack.i.l.bf16 %v4726_v28  ;;  %v4238_v28 = vld [vmem:[%s6109_s2 + $0x28] sm:$0xf0] }
 0x57e   : > { %v2171_v32 = vsel %vm1693_vm0, %v1792_v55, %v4728_v29  ;;  %v2170_v33 = vsel %vm1693_vm0, %v6298_v44, %v4727_v30  ;;  %v4797_v55 = vpop.eup %4796  ;;  %v4237_v30 = vor.u32 %v4544_v24, %v4236_v23 }
 0x57f   : > { %v2173_v39 = vsel %vm2172_vm3, %v2170_v33, %v4732_v35  ;;  %v2174_v10 = vsel %vm2172_vm3, %v2171_v32, %v4733_v34  ;;  %v2268_v56 = vmul.f32 128.0, %v4797_v55  ;;  %vm2272_vm5 = vweird.f32 %v4797_v55  ;;  %v4228_v32 = vld [vmem:[%s6109_s2 + $0x10] sm:$0xf]  ;;  %v4542_v33 = vld [vmem:[%s6109_s2 + $0x14] sm:$0xf0] }
 0x580   : > { %v4241_v34 = vor.u32 %v4543_v27, %v4238_v28  ;;  %v4541_v35 = vld [vmem:[%s6109_s2 + $0x14] sm:$0xf] }
 0x581   : > { %v2269_v63 = vsub.f32 1.0, %v2268_v56 }
 0x583   : > { %v2270_v7 = vmul.f32 %v4797_v55, %v2269_v63 }
 0x585   : > { %v2271_v53 = vadd.f32 %v4797_v55, %v2270_v7 }
 0x587   : > { %v6352_v21 = vsel %vm2272_vm5, %v4797_v55, %v2271_v53 }
 0x5a9   : > { %v4736_v36 = vpop.permute.xlu1 %4735 }
 0x5aa   : > { %v4738_v37 = vunpack.i.h.bf16 %v4736_v36  ;;  %v4737_v38 = vunpack.i.l.bf16 %v4736_v36  ;;  %v4230_v36 = vld [vmem:[%s6109_s2 + $0x18] sm:$0xf0] }
 0x5ac   : > { %v2177_v41 = vsel %vm2175_vm4, %v2174_v10, %v4738_v37  ;;  %v2176_v42 = vsel %vm2175_vm4, %v2173_v39, %v4737_v38  ;;  %v4229_v38 = vor.u32 %v4542_v33, %v4228_v32  ;;  %v4220_v39 = vld [vmem:[%s6109_s2] sm:$0xf]  ;;  %v4540_v10 = vld [vmem:[%s6109_s2 + $0x4] sm:$0xf0]  ;;  %v4756_v32 = vld [vmem:[%s6764_s23] ss:$0 sm:$0xff] }
 0x5ad   : > { %v2178_v43 = vpack.c.bf16 %v2177_v41, %v2176_v42  ;;  %v4233_v41 = vor.u32 %v4541_v35, %v4230_v36 }
 0x5af   : > { %2255 = vmatmul.bf16.vlgmr.msrb.gmra.mxu1 %v2178_v43  ;;  %v4539_v43 = vld [vmem:[%s6109_s2 + $0x4] sm:$0xf] }
 0x62c   : > { %v2256_v44 = vpop.f32.mrf.mxu1 }
 0x62d   : > { %v2257_v45 = vadd.f32 %v4754_v40, %v2256_v44 }
 0x62f   : > { %v2261_v46 = vadd.f32 %v2257_v45, %v6178_v49  ;;  %v4268_v49 = vld [vmem:[%s6109_s2 + $0x60] sm:$0xf]  ;;  %v4221_v45 = vor.u32 %v4540_v10, %v4220_v39 }
 0x630   : > { %v4269_v0 = vor.u32 %v4552_v60, %v4268_v49  ;;  %v4535_v49 = vld [vmem:[%s6106_s6 + $0x20] sm:$0xff]  ;;  %v4533_v60 = vld [vmem:[%s6106_s6 + $0x10] sm:$0xff] }
 0x631   : > { %2263 = vadd.xlane.f32.xlu0 %v2261_v46 }
 0x632   : > { %2511 = vmatpush.bf16.msra.mxu3 %v4269_v0 }
 0x634   : > { %v2258_v47 = vpop.f32.mrf.mxu1 }
 0x635   : > { %v2259_v48 = vadd.f32 %v4754_v40, %v2258_v47  ;;  %v4222_v40 = vld [vmem:[%s6109_s2 + $0x8] sm:$0xf0]  ;;  %s6769_s2 = scalar_lea.vmem [#allocation19], %s6088_s8 }
 0x636   : > { %2512 = vmatpush.bf16.msra.mxu3 %v4261_v8  ;;  %v1473_v47 = vld [vmem:[#allocation3 + $0x8] sm:$0xff]  ;;  %v4225_v52 = vor.u32 %v4539_v43, %v4222_v40 }
 0x637   : > { %v6329_v51 = vadd.f32 %v2259_v48, %v6180_v50  ;;  %v4281_v50 = vor.u32 %v4553_v61, %v4278_v54  ;;  %v4532_v61 = vld [vmem:[%s6106_s6 + $0x8] sm:$0xff] }
 0x639   : > { %2265 = vadd.xlane.f32.xlu1 %v6329_v51  ;;  %2524 = vmatpush.bf16.msrb.mxu0 %v4281_v50  ;;  %v4531_v50 = vld [vmem:[%s6106_s6] sm:$0xff] }
 0x63a   : > { %2513 = vmatpush.bf16.msra.mxu3 %v4253_v15 }
 0x63d   : > { %2525 = vmatpush.bf16.msrb.mxu0 %v4273_v4 }
 0x63e   : > { %2514 = vmatpush.bf16.msra.mxu3 %v4245_v22  ;;  %v4755_v22 = vld [vmem:[%s6763_s9] ss:$0 sm:$0xff] }
 0x641   : > { %2526 = vmatpush.bf16.msrb.mxu0 %v4265_v12  ;;  %v2424_v12 = vld [vmem:[%s6111_s30] sm:$0x3]  ;;  %s6770_s30 = scalar_lea.vmem [#allocation24], %s6088_s8 }
 0x642   : > { %2515 = vmatpush.bf16.msra.mxu3 %v4237_v30  ;;  %v2427_v15 = vperm.slane %v2424_v12, 1  ;;  %v2426_v17 = vperm.slane %v2424_v12, 0 }
 0x645   : > { %2527 = vmatpush.bf16.msrb.mxu0 %v4257_v18 }
 0x646   : > { %2516 = vmatpush.bf16.msra.mxu3 %v4229_v38 }
 0x649   : > { %2528 = vmatpush.bf16.msrb.mxu0 %v4249_v25 }
 0x64a   : > { %2517 = vmatpush.bf16.msra.mxu3 %v4221_v45 }
 0x64d   : > { %2529 = vmatpush.bf16.msrb.mxu0 %v4241_v34 }
 0x651   : > { %2530 = vmatpush.bf16.msrb.mxu0 %v4233_v41 }
 0x655   : > { %2531 = vmatpush.bf16.msrb.mxu0 %v4225_v52  ;;  %v4757_v52 = vld [vmem:[%s6765_s1] ss:$0 sm:$0xff] }
 0x6a4   : > { %v2264_v26 = vpop.xlane.xlu0 %2263 }
 0x6a5   : > { %v2274_v29 = vmul.f32 %v6352_v21, %v2264_v26 }
 0x6a7   : > { %v6359_v31 = vsub.f32 %v2261_v46, %v2274_v29  ;;  %v1472_v46 = vld [vmem:[#allocation3] sm:$0xff] }
 0x6a8   : > { %v2407_v56 = vpack.c.bf16 %v1473_v47, %v1472_v46 }
 0x6a9   : > { %v2278_v37 = vmul.f32 %v6359_v31, %v6359_v31 }
 0x6aa   : > { %2518 = vmatmul.bf16.vlgmr.msra.gmra.mxu3 %v2407_v56  ;;  %2532 = vmatmul.bf16.vlgmr.msrb.gmra.mxu0 %v2407_v56 }
 0x6ab   : > { %2280 = vadd.xlane.f32.xlu0 %v2278_v37 }
 0x6ac   : > { %v2266_v42 = vpop.xlane.xlu1 %2265 }
 0x6ad   : > { %v2275_v44 = vmul.f32 %v6352_v21, %v2266_v42 }
 0x6af   : > { %v6373_v48 = vsub.f32 %v6329_v51, %v2275_v44  ;;  %v4537_v51 = vld [vmem:[%s6106_s6 + $0x30] sm:$0xff]  ;;  %s6767_s6 = scalar_lea.vmem [#allocation22], %s6088_s8 }
 0x6b0   : > { %2392 = vmatpush.bf16.msrb.mxu2 %v4537_v51 }
 0x6b1   : > { %v2279_v55 = vmul.f32 %v6373_v48, %v6373_v48 }
 0x6b3   : > { %2282 = vadd.xlane.f32.xlu0 %v2279_v55 }
 0x6b4   : > { %2393 = vmatpush.bf16.msrb.mxu2 %v4536_v58 }
 0x6b8   : > { %2394 = vmatpush.bf16.msrb.mxu2 %v4535_v49 }
 0x6bc   : > { %2395 = vmatpush.bf16.msrb.mxu2 %v4534_v59 }
 0x6c0   : > { %2396 = vmatpush.bf16.msrb.mxu2 %v4533_v60 }
 0x6c4   : > { %2397 = vmatpush.bf16.msrb.mxu2 %v4532_v61 }
 0x6c8   : > { %2398 = vmatpush.bf16.msrb.mxu2 %v4531_v50 }
 0x71e   : > { %v2281_v54 = vpop.xlane.xlu0 %2280 }
 0x71f   : > { %v2284_v62 = vmul.f32 %v2281_v54, %v6352_v21 }
 0x721   : > { %v2286_v63 = vadd.f32 1e-05, %v2284_v62 }
 0x723   : > { %4798 = vrsqrt.f32 %v2286_v63  ;;  %vm2294_vm7 = vweird.f32 %v2286_v63 }
 0x726   : > { %v2283_v0 = vpop.xlane.xlu0 %2282 }
 0x727   : > { %v2285_v1 = vmul.f32 %v2283_v0, %v6352_v21  ;;  %v2533_v13 = vpop.f32.mrf.mxu0 }
 0x728   : > { %v2534_v18 = vadd.f32 %v2533_v13, %v2427_v15 }
 0x729   : > { %v4799_v2 = vpop.eup %4798  ;;  %v2287_v3 = vadd.f32 1e-05, %v2285_v1 }
 0x72a   : > { %v2289_v4 = vmul.f32 %v4799_v2, %v2286_v63  ;;  %vm2295_vm6 = vweird.f32 %v4799_v2 }
 0x72b   : > { %4800 = vrsqrt.f32 %v2287_v3  ;;  %vm2296_vm8 = vmor %vm2294_vm7, %vm2295_vm6  ;;  %vm2304_vm10 = vweird.f32 %v2287_v3 }
 0x72c   : > { %v2290_v5 = vmul.f32 %v4799_v2, %v2289_v4 }
 0x72d   : > { %v2519_v23 = vpop.f32.mrf.mxu3 }
 0x72e   : > { %v2291_v6 = vmul.f32 0.5, %v2290_v5  ;;  %v2520_v24 = vadd.f32 %v2519_v23, %v2426_v17 }
 0x72f   : > { %v2535_v29 = vpop.f32.mrf.mxu0 }
 0x730   : > { %v2292_v7 = vsub.f32 1.5, %v2291_v6  ;;  %v6391_v26 = vpack.c.bf16 %v2534_v18, %v2520_v24  ;;  %v2536_v36 = vadd.f32 %v2535_v29, %v2427_v15 }
 0x731   : > { %v4801_v8 = vpop.eup %4800 }
 0x732   : > { %v2293_v9 = vmul.f32 %v4799_v2, %v2292_v7  ;;  %v2299_v11 = vmul.f32 %v4801_v8, %v2287_v3  ;;  %vm2305_vm9 = vweird.f32 %v4801_v8  ;;  %v2542_v33 = vrot.slane %v6391_v26, 4 }
 0x733   : > { %vm2306_vm11 = vmor %vm2304_vm10, %vm2305_vm9  ;;  %v2649_v34 = vunpack.c.l.b16 %v6391_v26 }
 0x734   : > { %v2300_v14 = vmul.f32 %v4801_v8, %v2299_v11  ;;  %v2297_v53 = vsel %vm2296_vm8, %v4799_v2, %v2293_v9  ;;  %v2610_v37 = vsel %vm1760_vm2, %v2542_v33, 0 }
 0x735   : > { %v2308_v19 = vmul.f32 %v2297_v53, %v6359_v31  ;;  %v2548_v31 = vsel %vm1693_vm0, %v6391_v26, 0  ;;  %v2650_v38 = vpack.c.b16 %v2649_v34, %v2649_v34  ;;  %v2521_v39 = vpop.f32.mrf.mxu3  ;;  %2619 = vmatpush.bf16.msrb.mxu3 %v2610_v37 }
 0x736   : > { %v2301_v16 = vmul.f32 0.5, %v2300_v14  ;;  %2557 = vmatpush.bf16.xpose.msra.mxu1 %v2548_v31  ;;  %v2522_v42 = vadd.f32 %v2521_v39, %v2426_v17 }
 0x737   : > { %v2314_v28 = vmul.f32 %v4755_v22, %v2308_v19  ;;  %2651 = vrot.lane.b32.xlu2 %v2650_v38, %s5527_s11 }
 0x738   : > { %v2302_v20 = vsub.f32 1.5, %v2301_v16  ;;  %v6410_v40 = vpack.c.bf16 %v2536_v36, %v2522_v42 }
 0x739   : > { %v6403_v10 = vadd.f32 %v4756_v32, %v2314_v28 }
 0x73a   : > { %v2303_v25 = vmul.f32 %v4801_v8, %v2302_v20  ;;  %v2677_v44 = vunpack.c.l.b16 %v6410_v40  ;;  %v2567_v45 = vsel %vm1693_vm0, %v6410_v40, 0  ;;  %v2543_v46 = vrot.slane %v6410_v40, 4 }
 0x73b   : > { %2576 = vmatpush.bf16.xpose.msra.mxu2 %v2567_v45 }
 0x73c   : > { %v2307_v27 = vsel %vm2306_vm11, %v4801_v8, %v2303_v25  ;;  %v2678_v47 = vpack.c.b16 %v2677_v44, %v2677_v44 }
 0x73d   : > { %v2309_v30 = vmul.f32 %v2307_v27, %v6373_v48  ;;  %v2629_v48 = vsel %vm1760_vm2, %v2543_v46, 0 }
 0x73e   : > { %2638 = vmatpush.bf16.msra.mxu0 %v2629_v48  ;;  %2679 = vrot.lane.b32.xlu0 %v2678_v47, %s5527_s11 }
 0x73f   : > { %v2315_v35 = vmul.f32 %v4755_v22, %v2309_v30 }
 0x741   : > { %v6405_v41 = vadd.f32 %v4756_v32, %v2315_v35  ;;  %v2724_v35 = vunpack.c.l.b16 %v2542_v33 }
 0x743   : > { %v2322_v43 = vpack.c.bf16 %v6405_v41, %v6403_v10  ;;  %v6454_v42 = vpack.c.b16 %v2724_v35, %v2724_v35 }
 0x745   : > { %2399 = vmatmul.bf16.vlgmr.msrb.gmra.mxu2 %v2322_v43 }
 0x746   : > { %2795 = vrot.lane.b32.xlu0 %v2678_v47, %s5526_s10 }
 0x74e   : > { %2884 = vrot.lane.b32.xlu0 %v2650_v38, %s5528_s0 }
 0x791   : > { %v2652_v50 = vpop.permute.xlu2 %2651 }
 0x792   : > { %v2657_v63 = vsel %vm1693_vm0, %v2652_v50, 0 }
 0x793   : > { %2666 = vmatpush.bf16.xpose.msrb.mxu1 %v2657_v63 }
 0x7b0   : > { %v2680_v62 = vpop.permute.xlu0 %2679 }
 0x7b1   : > { %v2685_v0 = vsel %vm1693_vm0, %v2680_v62, 0 }
 0x7b2   : > { %2694 = vmatpush.bf16.xpose.msrb.mxu2 %v2685_v0 }
 0x7b8   : > { %v2796_v1 = vpop.permute.xlu0 %2795 }
 0x7b9   : > { %v2801_v2 = vsel %vm1693_vm0, %v2796_v1, 0 }
 0x7c0   : > { %v2885_v5 = vpop.permute.xlu0 %2884 }
 0x7c1   : > { %v2890_v8 = vsel %vm1693_vm0, %v2885_v5, 0 }
 0x7c8   : > { %v2400_v55 = vpop.f32.mrf.mxu2 }
 0x7c9   : > { %v2401_v56 = vadd.f32 %v4757_v52, %v2400_v55 }
 0x7cb   : > { %v2405_v57 = vpack.c.bf16 %v2401_v56, %v2401_v56 }
 0x7cd   : > { %v2645_v51 = vunpack.c.l.b16 %v2405_v57  ;;  %4282 = vmatmul.msk.bf16.vlgmr.msra.gmra.mxu1 %vm1693_vm0, %v2405_v57  ;;  %v2747_v57 = vunpack.c.l.b16 %v2543_v46 }
 0x7cf   : > { %v2646_v58 = vpack.c.b16 %v2645_v51, %v2645_v51  ;;  %v6464_v51 = vpack.c.b16 %v2747_v57, %v2747_v57 }
 0x7d0   : > { %v2402_v49 = vpop.f32.mrf.mxu2 }
 0x7d1   : > { %v2403_v59 = vadd.f32 %v4757_v52, %v2402_v49  ;;  %2770 = vrot.lane.b32.xlu1 %v2646_v58, %s5526_s10  ;;  %2882 = vrot.lane.b32.xlu0 %v2646_v58, %s5528_s0 }
 0x7d2   : > { %2647 = vrot.lane.b32.xlu2 %v2646_v58, %s5527_s11 }
 0x7d3   : > { %v2406_v60 = vpack.c.bf16 %v2403_v59, %v2403_v59 }
 0x7d5   : > { %v2673_v61 = vunpack.c.l.b16 %v2406_v60  ;;  %4283 = vmatmul.msk.bf16.vlgmr.msra.gmra.mxu2 %vm1693_vm0, %v2406_v60 }
 0x7d6   : > { %2810 = vmatpush.bf16.xpose.msra.mxu2 %v2801_v2 }
 0x7d7   : > { %v2674_v54 = vpack.c.b16 %v2673_v61, %v2673_v61 }
 0x7da   : > { %2675 = vrot.lane.b32.xlu2 %v2674_v54, %s5527_s11 }
 0x7e2   : > { %2772 = vrot.lane.b32.xlu2 %v2650_v38, %s5526_s10 }
 0x7ea   : > { %2793 = vrot.lane.b32.xlu2 %v2674_v54, %s5526_s10 }
 0x7f2   : > { %2907 = vrot.lane.b32.xlu2 %v2678_v47, %s5528_s0 }
 0x7fa   : > { %2905 = vrot.lane.b32.xlu2 %v2674_v54, %s5528_s0 }
 0x82c   : > { %v2648_v3 = vpop.permute.xlu2 %2647 }
 0x82d   : > { %4286 = vmatmul.msk.bf16.vlgmr.msrb.gmra.mxu1 %vm1693_vm0, %v2648_v3 }
 0x834   : > { %v2676_v4 = vpop.permute.xlu2 %2675 }
 0x835   : > { %4287 = vmatmul.msk.bf16.vlgmr.msrb.gmra.mxu2 %vm1693_vm0, %v2676_v4 }
 0x83c   : > { %v2773_v6 = vpop.permute.xlu2 %2772 }
 0x83d   : > { %v2778_v7 = vsel %vm1693_vm0, %v2773_v6, 0 }
 0x83e   : > { %2787 = vmatpush.bf16.xpose.msra.mxu1 %v2778_v7 }
 0x843   : > { %v2771_v9 = vpop.permute.xlu1 %2770  ;;  %v2883_v16 = vpop.permute.xlu0 %2882 }
 0x844   : > { %v2794_v11 = vpop.permute.xlu2 %2793 }
 0x845   : > { %4290 = vmatmul.msk.bf16.vlgmr.msra.gmra.mxu1 %vm1693_vm0, %v2771_v9  ;;  %4291 = vmatmul.msk.bf16.vlgmr.msra.gmra.mxu2 %vm1693_vm0, %v2794_v11 }
 0x846   : > { %2899 = vmatpush.bf16.xpose.msrb.mxu1 %v2890_v8 }
 0x84a   : > { %v2559_v12 = vpop.f32.mrf.mxu1 }
 0x84b   : > { %v2582_v13 = vsel %vm1732_vm1, %v2559_v12, -inf }
 0x84c   : > { %v2908_v14 = vpop.permute.xlu2 %2907  ;;  %2583 = vmax.xlane.f32.xlu0 %v2582_v13 }
 0x84d   : > { %v2913_v53 = vsel %vm1693_vm0, %v2908_v14, 0 }
 0x84e   : > { %2922 = vmatpush.bf16.xpose.msrb.mxu2 %v2913_v53 }
 0x852   : > { %v2561_v15 = vpop.f32.mrf.mxu1 }
 0x854   : > { %v2906_v17 = vpop.permute.xlu2 %2905 }
 0x855   : > { %4294 = vmatmul.msk.bf16.vlgmr.msrb.gmra.mxu1 %vm1693_vm0, %v2883_v16  ;;  %4295 = vmatmul.msk.bf16.vlgmr.msrb.gmra.mxu2 %vm1693_vm0, %v2906_v17 }
 0x858   : > { %v2578_v18 = vpop.f32.mrf.mxu2 }
 0x859   : > { %v2585_v19 = vsel %vm1732_vm1, %v2578_v18, -inf }
 0x85a   : > { %2586 = vmax.xlane.f32.xlu1 %v2585_v19 }
 0x860   : > { %v2580_v20 = vpop.f32.mrf.mxu2 }
 0x8aa   : > { %v2668_v22 = vpop.f32.mrf.mxu1 }
 0x8ab   : > { %v2700_v23 = vsel %vm1732_vm1, %v2668_v22, -inf }
 0x8ac   : > { %2701 = vmax.xlane.f32.xlu2 %v2700_v23 }
 0x8b2   : > { %v2670_v24 = vpop.f32.mrf.mxu1 }
 0x8b8   : > { %v2696_v25 = vpop.f32.mrf.mxu2 }
 0x8b9   : > { %v2703_v27 = vsel %vm1732_vm1, %v2696_v25, -inf }
 0x8ba   : > { %2704 = vmax.xlane.f32.xlu0 %v2703_v27 }
 0x8bf   : > { %v2584_v28 = vpop.xlane.xlu0 %2583 }
 0x8c0   : > { %v2698_v29 = vpop.f32.mrf.mxu2  ;;  %v2588_v30 = vsub.f32 %v2559_v12, %v2584_v28 }
 0x8c2   : > { %v2590_v32 = vmul.f32 1.442695, %v2588_v30  ;;  %v2789_v31 = vpop.f32.mrf.mxu1 }
 0x8c3   : > { %v2816_v45 = vsel %vm1732_vm1, %v2789_v31, -inf }
 0x8c4   : > { %4802 = vpow2.f32 %v2590_v32 }
 0x8c8   : > { %v2812_v34 = vpop.f32.mrf.mxu2 }
 0x8c9   : > { %v2819_v36 = vsel %vm1732_vm1, %v2812_v34, -inf }
 0x8ca   : > { %v4803_v37 = vpop.eup %4802  ;;  %2820 = vmax.xlane.f32.xlu2 %v2819_v36  ;;  %v2791_v38 = vpop.f32.mrf.mxu1 }
 0x8cb   : > { %v2594_v39 = vsel %vm1732_vm1, %v4803_v37, 0.0 }
 0x8cc   : > { %2595 = vadd.xlane.f32.xlu1 %v2594_v39 }
 0x8cd   : > { %v2587_v52 = vpop.xlane.xlu1 %2586 }
 0x8ce   : > { %2726 = vrot.lane.b32.xlu0 %v6454_v42, %s5527_s11  ;;  %v2589_v55 = vsub.f32 %v2578_v18, %v2587_v52 }
 0x8d0   : > { %v2814_v43 = vpop.f32.mrf.mxu2  ;;  %v2592_v56 = vmul.f32 1.442695, %v2589_v55 }
 0x8d2   : > { %v6458_v44 = vpop.f32.mrf.mxu1  ;;  %4804 = vpow2.f32 %v2592_v56 }
 0x8d3   : > { %v2928_v59 = vsel %vm1732_vm1, %v6458_v44, -inf }
 0x8d4   : > { %2817 = vmax.xlane.f32.xlu1 %v2816_v45 }
 0x8d8   : > { %v2924_v26 = vpop.f32.mrf.mxu2  ;;  %v4805_v58 = vpop.eup %4804 }
 0x8d9   : > { %v2931_v33 = vsel %vm1732_vm1, %v2924_v26, -inf  ;;  %v2597_v49 = vsel %vm1732_vm1, %v4805_v58, 0.0 }
 0x8da   : > { %2932 = vmax.xlane.f32.xlu2 %v2931_v33  ;;  %v2903_v47 = vpop.f32.mrf.mxu1 }
 0x8e0   : > { %v2926_v48 = vpop.f32.mrf.mxu2 }
 0x8f2   : > { %2861 = vrot.lane.b32.xlu2 %v6464_v51, %s5526_s10 }
 0x8f8   : > { %2598 = vadd.xlane.f32.xlu0 %v2597_v49 }
 0x900   : > { %2929 = vmax.xlane.f32.xlu0 %v2928_v59 }
 0x914   : > { %2840 = vrot.lane.b32.xlu0 %v6454_v42, %s5526_s10 }
 0x91f   : > { %v2702_v60 = vpop.xlane.xlu2 %2701 }
 0x920   : > { %v2706_v40 = vsub.f32 %v2668_v22, %v2702_v60 }
 0x922   : > { %v2708_v46 = vmul.f32 1.442695, %v2706_v40 }
 0x924   : > { %4806 = vpow2.f32 %v2708_v46 }
 0x92a   : > { %v6473_v61 = vpop.eup %4806 }
 0x92b   : > { %v2712_v54 = vsel %vm1732_vm1, %v6473_v61, 0.0 }
 0x92c   : > { %2713 = vadd.xlane.f32.xlu1 %v2712_v54 }
 0x92d   : > { %v2705_v50 = vpop.xlane.xlu0 %2704 }
 0x92e   : > { %v2707_v62 = vsub.f32 %v2696_v25, %v2705_v50 }
 0x930   : > { %v2710_v63 = vmul.f32 1.442695, %v2707_v62 }
 0x932   : > { %4808 = vpow2.f32 %v2710_v63 }
 0x938   : > { %v4809_v0 = vpop.eup %4808 }
 0x939   : > { %v2715_v1 = vsel %vm1732_vm1, %v4809_v0, 0.0 }
 0x93a   : > { %2716 = vadd.xlane.f32.xlu2 %v2715_v1 }
 0x93d   : > { %v2821_v5 = vpop.xlane.xlu2 %2820 }
 0x93e   : > { %v2823_v11 = vsub.f32 %v2812_v34, %v2821_v5 }
 0x93f   : > { %v2596_v2 = vpop.xlane.xlu1 %2595 }
 0x940   : > { %4810 = vrcp.f32 %v2596_v2  ;;  %v2727_v3 = vpop.permute.xlu0 %2726  ;;  %v2826_v14 = vmul.f32 1.442695, %v2823_v11 }
 0x941   : > { %v2732_v4 = vsel %vm1760_vm2, %v2727_v3, 0 }
 0x942   : > { %2741 = vmatpush.bf16.msra.mxu3 %v2732_v4 }
 0x945   : > { %2749 = vrot.lane.b32.xlu1 %v6464_v51, %s5527_s11 }
 0x946   : > { %v4811_v6 = vpop.eup %4810 }
 0x947   : > { %v2602_v7 = vmul.f32 %v4811_v6, %v4803_v37  ;;  %v2818_v8 = vpop.xlane.xlu1 %2817 }
 0x948   : > { %v2822_v9 = vsub.f32 %v2789_v31, %v2818_v8 }
 0x949   : > { %v2604_v12 = vpack.c.bf16 %v2602_v7, %v2602_v7 }
 0x94a   : > { %v2824_v13 = vmul.f32 1.442695, %v2822_v9 }
 0x94b   : > { %4284 = vmatmul.msk.bf16.vlgmr.msrb.gmra.mxu3 %vm1732_vm1, %v2604_v12 }
 0x94c   : > { %4812 = vpow2.f32 %v2824_v13 }
 0x94d   : > { %v2933_v53 = vpop.xlane.xlu2 %2932  ;;  %4814 = vpow2.f32 %v2826_v14 }
 0x94e   : > { %v2935_v15 = vsub.f32 %v2924_v26, %v2933_v53 }
 0x950   : > { %v2938_v16 = vmul.f32 1.442695, %v2935_v15 }
 0x952   : > { %v4813_v17 = vpop.eup %4812  ;;  %4816 = vpow2.f32 %v2938_v16 }
 0x953   : > { %v2828_v18 = vsel %vm1732_vm1, %v4813_v17, 0.0  ;;  %v4815_v19 = vpop.eup %4814 }
 0x954   : > { %2829 = vadd.xlane.f32.xlu2 %v2828_v18  ;;  %v2831_v23 = vsel %vm1732_vm1, %v4815_v19, 0.0 }
 0x955   : > { %v2862_v38 = vpop.permute.xlu2 %2861 }
 0x956   : > { %v2867_v48 = vsel %vm1760_vm2, %v2862_v38, 0 }
 0x958   : > { %v6483_v20 = vpop.eup %4816 }
 0x959   : > { %v2943_v22 = vsel %vm1732_vm1, %v6483_v20, 0.0 }
 0x95a   : > { %2944 = vadd.xlane.f32.xlu0 %v2943_v22  ;;  %v4562_v22 = vld [vmem:[%s6113_s27 + $0x38] sm:$0xff] }
 0x95b   : > { %3093 = vmatpush.bf16.msra.mxu1 %v4562_v22 }
 0x95c   : > { %2832 = vadd.xlane.f32.xlu2 %v2831_v23  ;;  %v4561_v23 = vld [vmem:[%s6113_s27 + $0x30] sm:$0xff] }
 0x95f   : > { %3094 = vmatpush.bf16.msra.mxu1 %v4561_v23  ;;  %v4366_v23 = vld [vmem:[%s6116_s3 + $0x48] sm:$0xf0] }
 0x96b   : > { %v2599_v24 = vpop.xlane.xlu0 %2598 }
 0x96c   : > { %4818 = vrcp.f32 %v2599_v24  ;;  %v4560_v24 = vld [vmem:[%s6113_s27 + $0x28] sm:$0xff] }
 0x96d   : > { %3095 = vmatpush.bf16.msra.mxu1 %v4560_v24 }
 0x972   : > { %v4819_v25 = vpop.eup %4818 }
 0x973   : > { %v2603_v27 = vmul.f32 %v4819_v25, %v4805_v58  ;;  %v2930_v28 = vpop.xlane.xlu0 %2929 }
 0x974   : > { %v2934_v29 = vsub.f32 %v6458_v44, %v2930_v28  ;;  %2952 = vrot.lane.b32.xlu2 %v6454_v42, %s5528_s0 }
 0x975   : > { %v2605_v30 = vpack.c.bf16 %v2603_v27, %v2603_v27 }
 0x976   : > { %v2936_v32 = vmul.f32 1.442695, %v2934_v29  ;;  %v4559_v29 = vld [vmem:[%s6113_s27 + $0x20] sm:$0xff] }
 0x977   : > { %4285 = vmatmul.msk.bf16.vlgmr.msra.gmra.mxu0 %vm1732_vm1, %v2605_v30  ;;  %3096 = vmatpush.bf16.msra.mxu1 %v4559_v29  ;;  %v4558_v30 = vld [vmem:[%s6113_s27 + $0x18] sm:$0xff] }
 0x978   : > { %4820 = vpow2.f32 %v2936_v32  ;;  %v4557_v32 = vld [vmem:[%s6113_s27 + $0x10] sm:$0xff] }
 0x97b   : > { %3097 = vmatpush.bf16.msra.mxu1 %v4558_v30  ;;  %v4358_v30 = vld [vmem:[%s6116_s3 + $0x38] sm:$0xf0] }
 0x97c   : > { %2973 = vrot.lane.b32.xlu2 %v6464_v51, %s5528_s0 }
 0x97e   : > { %v4821_v31 = vpop.eup %4820 }
 0x97f   : > { %v2940_v34 = vsel %vm1732_vm1, %v4821_v31, 0.0  ;;  %3098 = vmatpush.bf16.msra.mxu1 %v4557_v32 }
 0x980   : > { %2941 = vadd.xlane.f32.xlu1 %v2940_v34  ;;  %v4555_v34 = vld [vmem:[%s6113_s27] sm:$0xff] }
 0x986   : > { %v2841_v35 = vpop.permute.xlu0 %2840 }
 0x987   : > { %v2846_v36 = vsel %vm1760_vm2, %v2841_v35, 0 }
 0x988   : > { %2855 = vmatpush.bf16.msrb.mxu3 %v2846_v36 }
 0x99f   : > { %v2714_v37 = vpop.xlane.xlu1 %2713 }
 0x9a0   : > { %4822 = vrcp.f32 %v2714_v37 }
 0x9a6   : > { %v4823_v39 = vpop.eup %4822 }
 0x9a7   : > { %v2720_v42 = vmul.f32 %v4823_v39, %v6473_v61 }
 0x9a9   : > { %v2722_v43 = vpack.c.bf16 %v2720_v42, %v2720_v42 }
 0x9ab   : > { %4288 = vmatmul.msk.bf16.vlgmr.msra.gmra.mxu3 %vm1732_vm1, %v2722_v43 }
 0x9ad   : > { %v2717_v44 = vpop.xlane.xlu2 %2716 }
 0x9ae   : > { %4824 = vrcp.f32 %v2717_v44 }
 0x9b4   : > { %v4825_v45 = vpop.eup %4824 }
 0x9b5   : > { %v2721_v26 = vmul.f32 %v4825_v45, %v4809_v0 }
 0x9b7   : > { %v2750_v33 = vpop.permute.xlu1 %2749  ;;  %v2723_v52 = vpack.c.bf16 %v2721_v26, %v2721_v26 }
 0x9b8   : > { %v2755_v47 = vsel %vm1760_vm2, %v2750_v33, 0 }
 0x9b9   : > { %2764 = vmatpush.bf16.msrb.mxu0 %v2755_v47 }
 0x9bc   : > { %4289 = vmatmul.msk.bf16.vlgmr.msrb.gmra.mxu0 %vm1732_vm1, %v2723_v52 }
 0x9bd   : > { %2876 = vmatpush.bf16.msra.mxu0 %v2867_v48 }
 0x9c7   : > { %v2830_v55 = vpop.xlane.xlu2 %2829 }
 0x9c8   : > { %4826 = vrcp.f32 %v2830_v55 }
 0x9cd   : > { %v2945_v54 = vpop.xlane.xlu0 %2944 }
 0x9ce   : > { %v4827_v56 = vpop.eup %4826  ;;  %v6501_v57 = vpop.f32.mrf.mxu3 }
 0x9cf   : > { %v2836_v51 = vmul.f32 %v4827_v56, %v4813_v17  ;;  %v2833_v58 = vpop.xlane.xlu2 %2832 }
 0x9d0   : > { %4828 = vrcp.f32 %v2833_v58 }
 0x9d1   : > { %v2838_v49 = vpack.c.bf16 %v2836_v51, %v2836_v51  ;;  %4830 = vrcp.f32 %v2945_v54  ;;  %v4758_v51 = vld [vmem:[%s6766_s29] ss:$0 sm:$0xff] }
 0x9d3   : > { %4292 = vmatmul.msk.bf16.vlgmr.msrb.gmra.mxu3 %vm1732_vm1, %v2838_v49 }
 0x9d6   : > { %v4829_v59 = vpop.eup %4828  ;;  %v2623_v60 = vpop.f32.mrf.mxu3 }
 0x9d7   : > { %v2837_v40 = vmul.f32 %v4829_v59, %v4815_v19  ;;  %v2953_v46 = vpop.permute.xlu2 %2952  ;;  %v4831_v0 = vpop.eup %4830 }
 0x9d8   : > { %v2958_v61 = vsel %vm1760_vm2, %v2953_v46, 0  ;;  %v2949_v1 = vmul.f32 %v4831_v0, %v6483_v20  ;;  %v4388_v0 = vld [vmem:[%s6116_s3 + $0x70] sm:$0xf] }
 0x9d9   : > { %v2839_v50 = vpack.c.bf16 %v2837_v40, %v2837_v40  ;;  %2967 = vmatpush.bf16.msra.mxu3 %v2958_v61 }
 0x9da   : > { %v2951_v2 = vpack.c.bf16 %v2949_v1, %v2949_v1  ;;  %v4578_v1 = vld [vmem:[%s6116_s3 + $0x74] sm:$0xf0] }
 0x9db   : > { %4293 = vmatmul.msk.bf16.vlgmr.msra.gmra.mxu0 %vm1732_vm1, %v2839_v50 }
 0x9df   : > { %v2974_v62 = vpop.permute.xlu2 %2973 }
 0x9e0   : > { %v2979_v63 = vsel %vm1760_vm2, %v2974_v62, 0 }
 0x9e1   : > { %2988 = vmatpush.bf16.msrb.mxu0 %v2979_v63 }
 0x9eb   : > { %4297 = vmatmul.msk.bf16.vlgmr.msrb.gmra.mxu0 %vm1732_vm1, %v2951_v2  ;;  %v4577_v2 = vld [vmem:[%s6116_s3 + $0x74] sm:$0xf] }
 0x9f3   : > { %v2942_v3 = vpop.xlane.xlu1 %2941 }
 0x9f4   : > { %4832 = vrcp.f32 %v2942_v3  ;;  %v2640_v4 = vpop.f32.mrf.mxu0  ;;  %v4389_v3 = vor.u32 %v4578_v1, %v4388_v0  ;;  %v4592_v0 = vld [vmem:[%s6118_s17 + $0x68] sm:$0xff] }
 0x9f6   : > { %3264 = vmatpush.bf16.msra.mxu2 %v4389_v3  ;;  %v4583_v3 = vld [vmem:[%s6118_s17 + $0x20] sm:$0xff] }
 0x9fa   : > { %v4833_v5 = vpop.eup %4832 }
 0x9fb   : > { %v2948_v6 = vmul.f32 %v4833_v5, %v4821_v31  ;;  %v4556_v31 = vld [vmem:[%s6113_s27 + $0x8] sm:$0xff]  ;;  %s6771_s27 = scalar_lea.vmem [#allocation25], %s6088_s8 }
 0x9fc   : > { %v2642_v7 = vpop.f32.mrf.mxu0  ;;  %3099 = vmatpush.bf16.msra.mxu1 %v4556_v31  ;;  %v4348_v31 = vld [vmem:[%s6116_s3 + $0x20] sm:$0xf] }
 0x9fd   : > { %v2950_v8 = vpack.c.bf16 %v2948_v6, %v2948_v6  ;;  %v4380_v6 = vld [vmem:[%s6116_s3 + $0x60] sm:$0xf]  ;;  %v4576_v7 = vld [vmem:[%s6116_s3 + $0x64] sm:$0xf0] }
 0x9ff   : > { %4296 = vmatmul.msk.bf16.vlgmr.msra.gmra.mxu3 %vm1732_vm1, %v2950_v8  ;;  %v4575_v8 = vld [vmem:[%s6116_s3 + $0x64] sm:$0xf] }
 0xa00   : > { %3100 = vmatpush.bf16.msra.mxu1 %v4555_v34  ;;  %v4568_v34 = vld [vmem:[%s6116_s3 + $0x24] sm:$0xf0] }
 0xa2e   : > { %v2743_v9 = vpop.f32.mrf.mxu3 }
 0xa36   : > { %v2745_v11 = vpop.f32.mrf.mxu3 }
 0xa37   : > { %v4382_v11 = vld [vmem:[%s6116_s3 + $0x68] sm:$0xf0] }
 0xa39   : > { %v2766_v12 = vpop.f32.mrf.mxu0 }
 0xa3a   : > { %v4739_v13 = vpack.i.bf16 %v2766_v12, %v2743_v9  ;;  %v4381_v9 = vor.u32 %v4576_v7, %v4380_v6  ;;  %v4385_v12 = vor.u32 %v4575_v8, %v4382_v11 }
 0xa3c   : > { %4740 = vrot.lane.b32.xlu2 %v4739_v13, %s5528_s0  ;;  %3265 = vmatpush.bf16.msra.mxu2 %v4381_v9  ;;  %v4372_v13 = vld [vmem:[%s6116_s3 + $0x50] sm:$0xf] }
 0xa41   : > { %v2768_v14 = vpop.f32.mrf.mxu0 }
 0xa42   : > { %v4574_v14 = vld [vmem:[%s6116_s3 + $0x54] sm:$0xf0] }
 0xa56   : > { %v2857_v53 = vpop.f32.mrf.mxu3 }
 0xa58   : > { %v2878_v15 = vpop.f32.mrf.mxu0 }
 0xa59   : > { %v4744_v16 = vpack.i.bf16 %v2878_v15, %v2857_v53  ;;  %v4573_v53 = vld [vmem:[%s6116_s3 + $0x54] sm:$0xf]  ;;  %v4373_v15 = vor.u32 %v4574_v14, %v4372_v13 }
 0xa5b   : > { %4745 = vrot.lane.b32.xlu1 %v4744_v16, %s5526_s10  ;;  %v4374_v16 = vld [vmem:[%s6116_s3 + $0x58] sm:$0xf0]  ;;  %3266 = vmatpush.bf16.msra.mxu2 %v4373_v15 }
 0xa5e   : > { %v2859_v17 = vpop.f32.mrf.mxu3 }
 0xa5f   : > { %v4377_v17 = vor.u32 %v4573_v53, %v4374_v16  ;;  %v4759_v53 = vld [vmem:[%s6767_s6] ss:$0 sm:$0xff] }
 0xa60   : > { %v2880_v18 = vpop.f32.mrf.mxu0 }
 0xa61   : > { %v4364_v18 = vld [vmem:[%s6116_s3 + $0x40] sm:$0xf] }
 0xa68   : > { %v2990_v19 = vpop.f32.mrf.mxu0 }
 0xa70   : > { %v2992_v20 = vpop.f32.mrf.mxu0 }
 0xa71   : > { %v4571_v20 = vld [vmem:[%s6116_s3 + $0x44] sm:$0xf] }
 0xa72   : > { %v4369_v24 = vor.u32 %v4571_v20, %v4366_v23 }
 0xa82   : > { %v2969_v25 = vpop.f32.mrf.mxu3 }
 0xa83   : > { %v4749_v27 = vpack.i.bf16 %v2990_v19, %v2969_v25  ;;  %v4572_v19 = vld [vmem:[%s6116_s3 + $0x44] sm:$0xf0]  ;;  %v4356_v25 = vld [vmem:[%s6116_s3 + $0x30] sm:$0xf] }
 0xa84   : > { %v4365_v22 = vor.u32 %v4572_v19, %v4364_v18  ;;  %v4760_v19 = vld [vmem:[%s6768_s14] ss:$0 sm:$0xff] }
 0xa85   : > { %4750 = vrot.lane.b32.xlu2 %v4749_v27, %s5527_s11  ;;  %v4570_v27 = vld [vmem:[%s6116_s3 + $0x34] sm:$0xf0] }
 0xa86   : > { %3267 = vmatpush.bf16.msra.mxu2 %v4365_v22  ;;  %v4357_v29 = vor.u32 %v4570_v27, %v4356_v25  ;;  %v4590_v25 = vld [vmem:[%s6118_s17 + $0x58] sm:$0xff]  ;;  %v4581_v27 = vld [vmem:[%s6118_s17 + $0x10] sm:$0xff] }
 0xa8a   : > { %v2971_v28 = vpop.f32.mrf.mxu3  ;;  %3268 = vmatpush.bf16.msra.mxu2 %v4357_v29  ;;  %v4588_v29 = vld [vmem:[%s6118_s17 + $0x48] sm:$0xff] }
 0xa8b   : > { %v4569_v28 = vld [vmem:[%s6116_s3 + $0x34] sm:$0xf] }
 0xa8c   : > { %v4361_v32 = vor.u32 %v4569_v28, %v4358_v30  ;;  %v4580_v28 = vld [vmem:[%s6118_s17 + $0x8] sm:$0xff]  ;;  %v4579_v30 = vld [vmem:[%s6118_s17] sm:$0xff] }
 0xa96   : > { %v4741_v35 = vpop.permute.xlu2 %4740 }
 0xa97   : > { %v4743_v37 = vunpack.i.h.bf16 %v4741_v35  ;;  %v4742_v38 = vunpack.i.l.bf16 %v4741_v35  ;;  %v4567_v35 = vld [vmem:[%s6116_s3 + $0x24] sm:$0xf] }
 0xa99   : > { %v3019_v44 = vsel %vm1693_vm0, %v2640_v4, %v4743_v37  ;;  %v3018_v45 = vsel %vm1693_vm0, %v6501_v57, %v4742_v38  ;;  %v4390_v4 = vld [vmem:[%s6116_s3 + $0x78] sm:$0xf0]  ;;  %v4350_v37 = vld [vmem:[%s6116_s3 + $0x28] sm:$0xf0] }
 0xa9a   : > { %v4393_v5 = vor.u32 %v4577_v2, %v4390_v4  ;;  %v4353_v38 = vor.u32 %v4567_v35, %v4350_v37  ;;  %v4591_v4 = vld [vmem:[%s6118_s17 + $0x60] sm:$0xff] }
 0xa9c   : > { %3278 = vmatpush.bf16.msrb.mxu3 %v4393_v5 }
 0xaa0   : > { %3279 = vmatpush.bf16.msrb.mxu3 %v4385_v12 }
 0xaa4   : > { %3280 = vmatpush.bf16.msrb.mxu3 %v4377_v17 }
 0xaa8   : > { %3281 = vmatpush.bf16.msrb.mxu3 %v4369_v24  ;;  %v4582_v24 = vld [vmem:[%s6118_s17 + $0x18] sm:$0xff] }
 0xaac   : > { %3282 = vmatpush.bf16.msrb.mxu3 %v4361_v32  ;;  %v4587_v32 = vld [vmem:[%s6118_s17 + $0x40] sm:$0xff] }
 0xab0   : > { %3283 = vmatpush.bf16.msrb.mxu3 %v4353_v38 }
 0xacd   : > { %v4746_v36 = vpop.permute.xlu1 %4745 }
 0xace   : > { %v4748_v39 = vunpack.i.h.bf16 %v4746_v36  ;;  %v4747_v42 = vunpack.i.l.bf16 %v4746_v36  ;;  %v4349_v36 = vor.u32 %v4568_v34, %v4348_v31  ;;  %v3178_v31 = vld [vmem:[%s6136_s7] sm:$0x3] }
 0xacf   : > { %v3181_v37 = vperm.slane %v3178_v31, 1 }
 0xad0   : > { %v3021_v47 = vsel %vm2172_vm3, %v3019_v44, %v4748_v39  ;;  %v3020_v48 = vsel %vm2172_vm3, %v3018_v45, %v4747_v42  ;;  %3269 = vmatpush.bf16.msra.mxu2 %v4349_v36  ;;  %v4340_v39 = vld [vmem:[%s6116_s3 + $0x10] sm:$0xf]  ;;  %v4566_v42 = vld [vmem:[%s6116_s3 + $0x14] sm:$0xf0]  ;;  %v4342_v45 = vld [vmem:[%s6116_s3 + $0x18] sm:$0xf0] }
 0xad1   : > { %v4341_v44 = vor.u32 %v4566_v42, %v4340_v39  ;;  %v3180_v36 = vperm.slane %v3178_v31, 0 }
 0xad4   : > { %3270 = vmatpush.bf16.msra.mxu2 %v4341_v44 }
 0xadf   : > { %v4751_v43 = vpop.permute.xlu2 %4750 }
 0xae0   : > { %v4753_v26 = vunpack.i.h.bf16 %v4751_v43  ;;  %v4752_v33 = vunpack.i.l.bf16 %v4751_v43  ;;  %v4565_v43 = vld [vmem:[%s6116_s3 + $0x14] sm:$0xf] }
 0xae2   : > { %v3023_v52 = vsel %vm2175_vm4, %v3021_v47, %v4753_v26  ;;  %v3022_v55 = vsel %vm2175_vm4, %v3020_v48, %v4752_v33  ;;  %v4345_v26 = vor.u32 %v4565_v43, %v4342_v45  ;;  %v4332_v33 = vld [vmem:[%s6116_s3] sm:$0xf]  ;;  %v4564_v47 = vld [vmem:[%s6116_s3 + $0x4] sm:$0xf0]  ;;  %v4563_v48 = vld [vmem:[%s6116_s3 + $0x4] sm:$0xf] }
 0xae3   : > { %v3024_v56 = vpack.c.bf16 %v3023_v52, %v3022_v55  ;;  %v4333_v55 = vor.u32 %v4564_v47, %v4332_v33 }
 0xae4   : > { %3284 = vmatpush.bf16.msrb.mxu3 %v4345_v26 }
 0xae5   : > { %3101 = vmatmul.bf16.vlgmr.msra.gmra.mxu1 %v3024_v56  ;;  %v4334_v56 = vld [vmem:[%s6116_s3 + $0x8] sm:$0xf0]  ;;  %3271 = vmatpush.bf16.msra.mxu2 %v4333_v55 }
 0xb62   : > { %v3102_v58 = vpop.f32.mrf.mxu1 }
 0xb63   : > { %v3103_v49 = vadd.f32 %v4758_v51, %v3102_v58  ;;  %v4337_v58 = vor.u32 %v4563_v48, %v4334_v56  ;;  %v4761_v56 = vld [vmem:[%s6769_s2] ss:$0 sm:$0xff] }
 0xb65   : > { %v3107_v59 = vadd.f32 %v3103_v49, %v6403_v10  ;;  %3285 = vmatpush.bf16.msrb.mxu3 %v4337_v58 }
 0xb67   : > { %3109 = vadd.xlane.f32.xlu0 %v3107_v59 }
 0xb6a   : > { %v3104_v57 = vpop.f32.mrf.mxu1 }
 0xb6b   : > { %v3105_v60 = vadd.f32 %v4758_v51, %v3104_v57  ;;  %v4594_v57 = vld [vmem:[%s6118_s17 + $0x78] sm:$0xff] }
 0xb6c   : > { %3444 = vmatpush.bf16.msrb.mxu1 %v4594_v57 }
 0xb6d   : > { %v3108_v40 = vadd.f32 %v3105_v60, %v6405_v41 }
 0xb6f   : > { %3111 = vadd.xlane.f32.xlu2 %v3108_v40 }
 0xbda   : > { %v3110_v46 = vpop.xlane.xlu0 %3109 }
 0xbdb   : > { %v3113_v61 = vmul.f32 %v3110_v46, %v6352_v21  ;;  %v4585_v46 = vld [vmem:[%s6118_s17 + $0x30] sm:$0xff] }
 0xbdd   : > { %v6533_v54 = vsub.f32 %v3107_v59, %v3113_v61  ;;  %v4586_v59 = vld [vmem:[%s6118_s17 + $0x38] sm:$0xff]  ;;  %v4593_v61 = vld [vmem:[%s6118_s17 + $0x70] sm:$0xff] }
 0xbde   : > { %3430 = vmatpush.bf16.msra.mxu0 %v4586_v59  ;;  %3445 = vmatpush.bf16.msrb.mxu1 %v4593_v61 }
 0xbdf   : > { %v3117_v50 = vmul.f32 %v6533_v54, %v6533_v54 }
 0xbe1   : > { %3119 = vadd.xlane.f32.xlu0 %v3117_v50 }
 0xbe2   : > { %v3112_v10 = vpop.xlane.xlu2 %3111  ;;  %3431 = vmatpush.bf16.msra.mxu0 %v4585_v46  ;;  %3446 = vmatpush.bf16.msrb.mxu1 %v4592_v0 }
 0xbe3   : > { %v3114_v62 = vmul.f32 %v3112_v10, %v6352_v21 }
 0xbe5   : > { %v6538_v63 = vsub.f32 %v3108_v40, %v3114_v62 }
 0xbe6   : > { %3447 = vmatpush.bf16.msrb.mxu1 %v4591_v4 }
 0xbe7   : > { %v3118_v41 = vmul.f32 %v6538_v63, %v6538_v63 }
 0xbe9   : > { %3121 = vadd.xlane.f32.xlu0 %v3118_v41  ;;  %v4584_v41 = vld [vmem:[%s6118_s17 + $0x28] sm:$0xff] }
 0xbea   : > { %3432 = vmatpush.bf16.msra.mxu0 %v4584_v41  ;;  %3448 = vmatpush.bf16.msrb.mxu1 %v4590_v25 }
 0xbee   : > { %3433 = vmatpush.bf16.msra.mxu0 %v4583_v3 }
 0xbf2   : > { %3434 = vmatpush.bf16.msra.mxu0 %v4582_v24 }
 0xbf6   : > { %3435 = vmatpush.bf16.msra.mxu0 %v4581_v27 }
 0xbfa   : > { %3436 = vmatpush.bf16.msra.mxu0 %v4580_v28 }
 0xbfe   : > { %3437 = vmatpush.bf16.msra.mxu0 %v4579_v30 }
 0xc54   : > { %v3120_v52 = vpop.xlane.xlu0 %3119 }
 0xc55   : > { %v3123_v51 = vmul.f32 %v3120_v52, %v6352_v21 }
 0xc57   : > { %v3125_v49 = vadd.f32 1e-05, %v3123_v51 }
 0xc59   : > { %4834 = vrsqrt.f32 %v3125_v49  ;;  %vm3133_vm13 = vweird.f32 %v3125_v49 }
 0xc5c   : > { %v3122_v60 = vpop.xlane.xlu0 %3121 }
 0xc5d   : > { %v3124_v40 = vmul.f32 %v3122_v60, %v6352_v21 }
 0xc5f   : > { %v4835_v50 = vpop.eup %4834  ;;  %v3126_v10 = vadd.f32 1e-05, %v3124_v40 }
 0xc60   : > { %v3128_v62 = vmul.f32 %v4835_v50, %v3125_v49  ;;  %vm3134_vm12 = vweird.f32 %v4835_v50 }
 0xc61   : > { %4836 = vrsqrt.f32 %v3126_v10  ;;  %vm3135_vm14 = vmor %vm3133_vm13, %vm3134_vm12  ;;  %vm3143_vm0 = vweird.f32 %v3126_v10 }
 0xc62   : > { %v3129_v1 = vmul.f32 %v4835_v50, %v3128_v62 }
 0xc64   : > { %v3130_v2 = vmul.f32 0.5, %v3129_v1 }
 0xc66   : > { %v3131_v5 = vsub.f32 1.5, %v3130_v2 }
 0xc67   : > { %v4837_v6 = vpop.eup %4836 }
 0xc68   : > { %v3132_v7 = vmul.f32 %v4835_v50, %v3131_v5  ;;  %v3138_v8 = vmul.f32 %v4837_v6, %v3126_v10  ;;  %vm3144_vm15 = vweird.f32 %v4837_v6 }
 0xc69   : > { %vm3145_vm1 = vmor %vm3143_vm0, %vm3144_vm15 }
 0xc6a   : > { %v3139_v9 = vmul.f32 %v4837_v6, %v3138_v8  ;;  %v3136_v11 = vsel %vm3135_vm14, %v4835_v50, %v3132_v7 }
 0xc6b   : > { %v3147_v14 = vmul.f32 %v3136_v11, %v6533_v54 }
 0xc6c   : > { %v3140_v12 = vmul.f32 0.5, %v3139_v9 }
 0xc6d   : > { %v3153_v18 = vmul.f32 %v4759_v53, %v3147_v14 }
 0xc6e   : > { %v3141_v13 = vsub.f32 1.5, %v3140_v12 }
 0xc6f   : > { %v3159_v22 = vadd.f32 %v4760_v19, %v3153_v18 }
 0xc70   : > { %v3142_v15 = vmul.f32 %v4837_v6, %v3141_v13 }
 0xc72   : > { %v3146_v16 = vsel %vm3145_vm1, %v4837_v6, %v3142_v15 }
 0xc73   : > { %v3148_v17 = vmul.f32 %v3146_v16, %v6538_v63  ;;  %v4589_v63 = vld [vmem:[%s6118_s17 + $0x50] sm:$0xff]  ;;  %s6773_s17 = sld [smem:[#allocation59_spill]] (!%p4458_p5) }
 0xc74   : > { %3449 = vmatpush.bf16.msrb.mxu1 %v4589_v63 }
 0xc75   : > { %v3154_v20 = vmul.f32 %v4759_v53, %v3148_v17 }
 0xc77   : > { %v3160_v23 = vadd.f32 %v4760_v19, %v3154_v20  ;;  %v4762_v19 = vld [vmem:[%s6770_s30] ss:$0 sm:$0xff] }
 0xc78   : > { %3450 = vmatpush.bf16.msrb.mxu1 %v4588_v29 }
 0xc79   : > { %v3161_v54 = vpack.c.bf16 %v3160_v23, %v3159_v22 }
 0xc7b   : > { %3272 = vmatmul.bf16.vlgmr.msra.gmra.mxu2 %v3161_v54  ;;  %3286 = vmatmul.bf16.vlgmr.msrb.gmra.mxu3 %v3161_v54 }
 0xc7c   : > { %3451 = vmatpush.bf16.msrb.mxu1 %v4587_v32 }
 0xcfe   : > { %v3273_v34 = vpop.f32.mrf.mxu2  ;;  %v3287_v35 = vpop.f32.mrf.mxu3 }
 0xcff   : > { %v3274_v38 = vadd.f32 %v3273_v34, %v3180_v36  ;;  %v3288_v39 = vadd.f32 %v3287_v35, %v3181_v37 }
 0xd01   : > { %v3292_v26 = vmax.f32 %v3274_v38, 0.0  ;;  %v3293_v33 = vmax.f32 %v3288_v39, 0.0 }
 0xd06   : > { %v3275_v42 = vpop.f32.mrf.mxu2  ;;  %v3289_v43 = vpop.f32.mrf.mxu3 }
 0xd07   : > { %v3276_v44 = vadd.f32 %v3275_v42, %v3180_v36  ;;  %v3290_v45 = vadd.f32 %v3289_v43, %v3181_v37 }
 0xd09   : > { %v3294_v47 = vmax.f32 %v3276_v44, 0.0  ;;  %v3295_v48 = vmax.f32 %v3290_v45, 0.0 }
 0xd0b   : > { %v3296_v52 = vpack.c.bf16 %v3294_v47, %v3292_v26  ;;  %v3297_v55 = vpack.c.bf16 %v3295_v48, %v3293_v33 }
 0xd0d   : > { %3438 = vmatmul.bf16.vlgmr.msra.gmra.mxu0 %v3296_v52  ;;  %3452 = vmatmul.bf16.vlgmr.msrb.gmra.mxu1 %v3297_v55 }
 0xd8a   : > { %v3439_v51 = vpop.f32.mrf.mxu0  ;;  %v3453_v58 = vpop.f32.mrf.mxu1 }
 0xd8b   : > { %v3440_v49 = vadd.f32 %v4761_v56, %v3439_v51 }
 0xd8d   : > { %v3454_v59 = vadd.f32 %v3453_v58, %v3440_v49 }
 0xd8f   : > { %v3458_v57 = vadd.f32 %v3454_v59, %v3159_v22 }
 0xd91   : > { %3460 = vadd.xlane.f32.xlu0 %v3458_v57 }
 0xd92   : > { %v3441_v60 = vpop.f32.mrf.mxu0  ;;  %v3455_v46 = vpop.f32.mrf.mxu1 }
 0xd93   : > { %v3442_v40 = vadd.f32 %v4761_v56, %v3441_v60 }
 0xd95   : > { %v3456_v61 = vadd.f32 %v3455_v46, %v3442_v40 }
 0xd97   : > { %v3459_v50 = vadd.f32 %v3456_v61, %v3160_v23 }
 0xd99   : > { %3462 = vadd.xlane.f32.xlu1 %v3459_v50 }
 0xe04   : > { %v3461_v10 = vpop.xlane.xlu0 %3460 }
 0xe05   : > { %v3464_v62 = vmul.f32 %v3461_v10, %v6352_v21 }
 0xe07   : > { %v3466_v41 = vsub.f32 %v3458_v57, %v3464_v62 }
 0xe09   : > { %v3468_v0 = vmul.f32 %v3466_v41, %v3466_v41 }
 0xe0b   : > { %3470 = vadd.xlane.f32.xlu0 %v3468_v0 }
 0xe0c   : > { %v3463_v1 = vpop.xlane.xlu1 %3462 }
 0xe0d   : > { %v3465_v2 = vmul.f32 %v3463_v1, %v6352_v21 }
 0xe0f   : > { %v3467_v3 = vsub.f32 %v3459_v50, %v3465_v2 }
 0xe11   : > { %v3469_v4 = vmul.f32 %v3467_v3, %v3467_v3 }
 0xe13   : > { %3472 = vadd.xlane.f32.xlu0 %v3469_v4 }
 0xe7e   : > { %v3471_v5 = vpop.xlane.xlu0 %3470 }
 0xe7f   : > { %v3474_v6 = vmul.f32 %v3471_v5, %v6352_v21 }
 0xe81   : > { %v3476_v7 = vadd.f32 1e-05, %v3474_v6 }
 0xe83   : > { %4838 = vrsqrt.f32 %v3476_v7  ;;  %vm3484_vm3 = vweird.f32 %v3476_v7 }
 0xe86   : > { %v3473_v8 = vpop.xlane.xlu0 %3472 }
 0xe87   : > { %v3475_v9 = vmul.f32 %v3473_v8, %v6352_v21  ;;  %v4763_v21 = vld [vmem:[%s6771_s27] ss:$0 sm:$0xff] }
 0xe89   : > { %v4839_v11 = vpop.eup %4838  ;;  %v3477_v12 = vadd.f32 1e-05, %v3475_v9 }
 0xe8a   : > { %v3479_v13 = vmul.f32 %v4839_v11, %v3476_v7  ;;  %vm3485_vm2 = vweird.f32 %v4839_v11 }
 0xe8b   : > { %4840 = vrsqrt.f32 %v3477_v12  ;;  %vm3486_vm4 = vmor %vm3484_vm3, %vm3485_vm2  ;;  %vm3494_vm6 = vweird.f32 %v3477_v12 }
 0xe8c   : > { %v3480_v14 = vmul.f32 %v4839_v11, %v3479_v13 }
 0xe8e   : > { %v3481_v53 = vmul.f32 0.5, %v3480_v14 }
 0xe90   : > { %v3482_v15 = vsub.f32 1.5, %v3481_v53 }
 0xe91   : > { %v4841_v16 = vpop.eup %4840 }
 0xe92   : > { %v3483_v17 = vmul.f32 %v4839_v11, %v3482_v15  ;;  %v3489_v18 = vmul.f32 %v4841_v16, %v3477_v12  ;;  %vm3495_vm5 = vweird.f32 %v4841_v16 }
 0xe93   : > { %vm3496_vm7 = vmor %vm3494_vm6, %vm3495_vm5 }
 0xe94   : > { %v3487_v20 = vsel %vm3486_vm4, %v4839_v11, %v3483_v17  ;;  %v3490_v22 = vmul.f32 %v4841_v16, %v3489_v18 }
 0xe95   : > { %v3498_v23 = vmul.f32 %v3487_v20, %v3466_v41 }
 0xe96   : > { %v3491_v54 = vmul.f32 0.5, %v3490_v22 }
 0xe97   : > { %v3504_v24 = vmul.f32 %v4762_v19, %v3498_v23 }
 0xe98   : > { %v3492_v25 = vsub.f32 1.5, %v3491_v54 }
 0xe99   : > { %v3510_v27 = vadd.f32 %v4763_v21, %v3504_v24 }
 0xe9a   : > { %v3493_v63 = vmul.f32 %v4841_v16, %v3492_v25 }
 0xe9b   : > { %3512 = vst [vmem:[#allocation2] sm:$0xff] %v3510_v27 }
 0xe9c   : > { %v3497_v28 = vsel %vm3496_vm7, %v4841_v16, %v3493_v63 }
 0xe9d   : > { %v3499_v29 = vmul.f32 %v3497_v28, %v3467_v3 }
 0xe9f   : > { %v3505_v30 = vmul.f32 %v4762_v19, %v3499_v29  ;;  %3517 = sbr.rel (%p4458_p5) target bundleno = 3917 (0xf4d), region = 216 }
 0xea1   : > { %v3511_v32 = vadd.f32 %v4763_v21, %v3505_v30 }
 0xea3   : > { %3513 = vst [vmem:[#allocation2 + $0x8] sm:$0xff] %v3511_v32 }
 0xea4   : > { %v4602_v31 = vld [vmem:[#allocation26 + $0x38] sm:$0xff]  ;;  %v4601_v34 = vld [vmem:[#allocation26 + $0x30] sm:$0xff]  ;;  %v4600_v35 = vld [vmem:[#allocation26 + $0x28] sm:$0xff]  ;;  %v3518_v43 = vpack.c.bf16 %v3511_v32, %v3510_v27 }
 0xea5   : > { %3587 = vmatpush.bf16.msra.mxu0 %v4602_v31  ;;  %v4599_v36 = vld [vmem:[#allocation26 + $0x20] sm:$0xff]  ;;  %v4598_v37 = vld [vmem:[#allocation26 + $0x18] sm:$0xff]  ;;  %v4597_v38 = vld [vmem:[#allocation26 + $0x10] sm:$0xff] }
 0xea6   : > { %v4596_v39 = vld [vmem:[#allocation26 + $0x8] sm:$0xff]  ;;  %v4595_v42 = vld [vmem:[#allocation26] sm:$0xff]  ;;  %v4842_v44 = vld [vmem:[%s6773_s17] ss:$0 sm:$0xff] }
 0xea9   : > { %3588 = vmatpush.bf16.msra.mxu0 %v4601_v34 }
 0xead   : > { %3589 = vmatpush.bf16.msra.mxu0 %v4600_v35 }
 0xeb1   : > { %3590 = vmatpush.bf16.msra.mxu0 %v4599_v36 }
 0xeb5   : > { %3591 = vmatpush.bf16.msra.mxu0 %v4598_v37 }
 0xeb9   : > { %3592 = vmatpush.bf16.msra.mxu0 %v4597_v38 }
 0xebd   : > { %3593 = vmatpush.bf16.msra.mxu0 %v4596_v39 }
 0xec1   : > { %3594 = vmatpush.bf16.msra.mxu0 %v4595_v42 }
 0xec4   : > { %3595 = vmatmul.bf16.vlgmr.msra.gmra.mxu0 %v3518_v43 }
 0xf41   : > { %v3596_v45 = vpop.f32.mrf.mxu0 }
 0xf42   : > { %v3597_v26 = vadd.f32 %v4842_v44, %v3596_v45 }
 0xf44   : > { %3601 = vst [vmem:[%s6774_s22] sm:$0xff] %v3597_v26 }
 0xf49   : > { %v3598_v33 = vpop.f32.mrf.mxu0 }
 0xf4a   : > { %v3599_v47 = vadd.f32 %v4842_v44, %v3598_v33 }
 0xf4c   : > { %3602 = vst [vmem:[%s6774_s22 + $0x8] sm:$0xff] %v3599_v47 }
 0xf4d PF: > { %s6775_s30 = sld [smem:[#allocation34_spill]] }
 0xf4e   : > { %s6776_s29 = sld [smem:[#allocation31_spill]] }
 0xf4f   : > { %s6777_s2 = sld [smem:[#allocation32_spill]] }
 0xf50   : > { %s6778_s6 = sld [smem:[#allocation35_spill]] }
 0xf53   : > { %p34_p8 = scmp.ge.s32.totalorder %s6775_s30, 4  }
 0xf55   :  { %36 = sbr.rel (!%p34_p8) target bundleno = 27 (0x1b), region = 376 }
 0xf5a   :  { %3614 = vsyncpa [#allocation4], 1 }
 0xf5b   :  { %3616 = vsyncpa [#allocation4 + $0x1], 1 }
 0xf5c   :  { %3617 = vsyncpa [#allocation6], 1 }

</bundles_post_ra>
